<compile_context>
chip_gen: v5e
topology: v5e:2x2
jax: 0.10.0
libtpu: 0.0.40
codegen_flags: <defaults>
</compile_context>

<pallas_src>
import jax
import jax.numpy as jnp
from jax.experimental import pallas as pl
from jax.experimental.pallas import tpu as pltpu


def _round_up(x, m):
    return (x + m - 1) // m * m


def _vmem_limit_bytes():
    cap = 128 * 1024 * 1024
    try:
        info = pltpu.get_tpu_info()
        cap = int(getattr(info, "vmem_capacity_bytes", cap))
    except Exception:
        pass
    # Never request more than half of physical VMEM (v7x has only 64 MiB/TC),
    # capped at 64 MiB on the big-VMEM generations.
    return int(min(64 * 1024 * 1024, max(16 * 1024 * 1024, cap // 2)))


_COMPILER_PARAMS = pltpu.CompilerParams(
    dimension_semantics=("parallel",),
    vmem_limit_bytes=_vmem_limit_bytes(),
)


# ----------------------------------------------------------------------------
# Pallas kernels
# ----------------------------------------------------------------------------
def _make_matmul_bn_kernel(relu):
    def kernel(x_ref, w_ref, b_ref, o_ref):
        # x_ref: (TM, Cin) bf16, w_ref: (Cin, Cout) bf16 (BN scale pre-folded),
        # b_ref: (1, Cout) f32, o_ref: (TM, Cout)
        acc = jnp.dot(x_ref[...], w_ref[...], preferred_element_type=jnp.float32)
        acc = acc + b_ref[...]
        if relu:
            acc = jnp.maximum(acc, 0.0)
        o_ref[...] = acc.astype(o_ref.dtype)
    return kernel


def _conv7_w_kernel(x_ref, w_ref, b_ref, o_ref):
    # 7-tap conv along the inner spatial dim (W).  Taps are concatenated along
    # the lane dim so the whole tile is ONE MXU matmul with K = 7*Cin.
    # x_ref: (TR, Sp+6, Cin) bf16, w_ref: (7*Cin, Cout) bf16,
    # b_ref: (1, Cout) f32, o_ref: (TR, Sp, Cout)
    TR, S, Cout = o_ref.shape
    Cin = x_ref.shape[2]
    taps = [x_ref[:, t:t + S, :] for t in range(7)]                # (TR, S, Cin)
    xcat = jnp.concatenate(taps, axis=-1).reshape(TR * S, 7 * Cin)
    y = jnp.dot(xcat, w_ref[...], preferred_element_type=jnp.float32)
    y = jnp.maximum(y + b_ref[...], 0.0)
    o_ref[...] = y.reshape(TR, S, Cout).astype(o_ref.dtype)


def _conv7_h_kernel(x_ref, w_ref, b_ref, o_ref):
    # 7-tap conv along H, NHWC-native (no transpose).  The halo is built
    # in-kernel along the leading (untiled) dim; taps are layout-free shifts.
    # x_ref: (1, H, W, Cin) bf16, w_ref: (7*Cin, Cout) bf16,
    # b_ref: (1, Cout) f32, o_ref: (1, H, W, Cout)
    _, H, W, Cout = o_ref.shape
    Cin = x_ref.shape[3]
    x = x_ref[0]                                                    # (H, W, Cin)
    zpad = jnp.zeros((3, W, Cin), x.dtype)
    xp = jnp.concatenate([zpad, x, zpad], axis=0)                   # (H+6, W, Cin)
    taps = [xp[t:t + H] for t in range(7)]                          # (H, W, Cin)
    xcat = jnp.concatenate(taps, axis=-1).reshape(H * W, 7 * Cin)
    y = jnp.dot(xcat, w_ref[...], preferred_element_type=jnp.float32)
    y = jnp.maximum(y + b_ref[...], 0.0)
    o_ref[...] = y.reshape(1, H, W, Cout).astype(o_ref.dtype)


def _avgpool3_bias_relu_kernel(x_ref, b_ref, o_ref):
    # Separable 3x3 sum (stride 1, pad 1) + bias + ReLU.  The 1/9 factor is
    # pre-folded into the 1x1 conv weights that produced x.
    # x_ref: (1, H+2, W+2, C) f32, b_ref: (1, C) f32, o_ref: (1, H, W, C)
    _, H, W, C = o_ref.shape
    x = x_ref[0].astype(jnp.float32)                                # (H+2, W+2, C)
    row = x[:, 0:W, :] + x[:, 1:W + 1, :] + x[:, 2:W + 2, :]        # (H+2, W, C)
    pooled = row[0:H] + row[1:H + 1] + row[2:H + 2]                 # (H, W, C)
    y = jnp.maximum(pooled + b_ref[...], 0.0)
    o_ref[...] = y.reshape(1, H, W, C).astype(o_ref.dtype)


# ----------------------------------------------------------------------------
# Wrappers (glue: BN folding, padding, tiling)
# ----------------------------------------------------------------------------
def conv1x1_bn(x_nhwc, w_oihw, scale, bias=None, relu=True, out_dtype=jnp.float32):
    N, H, W, Cin = x_nhwc.shape
    Cout = w_oihw.shape[0]
    M = N * H * W
    TM = min(512, _round_up(M, 8))
    Mp = _round_up(M, TM)

    x2 = x_nhwc.reshape(M, Cin).astype(jnp.bfloat16)
    if Mp != M:
        x2 = jnp.pad(x2, ((0, Mp - M), (0, 0)))
    w2 = (w_oihw.reshape(Cout, Cin).T * scale[None, :]).astype(jnp.bfloat16)
    if bias is None:
        b2 = jnp.zeros((1, Cout), jnp.float32)
    else:
        b2 = bias.reshape(1, Cout).astype(jnp.float32)

    out_bytes = Mp * Cout * jnp.dtype(out_dtype).itemsize
    out = pl.pallas_call(
        _make_matmul_bn_kernel(relu),
        out_shape=jax.ShapeDtypeStruct((Mp, Cout), out_dtype),
        grid=(Mp // TM,),
        in_specs=[
            pl.BlockSpec((TM, Cin), lambda m: (m, 0)),
            pl.BlockSpec((Cin, Cout), lambda m: (0, 0)),
            pl.BlockSpec((1, Cout), lambda m: (0, 0)),
        ],
        out_specs=pl.BlockSpec((TM, Cout), lambda m: (m, 0)),
        compiler_params=_COMPILER_PARAMS,
        cost_estimate=pl.CostEstimate(
            flops=int(2 * Mp * Cin * Cout),
            transcendentals=0,
            bytes_accessed=int(Mp * Cin * 2 + Cin * Cout * 2 + Cout * 4 + out_bytes)),
    )(x2, w2, b2)
    return out[:M].reshape(N, H, W, Cout)


def conv7_w_bn_relu(x_nhwc, w_oihw, scale, bias, out_dtype=jnp.float32):
    """kernel_size=(1,7), padding=(0,3): conv along W, NHWC-native."""
    N, H, W, Cin = x_nhwc.shape
    Cout = w_oihw.shape[0]
    taps = w_oihw[:, :, 0, :]                                       # (Cout, Cin, 7)
    w7 = (jnp.transpose(taps, (2, 1, 0)) * scale[None, None, :])    # (7, Cin, Cout)
    w7 = w7.reshape(7 * Cin, Cout).astype(jnp.bfloat16)
    b2 = bias.reshape(1, Cout).astype(jnp.float32)

    Sp = _round_up(W, 8)                      # align inner spatial dim to sublanes
    rows = N * H
    xp = jnp.pad(x_nhwc.astype(jnp.bfloat16),
                 ((0, 0), (0, 0), (3, 3 + Sp - W), (0, 0))).reshape(rows, Sp + 6, Cin)

    TR = min(rows, max(8, 512 // Sp))         # ~512-row MXU tiles
    rows_p = _round_up(rows, TR)
    if rows_p != rows:
        xp = jnp.pad(xp, ((0, rows_p - rows), (0, 0), (0, 0)))

    out_bytes = rows_p * Sp * Cout * jnp.dtype(out_dtype).itemsize
    out = pl.pallas_call(
        _conv7_w_kernel,
        out_shape=jax.ShapeDtypeStruct((rows_p, Sp, Cout), out_dtype),
        grid=(rows_p // TR,),
        in_specs=[
            pl.BlockSpec((TR, Sp + 6, Cin), lambda r: (r, 0, 0)),
            pl.BlockSpec((7 * Cin, Cout), lambda r: (0, 0)),
            pl.BlockSpec((1, Cout), lambda r: (0, 0)),
        ],
        out_specs=pl.BlockSpec((TR, Sp, Cout), lambda r: (r, 0, 0)),
        compiler_params=_COMPILER_PARAMS,
        cost_estimate=pl.CostEstimate(
            flops=int(2 * rows_p * Sp * 7 * Cin * Cout),
            transcendentals=0,
            bytes_accessed=int(rows_p * (Sp + 6) * Cin * 2 + 7 * Cin * Cout * 2
                               + Cout * 4 + out_bytes)),
    )(xp, w7, b2)
    return out[:rows, :W].reshape(N, H, W, Cout)


def conv7_h_bn_relu(x_nhwc, w_oihw, scale, bias, out_dtype=jnp.float32):
    """kernel_size=(7,1), padding=(3,0): conv along H, NHWC-native (no transpose)."""
    N, H, W, Cin = x_nhwc.shape
    Cout = w_oihw.shape[0]
    taps = w_oihw[:, :, :, 0]                                       # (Cout, Cin, 7)
    w7 = (jnp.transpose(taps, (2, 1, 0)) * scale[None, None, :])    # (7, Cin, Cout)
    w7 = w7.reshape(7 * Cin, Cout).astype(jnp.bfloat16)
    b2 = bias.reshape(1, Cout).astype(jnp.float32)
    xb = x_nhwc.astype(jnp.bfloat16)

    out_bytes = N * H * W * Cout * jnp.dtype(out_dtype).itemsize
    return pl.pallas_call(
        _conv7_h_kernel,
        out_shape=jax.ShapeDtypeStruct((N, H, W, Cout), out_dtype),
        grid=(N,),
        in_specs=[
            pl.BlockSpec((1, H, W, Cin), lambda n: (n, 0, 0, 0)),
            pl.BlockSpec((7 * Cin, Cout), lambda n: (0, 0)),
            pl.BlockSpec((1, Cout), lambda n: (0, 0)),
        ],
        out_specs=pl.BlockSpec((1, H, W, Cout), lambda n: (n, 0, 0, 0)),
        compiler_params=_COMPILER_PARAMS,
        cost_estimate=pl.CostEstimate(
            flops=int(2 * N * H * W * 7 * Cin * Cout),
            transcendentals=0,
            bytes_accessed=int(N * H * W * Cin * 2 + 7 * Cin * Cout * 2
                               + Cout * 4 + out_bytes)),
    )(xb, w7, b2)


def avgpool3_bias_relu(y_nhwc, bias, out_dtype=jnp.float32):
    """3x3 sum (stride 1, pad 1) + bias + ReLU; 1/9 already folded into y."""
    N, H, W, C = y_nhwc.shape
    yp = jnp.pad(y_nhwc, ((0, 0), (1, 1), (1, 1), (0, 0)))
    b2 = bias.reshape(1, C).astype(jnp.float32)
    out_bytes = N * H * W * C * jnp.dtype(out_dtype).itemsize
    return pl.pallas_call(
        _avgpool3_bias_relu_kernel,
        out_shape=jax.ShapeDtypeStruct((N, H, W, C), out_dtype),
        grid=(N,),
        in_specs=[
            pl.BlockSpec((1, H + 2, W + 2, C), lambda n: (n, 0, 0, 0)),
            pl.BlockSpec((1, C), lambda n: (0, 0)),
        ],
        out_specs=pl.BlockSpec((1, H, W, C), lambda n: (n, 0, 0, 0)),
        compiler_params=_COMPILER_PARAMS,
        cost_estimate=pl.CostEstimate(
            flops=int(9 * N * H * W * C),
            transcendentals=0,
            bytes_accessed=int(N * (H + 2) * (W + 2) * C * 4 + C * 4 + out_bytes)),
    )(yp, b2)


# ----------------------------------------------------------------------------
# Deterministic parameter initialization (shapes from the PyTorch __init__)
# ----------------------------------------------------------------------------
def init_basic_conv(key, cin, cout, kh, kw, eps=1e-3):
    kw_, kg, kb, km, kv = jax.random.split(key, 5)
    weight = jax.random.normal(kw_, (cout, cin, kh, kw), jnp.float32) * 0.1
    gamma = jax.random.uniform(kg, (cout,), jnp.float32, 0.5, 1.5)
    beta = jax.random.normal(kb, (cout,), jnp.float32) * 0.1
    running_mean = jax.random.normal(km, (cout,), jnp.float32) * 0.1
    running_var = jax.random.uniform(kv, (cout,), jnp.float32, 0.5, 1.5)
    scale = gamma / jnp.sqrt(running_var + eps)
    bias = beta - running_mean * scale
    return (weight, scale, bias)


def init_inception_c(key, in_channels, channels_7x7):
    c7 = channels_7x7
    spec = [
        ("branch1x1",      in_channels, 128, 1, 1),
        ("branch7x7_1",    in_channels, c7,  1, 1),
        ("branch7x7_2",    c7,          c7,  1, 7),
        ("branch7x7_3",    c7,          128, 7, 1),
        ("branch7x7dbl_1", in_channels, c7,  1, 1),
        ("branch7x7dbl_2", c7,          c7,  7, 1),
        ("branch7x7dbl_3", c7,          c7,  1, 7),
        ("branch7x7dbl_4", c7,          c7,  7, 1),
        ("branch7x7dbl_5", c7,          128, 1, 7),
        ("branch_pool",    in_channels, 128, 1, 1),
    ]
    keys = jax.random.split(key, len(spec))
    return {name: init_basic_conv(k, cin, cout, kh, kw)
            for k, (name, cin, cout, kh, kw) in zip(keys, spec)}


# ----------------------------------------------------------------------------
# InceptionC forward (NCHW in / NCHW out, matching PyTorch)
# ----------------------------------------------------------------------------
def inception_c_forward(x_nchw, params):
    x = jnp.transpose(x_nchw, (0, 2, 3, 1)).astype(jnp.float32)  # NCHW -> NHWC

    branch1x1 = conv1x1_bn(x, *params["branch1x1"], relu=True, out_dtype=jnp.float32)

    # branch7x7: 1x1 -> (1,7) -> (7,1); all NHWC-native, bf16 between stages
    b7 = conv1x1_bn(x, *params["branch7x7_1"], relu=True, out_dtype=jnp.bfloat16)
    b7 = conv7_w_bn_relu(b7, *params["branch7x7_2"], out_dtype=jnp.bfloat16)
    b7 = conv7_h_bn_relu(b7, *params["branch7x7_3"], out_dtype=jnp.float32)

    # branch7x7dbl: 1x1 -> (7,1) -> (1,7) -> (7,1) -> (1,7)
    bd = conv1x1_bn(x, *params["branch7x7dbl_1"], relu=True, out_dtype=jnp.bfloat16)
    bd = conv7_h_bn_relu(bd, *params["branch7x7dbl_2"], out_dtype=jnp.bfloat16)
    bd = conv7_w_bn_relu(bd, *params["branch7x7dbl_3"], out_dtype=jnp.bfloat16)
    bd = conv7_h_bn_relu(bd, *params["branch7x7dbl_4"], out_dtype=jnp.bfloat16)
    bd = conv7_w_bn_relu(bd, *params["branch7x7dbl_5"], out_dtype=jnp.float32)

    # branch_pool: avg-pool commuted with the (linear) 1x1 conv + folded BN.
    # 1/9 is folded into the conv scale; bias + ReLU applied after pooling
    # (ReLU stays last -> exactly equivalent to pool-then-conv).
    wp, sp, bp_bias = params["branch_pool"]
    y = conv1x1_bn(x, wp, sp / 9.0, bias=None, relu=False, out_dtype=jnp.float32)
    bp = avgpool3_bias_relu(y, bp_bias, out_dtype=jnp.float32)

    out = jnp.concatenate([branch1x1, b7, bd, bp], axis=-1)  # channel concat
    return jnp.transpose(out, (0, 3, 1, 2))                  # NHWC -> NCHW


if __name__ == "__main__":
    key = jax.random.PRNGKey(0)
    kx, kp = jax.random.split(key)

    N, Cin, H, W = 2, 16, 8, 8
    channels_7x7 = 8

    x = jax.random.normal(kx, (N, Cin, H, W), jnp.float32)
    params = init_inception_c(kp, Cin, channels_7x7)

    out = jax.jit(inception_c_forward)(x, params)
    out = jax.block_until_ready(out)

    assert out.shape == (N, 128 * 4, H, W), out.shape
    assert bool(jnp.all(out >= 0.0))  # ReLU output
    print("KERNEL_OK")
</pallas_src>

<mosaic_0001>
module attributes {stable_mosaic.version = 11 : i64} {
  func.func @_conv7_h_kernel(%arg0: i32, %arg1: memref<1x8x8x8xbf16, #tpu.memory_space<vmem>>, %arg2: memref<56x8xbf16, #tpu.memory_space<vmem>>, %arg3: memref<1x8xf32, #tpu.memory_space<vmem>>, %arg4: memref<1x8x8x8xbf16, #tpu.memory_space<vmem>>) attributes {dimension_semantics = [#tpu.dimension_semantics<parallel>], iteration_bounds = array<i64: 2>, scalar_prefetch = 0 : i64, scratch_operands = 0 : i64, tpu.core_type = #tpu.core_type<tc>, window_params = [{transform_indices = @transform_0, window_bounds = array<i64: 1, 8, 8, 8>}, {pipeline_mode = #tpu.pipeline_mode<synchronous>, transform_indices = @transform_1, window_bounds = array<i64: 56, 8>}, {pipeline_mode = #tpu.pipeline_mode<synchronous>, transform_indices = @transform_2, window_bounds = array<i64: 1, 8>}, {transform_indices = @transform_3, window_bounds = array<i64: 1, 8, 8, 8>}]} {
    %c0 = arith.constant 0 : index
    %c0_0 = arith.constant 0 : index
    %c0_1 = arith.constant 0 : index
    %c0_2 = arith.constant 0 : index
    %0 = vector.load %arg1[%c0, %c0_0, %c0_1, %c0_2] : memref<1x8x8x8xbf16, #tpu.memory_space<vmem>>, vector<1x8x8x8xbf16>
    %1 = vector.shape_cast %0 : vector<1x8x8x8xbf16> to vector<8x8x8xbf16>
    %cst = arith.constant 0.000000e+00 : bf16
    %2 = vector.broadcast %cst : bf16 to vector<3x8x8xbf16>
    %3 = tpu.concatenate %2, %1, %2 in 0 : vector<3x8x8xbf16>, vector<8x8x8xbf16>, vector<3x8x8xbf16> -> vector<14x8x8xbf16>
    %4 = vector.extract_strided_slice %3 {offsets = [0, 0, 0], sizes = [8, 8, 8], strides = [1, 1, 1]} : vector<14x8x8xbf16> to vector<8x8x8xbf16>
    %5 = vector.extract_strided_slice %3 {offsets = [1, 0, 0], sizes = [8, 8, 8], strides = [1, 1, 1]} : vector<14x8x8xbf16> to vector<8x8x8xbf16>
    %6 = vector.extract_strided_slice %3 {offsets = [2, 0, 0], sizes = [8, 8, 8], strides = [1, 1, 1]} : vector<14x8x8xbf16> to vector<8x8x8xbf16>
    %7 = vector.extract_strided_slice %3 {offsets = [3, 0, 0], sizes = [8, 8, 8], strides = [1, 1, 1]} : vector<14x8x8xbf16> to vector<8x8x8xbf16>
    %8 = vector.extract_strided_slice %3 {offsets = [4, 0, 0], sizes = [8, 8, 8], strides = [1, 1, 1]} : vector<14x8x8xbf16> to vector<8x8x8xbf16>
    %9 = vector.extract_strided_slice %3 {offsets = [5, 0, 0], sizes = [8, 8, 8], strides = [1, 1, 1]} : vector<14x8x8xbf16> to vector<8x8x8xbf16>
    %10 = vector.extract_strided_slice %3 {offsets = [6, 0, 0], sizes = [8, 8, 8], strides = [1, 1, 1]} : vector<14x8x8xbf16> to vector<8x8x8xbf16>
    %11 = tpu.concatenate %4, %5, %6, %7, %8, %9, %10 in 2 : vector<8x8x8xbf16>, vector<8x8x8xbf16>, vector<8x8x8xbf16>, vector<8x8x8xbf16>, vector<8x8x8xbf16>, vector<8x8x8xbf16>, vector<8x8x8xbf16> -> vector<8x8x56xbf16>
    %12 = vector.shape_cast %11 : vector<8x8x56xbf16> to vector<64x56xbf16>
    %c0_3 = arith.constant 0 : index
    %c0_4 = arith.constant 0 : index
    %13 = vector.load %arg2[%c0_3, %c0_4] : memref<56x8xbf16, #tpu.memory_space<vmem>>, vector<56x8xbf16>
    %cst_5 = arith.constant dense<0.000000e+00> : vector<64x8xf32>
    %14 = tpu.matmul %12, %13, %cst_5 {dimension_numbers = #tpu.dot_dimension_numbers<[1], [0], [0], [1], [0, 0, 1, 1], [], []>} : vector<64x56xbf16>, vector<56x8xbf16>, vector<64x8xf32> -> vector<64x8xf32>
    %c0_6 = arith.constant 0 : index
    %c0_7 = arith.constant 0 : index
    %15 = vector.load %arg3[%c0_6, %c0_7] : memref<1x8xf32, #tpu.memory_space<vmem>>, vector<1x8xf32>
    %16 = vector.broadcast %15 : vector<1x8xf32> to vector<64x8xf32>
    %17 = arith.addf %14, %16 : vector<64x8xf32>
    %cst_8 = arith.constant 0.000000e+00 : f32
    %18 = vector.broadcast %cst_8 : f32 to vector<64x8xf32>
    %19 = arith.maximumf %17, %18 : vector<64x8xf32>
    %20 = vector.shape_cast %19 : vector<64x8xf32> to vector<1x8x8x8xf32>
    %21 = arith.truncf %20 : vector<1x8x8x8xf32> to vector<1x8x8x8xbf16>
    %c0_9 = arith.constant 0 : index
    %c0_10 = arith.constant 0 : index
    %c0_11 = arith.constant 0 : index
    %c0_12 = arith.constant 0 : index
    %22 = vector.load %arg4[%c0_9, %c0_10, %c0_11, %c0_12] : memref<1x8x8x8xbf16, #tpu.memory_space<vmem>>, vector<1x8x8x8xbf16>
    tpu.vector_store %arg4[%c0_9, %c0_10, %c0_11, %c0_12], %21 {strides = array<i32>} : memref<1x8x8x8xbf16, #tpu.memory_space<vmem>>, vector<1x8x8x8xbf16>,
    return
  }
  func.func @transform_0(%arg0: i32) -> (i32, i32, i32, i32) {
    %c0_i32 = arith.constant 0 : i32
    %c0_i32_0 = arith.constant 0 : i32
    %c0_i32_1 = arith.constant 0 : i32
    %c0_i32_2 = arith.constant 0 : i32
    return %arg0, %c0_i32, %c0_i32_0, %c0_i32_1 : i32, i32, i32, i32
  }
  func.func @transform_1(%arg0: i32) -> (i32, i32) {
    %c0_i32 = arith.constant 0 : i32
    %c0_i32_0 = arith.constant 0 : i32
    %c0_i32_1 = arith.constant 0 : i32
    return %c0_i32, %c0_i32_0 : i32, i32
  }
  func.func @transform_2(%arg0: i32) -> (i32, i32) {
    %c0_i32 = arith.constant 0 : i32
    %c0_i32_0 = arith.constant 0 : i32
    %c0_i32_1 = arith.constant 0 : i32
    return %c0_i32, %c0_i32_0 : i32, i32
  }
  func.func @transform_3(%arg0: i32) -> (i32, i32, i32, i32) {
    %c0_i32 = arith.constant 0 : i32
    %c0_i32_0 = arith.constant 0 : i32
    %c0_i32_1 = arith.constant 0 : i32
    %c0_i32_2 = arith.constant 0 : i32
    return %arg0, %c0_i32, %c0_i32_0, %c0_i32_1 : i32, i32, i32, i32
  }
}

module attributes {stable_mosaic.version = 11 : i64} {
  func.func @kernel(%arg0: i32, %arg1: memref<128x16xbf16, #tpu.memory_space<vmem>>, %arg2: memref<16x8xbf16, #tpu.memory_space<vmem>>, %arg3: memref<1x8xf32, #tpu.memory_space<vmem>>, %arg4: memref<128x8xbf16, #tpu.memory_space<vmem>>) attributes {dimension_semantics = [#tpu.dimension_semantics<parallel>], iteration_bounds = array<i64: 1>, scalar_prefetch = 0 : i64, scratch_operands = 0 : i64, tpu.core_type = #tpu.core_type<tc>, window_params = [{transform_indices = @transform_0, window_bounds = array<i64: 128, 16>}, {pipeline_mode = #tpu.pipeline_mode<synchronous>, transform_indices = @transform_1, window_bounds = array<i64: 16, 8>}, {pipeline_mode = #tpu.pipeline_mode<synchronous>, transform_indices = @transform_2, window_bounds = array<i64: 1, 8>}, {transform_indices = @transform_3, window_bounds = array<i64: 128, 8>}]} {
    %c0 = arith.constant 0 : index
    %c0_0 = arith.constant 0 : index
    %0 = vector.load %arg1[%c0, %c0_0] : memref<128x16xbf16, #tpu.memory_space<vmem>>, vector<128x16xbf16>
    %c0_1 = arith.constant 0 : index
    %c0_2 = arith.constant 0 : index
    %1 = vector.load %arg2[%c0_1, %c0_2] : memref<16x8xbf16, #tpu.memory_space<vmem>>, vector<16x8xbf16>
    %cst = arith.constant dense<0.000000e+00> : vector<128x8xf32>
    %2 = tpu.matmul %0, %1, %cst {dimension_numbers = #tpu.dot_dimension_numbers<[1], [0], [0], [1], [0, 0, 1, 1], [], []>} : vector<128x16xbf16>, vector<16x8xbf16>, vector<128x8xf32> -> vector<128x8xf32>
    %c0_3 = arith.constant 0 : index
    %c0_4 = arith.constant 0 : index
    %3 = vector.load %arg3[%c0_3, %c0_4] : memref<1x8xf32, #tpu.memory_space<vmem>>, vector<1x8xf32>
    %4 = vector.broadcast %3 : vector<1x8xf32> to vector<128x8xf32>
    %5 = arith.addf %2, %4 : vector<128x8xf32>
    %cst_5 = arith.constant 0.000000e+00 : f32
    %6 = vector.broadcast %cst_5 : f32 to vector<128x8xf32>
    %7 = arith.maximumf %5, %6 : vector<128x8xf32>
    %8 = arith.truncf %7 : vector<128x8xf32> to vector<128x8xbf16>
    %c0_6 = arith.constant 0 : index
    %c0_7 = arith.constant 0 : index
    %9 = vector.load %arg4[%c0_6, %c0_7] : memref<128x8xbf16, #tpu.memory_space<vmem>>, vector<128x8xbf16>
    tpu.vector_store %arg4[%c0_6, %c0_7], %8 {strides = array<i32>} : memref<128x8xbf16, #tpu.memory_space<vmem>>, vector<128x8xbf16>,
    return
  }
  func.func @transform_0(%arg0: i32) -> (i32, i32) {
    %c0_i32 = arith.constant 0 : i32
    %c0_i32_0 = arith.constant 0 : i32
    return %arg0, %c0_i32 : i32, i32
  }
  func.func @transform_1(%arg0: i32) -> (i32, i32) {
    %c0_i32 = arith.constant 0 : i32
    %c0_i32_0 = arith.constant 0 : i32
    %c0_i32_1 = arith.constant 0 : i32
    return %c0_i32, %c0_i32_0 : i32, i32
  }
  func.func @transform_2(%arg0: i32) -> (i32, i32) {
    %c0_i32 = arith.constant 0 : i32
    %c0_i32_0 = arith.constant 0 : i32
    %c0_i32_1 = arith.constant 0 : i32
    return %c0_i32, %c0_i32_0 : i32, i32
  }
  func.func @transform_3(%arg0: i32) -> (i32, i32) {
    %c0_i32 = arith.constant 0 : i32
    %c0_i32_0 = arith.constant 0 : i32
    return %arg0, %c0_i32 : i32, i32
  }
}

module attributes {stable_mosaic.version = 11 : i64} {
  func.func @_conv7_w_kernel(%arg0: i32, %arg1: memref<16x14x8xbf16, #tpu.memory_space<vmem>>, %arg2: memref<56x8xbf16, #tpu.memory_space<vmem>>, %arg3: memref<1x8xf32, #tpu.memory_space<vmem>>, %arg4: memref<16x8x8xbf16, #tpu.memory_space<vmem>>) attributes {dimension_semantics = [#tpu.dimension_semantics<parallel>], iteration_bounds = array<i64: 1>, scalar_prefetch = 0 : i64, scratch_operands = 0 : i64, tpu.core_type = #tpu.core_type<tc>, window_params = [{transform_indices = @transform_0, window_bounds = array<i64: 16, 14, 8>}, {pipeline_mode = #tpu.pipeline_mode<synchronous>, transform_indices = @transform_1, window_bounds = array<i64: 56, 8>}, {pipeline_mode = #tpu.pipeline_mode<synchronous>, transform_indices = @transform_2, window_bounds = array<i64: 1, 8>}, {transform_indices = @transform_3, window_bounds = array<i64: 16, 8, 8>}]} {
    %c0 = arith.constant 0 : index
    %c0_0 = arith.constant 0 : index
    %c0_1 = arith.constant 0 : index
    %0 = vector.load %arg1[%c0, %c0_0, %c0_1] : memref<16x14x8xbf16, #tpu.memory_space<vmem>>, vector<16x8x8xbf16>
    %c0_2 = arith.constant 0 : index
    %c1 = arith.constant 1 : index
    %c0_3 = arith.constant 0 : index
    %1 = vector.load %arg1[%c0_2, %c1, %c0_3] : memref<16x14x8xbf16, #tpu.memory_space<vmem>>, vector<16x8x8xbf16>
    %c0_4 = arith.constant 0 : index
    %c2 = arith.constant 2 : index
    %c0_5 = arith.constant 0 : index
    %2 = vector.load %arg1[%c0_4, %c2, %c0_5] : memref<16x14x8xbf16, #tpu.memory_space<vmem>>, vector<16x8x8xbf16>
    %c0_6 = arith.constant 0 : index
    %c3 = arith.constant 3 : index
    %c0_7 = arith.constant 0 : index
    %3 = vector.load %arg1[%c0_6, %c3, %c0_7] : memref<16x14x8xbf16, #tpu.memory_space<vmem>>, vector<16x8x8xbf16>
    %c0_8 = arith.constant 0 : index
    %c4 = arith.constant 4 : index
    %c0_9 = arith.constant 0 : index
    %4 = vector.load %arg1[%c0_8, %c4, %c0_9] : memref<16x14x8xbf16, #tpu.memory_space<vmem>>, vector<16x8x8xbf16>
    %c0_10 = arith.constant 0 : index
    %c5 = arith.constant 5 : index
    %c0_11 = arith.constant 0 : index
    %5 = vector.load %arg1[%c0_10, %c5, %c0_11] : memref<16x14x8xbf16, #tpu.memory_space<vmem>>, vector<16x8x8xbf16>
    %c0_12 = arith.constant 0 : index
    %c6 = arith.constant 6 : index
    %c0_13 = arith.constant 0 : index
    %6 = vector.load %arg1[%c0_12, %c6, %c0_13] : memref<16x14x8xbf16, #tpu.memory_space<vmem>>, vector<16x8x8xbf16>
    %7 = tpu.concatenate %0, %1, %2, %3, %4, %5, %6 in 2 : vector<16x8x8xbf16>, vector<16x8x8xbf16>, vector<16x8x8xbf16>, vector<16x8x8xbf16>, vector<16x8x8xbf16>, vector<16x8x8xbf16>, vector<16x8x8xbf16> -> vector<16x8x56xbf16>
    %8 = vector.shape_cast %7 : vector<16x8x56xbf16> to vector<128x56xbf16>
    %c0_14 = arith.constant 0 : index
    %c0_15 = arith.constant 0 : index
    %9 = vector.load %arg2[%c0_14, %c0_15] : memref<56x8xbf16, #tpu.memory_space<vmem>>, vector<56x8xbf16>
    %cst = arith.constant dense<0.000000e+00> : vector<128x8xf32>
    %10 = tpu.matmul %8, %9, %cst {dimension_numbers = #tpu.dot_dimension_numbers<[1], [0], [0], [1], [0, 0, 1, 1], [], []>} : vector<128x56xbf16>, vector<56x8xbf16>, vector<128x8xf32> -> vector<128x8xf32>
    %c0_16 = arith.constant 0 : index
    %c0_17 = arith.constant 0 : index
    %11 = vector.load %arg3[%c0_16, %c0_17] : memref<1x8xf32, #tpu.memory_space<vmem>>, vector<1x8xf32>
    %12 = vector.broadcast %11 : vector<1x8xf32> to vector<128x8xf32>
    %13 = arith.addf %10, %12 : vector<128x8xf32>
    %cst_18 = arith.constant 0.000000e+00 : f32
    %14 = vector.broadcast %cst_18 : f32 to vector<128x8xf32>
    %15 = arith.maximumf %13, %14 : vector<128x8xf32>
    %16 = vector.shape_cast %15 : vector<128x8xf32> to vector<16x8x8xf32>
    %17 = arith.truncf %16 : vector<16x8x8xf32> to vector<16x8x8xbf16>
    %c0_19 = arith.constant 0 : index
    %c0_20 = arith.constant 0 : index
    %c0_21 = arith.constant 0 : index
    %18 = vector.load %arg4[%c0_19, %c0_20, %c0_21] : memref<16x8x8xbf16, #tpu.memory_space<vmem>>, vector<16x8x8xbf16>
    tpu.vector_store %arg4[%c0_19, %c0_20, %c0_21], %17 {strides = array<i32>} : memref<16x8x8xbf16, #tpu.memory_space<vmem>>, vector<16x8x8xbf16>,
    return
  }
  func.func @transform_0(%arg0: i32) -> (i32, i32, i32) {
    %c0_i32 = arith.constant 0 : i32
    %c0_i32_0 = arith.constant 0 : i32
    %c0_i32_1 = arith.constant 0 : i32
    return %arg0, %c0_i32, %c0_i32_0 : i32, i32, i32
  }
  func.func @transform_1(%arg0: i32) -> (i32, i32) {
    %c0_i32 = arith.constant 0 : i32
    %c0_i32_0 = arith.constant 0 : i32
    %c0_i32_1 = arith.constant 0 : i32
    return %c0_i32, %c0_i32_0 : i32, i32
  }
  func.func @transform_2(%arg0: i32) -> (i32, i32) {
    %c0_i32 = arith.constant 0 : i32
    %c0_i32_0 = arith.constant 0 : i32
    %c0_i32_1 = arith.constant 0 : i32
    return %c0_i32, %c0_i32_0 : i32, i32
  }
  func.func @transform_3(%arg0: i32) -> (i32, i32, i32) {
    %c0_i32 = arith.constant 0 : i32
    %c0_i32_0 = arith.constant 0 : i32
    %c0_i32_1 = arith.constant 0 : i32
    return %arg0, %c0_i32, %c0_i32_0 : i32, i32, i32
  }
}

module attributes {stable_mosaic.version = 11 : i64} {
  func.func @_conv7_h_kernel(%arg0: i32, %arg1: memref<1x8x8x8xbf16, #tpu.memory_space<vmem>>, %arg2: memref<56x128xbf16, #tpu.memory_space<vmem>>, %arg3: memref<1x128xf32, #tpu.memory_space<vmem>>, %arg4: memref<1x8x8x128xf32, #tpu.memory_space<vmem>>) attributes {dimension_semantics = [#tpu.dimension_semantics<parallel>], iteration_bounds = array<i64: 2>, scalar_prefetch = 0 : i64, scratch_operands = 0 : i64, tpu.core_type = #tpu.core_type<tc>, window_params = [{transform_indices = @transform_0, window_bounds = array<i64: 1, 8, 8, 8>}, {pipeline_mode = #tpu.pipeline_mode<synchronous>, transform_indices = @transform_1, window_bounds = array<i64: 56, 128>}, {pipeline_mode = #tpu.pipeline_mode<synchronous>, transform_indices = @transform_2, window_bounds = array<i64: 1, 128>}, {transform_indices = @transform_3, window_bounds = array<i64: 1, 8, 8, 128>}]} {
    %c0 = arith.constant 0 : index
    %c0_0 = arith.constant 0 : index
    %c0_1 = arith.constant 0 : index
    %c0_2 = arith.constant 0 : index
    %0 = vector.load %arg1[%c0, %c0_0, %c0_1, %c0_2] : memref<1x8x8x8xbf16, #tpu.memory_space<vmem>>, vector<1x8x8x8xbf16>
    %1 = vector.shape_cast %0 : vector<1x8x8x8xbf16> to vector<8x8x8xbf16>
    %cst = arith.constant 0.000000e+00 : bf16
    %2 = vector.broadcast %cst : bf16 to vector<3x8x8xbf16>
    %3 = tpu.concatenate %2, %1, %2 in 0 : vector<3x8x8xbf16>, vector<8x8x8xbf16>, vector<3x8x8xbf16> -> vector<14x8x8xbf16>
    %4 = vector.extract_strided_slice %3 {offsets = [0, 0, 0], sizes = [8, 8, 8], strides = [1, 1, 1]} : vector<14x8x8xbf16> to vector<8x8x8xbf16>
    %5 = vector.extract_strided_slice %3 {offsets = [1, 0, 0], sizes = [8, 8, 8], strides = [1, 1, 1]} : vector<14x8x8xbf16> to vector<8x8x8xbf16>
    %6 = vector.extract_strided_slice %3 {offsets = [2, 0, 0], sizes = [8, 8, 8], strides = [1, 1, 1]} : vector<14x8x8xbf16> to vector<8x8x8xbf16>
    %7 = vector.extract_strided_slice %3 {offsets = [3, 0, 0], sizes = [8, 8, 8], strides = [1, 1, 1]} : vector<14x8x8xbf16> to vector<8x8x8xbf16>
    %8 = vector.extract_strided_slice %3 {offsets = [4, 0, 0], sizes = [8, 8, 8], strides = [1, 1, 1]} : vector<14x8x8xbf16> to vector<8x8x8xbf16>
    %9 = vector.extract_strided_slice %3 {offsets = [5, 0, 0], sizes = [8, 8, 8], strides = [1, 1, 1]} : vector<14x8x8xbf16> to vector<8x8x8xbf16>
    %10 = vector.extract_strided_slice %3 {offsets = [6, 0, 0], sizes = [8, 8, 8], strides = [1, 1, 1]} : vector<14x8x8xbf16> to vector<8x8x8xbf16>
    %11 = tpu.concatenate %4, %5, %6, %7, %8, %9, %10 in 2 : vector<8x8x8xbf16>, vector<8x8x8xbf16>, vector<8x8x8xbf16>, vector<8x8x8xbf16>, vector<8x8x8xbf16>, vector<8x8x8xbf16>, vector<8x8x8xbf16> -> vector<8x8x56xbf16>
    %12 = vector.shape_cast %11 : vector<8x8x56xbf16> to vector<64x56xbf16>
    %c0_3 = arith.constant 0 : index
    %c0_4 = arith.constant 0 : index
    %13 = vector.load %arg2[%c0_3, %c0_4] : memref<56x128xbf16, #tpu.memory_space<vmem>>, vector<56x128xbf16>
    %cst_5 = arith.constant dense<0.000000e+00> : vector<64x128xf32>
    %14 = tpu.matmul %12, %13, %cst_5 {dimension_numbers = #tpu.dot_dimension_numbers<[1], [0], [0], [1], [0, 0, 1, 1], [], []>} : vector<64x56xbf16>, vector<56x128xbf16>, vector<64x128xf32> -> vector<64x128xf32>
    %c0_6 = arith.constant 0 : index
    %c0_7 = arith.constant 0 : index
    %15 = vector.load %arg3[%c0_6, %c0_7] : memref<1x128xf32, #tpu.memory_space<vmem>>, vector<1x128xf32>
    %16 = vector.broadcast %15 : vector<1x128xf32> to vector<64x128xf32>
    %17 = arith.addf %14, %16 : vector<64x128xf32>
    %cst_8 = arith.constant 0.000000e+00 : f32
    %18 = vector.broadcast %cst_8 : f32 to vector<64x128xf32>
    %19 = arith.maximumf %17, %18 : vector<64x128xf32>
    %20 = vector.shape_cast %19 : vector<64x128xf32> to vector<1x8x8x128xf32>
    %c0_9 = arith.constant 0 : index
    %c0_10 = arith.constant 0 : index
    %c0_11 = arith.constant 0 : index
    %c0_12 = arith.constant 0 : index
    %21 = vector.load %arg4[%c0_9, %c0_10, %c0_11, %c0_12] : memref<1x8x8x128xf32, #tpu.memory_space<vmem>>, vector<1x8x8x128xf32>
    tpu.vector_store %arg4[%c0_9, %c0_10, %c0_11, %c0_12], %20 {strides = array<i32>} : memref<1x8x8x128xf32, #tpu.memory_space<vmem>>, vector<1x8x8x128xf32>,
    return
  }
  func.func @transform_0(%arg0: i32) -> (i32, i32, i32, i32) {
    %c0_i32 = arith.constant 0 : i32
    %c0_i32_0 = arith.constant 0 : i32
    %c0_i32_1 = arith.constant 0 : i32
    %c0_i32_2 = arith.constant 0 : i32
    return %arg0, %c0_i32, %c0_i32_0, %c0_i32_1 : i32, i32, i32, i32
  }
  func.func @transform_1(%arg0: i32) -> (i32, i32) {
    %c0_i32 = arith.constant 0 : i32
    %c0_i32_0 = arith.constant 0 : i32
    %c0_i32_1 = arith.constant 0 : i32
    return %c0_i32, %c0_i32_0 : i32, i32
  }
  func.func @transform_2(%arg0: i32) -> (i32, i32) {
    %c0_i32 = arith.constant 0 : i32
    %c0_i32_0 = arith.constant 0 : i32
    %c0_i32_1 = arith.constant 0 : i32
    return %c0_i32, %c0_i32_0 : i32, i32
  }
  func.func @transform_3(%arg0: i32) -> (i32, i32, i32, i32) {
    %c0_i32 = arith.constant 0 : i32
    %c0_i32_0 = arith.constant 0 : i32
    %c0_i32_1 = arith.constant 0 : i32
    %c0_i32_2 = arith.constant 0 : i32
    return %arg0, %c0_i32, %c0_i32_0, %c0_i32_1 : i32, i32, i32, i32
  }
}

module attributes {stable_mosaic.version = 11 : i64} {
  func.func @_conv7_w_kernel(%arg0: i32, %arg1: memref<16x14x8xbf16, #tpu.memory_space<vmem>>, %arg2: memref<56x128xbf16, #tpu.memory_space<vmem>>, %arg3: memref<1x128xf32, #tpu.memory_space<vmem>>, %arg4: memref<16x8x128xf32, #tpu.memory_space<vmem>>) attributes {dimension_semantics = [#tpu.dimension_semantics<parallel>], iteration_bounds = array<i64: 1>, scalar_prefetch = 0 : i64, scratch_operands = 0 : i64, tpu.core_type = #tpu.core_type<tc>, window_params = [{transform_indices = @transform_0, window_bounds = array<i64: 16, 14, 8>}, {pipeline_mode = #tpu.pipeline_mode<synchronous>, transform_indices = @transform_1, window_bounds = array<i64: 56, 128>}, {pipeline_mode = #tpu.pipeline_mode<synchronous>, transform_indices = @transform_2, window_bounds = array<i64: 1, 128>}, {transform_indices = @transform_3, window_bounds = array<i64: 16, 8, 128>}]} {
    %c0 = arith.constant 0 : index
    %c0_0 = arith.constant 0 : index
    %c0_1 = arith.constant 0 : index
    %0 = vector.load %arg1[%c0, %c0_0, %c0_1] : memref<16x14x8xbf16, #tpu.memory_space<vmem>>, vector<16x8x8xbf16>
    %c0_2 = arith.constant 0 : index
    %c1 = arith.constant 1 : index
    %c0_3 = arith.constant 0 : index
    %1 = vector.load %arg1[%c0_2, %c1, %c0_3] : memref<16x14x8xbf16, #tpu.memory_space<vmem>>, vector<16x8x8xbf16>
    %c0_4 = arith.constant 0 : index
    %c2 = arith.constant 2 : index
    %c0_5 = arith.constant 0 : index
    %2 = vector.load %arg1[%c0_4, %c2, %c0_5] : memref<16x14x8xbf16, #tpu.memory_space<vmem>>, vector<16x8x8xbf16>
    %c0_6 = arith.constant 0 : index
    %c3 = arith.constant 3 : index
    %c0_7 = arith.constant 0 : index
    %3 = vector.load %arg1[%c0_6, %c3, %c0_7] : memref<16x14x8xbf16, #tpu.memory_space<vmem>>, vector<16x8x8xbf16>
    %c0_8 = arith.constant 0 : index
    %c4 = arith.constant 4 : index
    %c0_9 = arith.constant 0 : index
    %4 = vector.load %arg1[%c0_8, %c4, %c0_9] : memref<16x14x8xbf16, #tpu.memory_space<vmem>>, vector<16x8x8xbf16>
    %c0_10 = arith.constant 0 : index
    %c5 = arith.constant 5 : index
    %c0_11 = arith.constant 0 : index
    %5 = vector.load %arg1[%c0_10, %c5, %c0_11] : memref<16x14x8xbf16, #tpu.memory_space<vmem>>, vector<16x8x8xbf16>
    %c0_12 = arith.constant 0 : index
    %c6 = arith.constant 6 : index
    %c0_13 = arith.constant 0 : index
    %6 = vector.load %arg1[%c0_12, %c6, %c0_13] : memref<16x14x8xbf16, #tpu.memory_space<vmem>>, vector<16x8x8xbf16>
    %7 = tpu.concatenate %0, %1, %2, %3, %4, %5, %6 in 2 : vector<16x8x8xbf16>, vector<16x8x8xbf16>, vector<16x8x8xbf16>, vector<16x8x8xbf16>, vector<16x8x8xbf16>, vector<16x8x8xbf16>, vector<16x8x8xbf16> -> vector<16x8x56xbf16>
    %8 = vector.shape_cast %7 : vector<16x8x56xbf16> to vector<128x56xbf16>
    %c0_14 = arith.constant 0 : index
    %c0_15 = arith.constant 0 : index
    %9 = vector.load %arg2[%c0_14, %c0_15] : memref<56x128xbf16, #tpu.memory_space<vmem>>, vector<56x128xbf16>
    %cst = arith.constant dense<0.000000e+00> : vector<128x128xf32>
    %10 = tpu.matmul %8, %9, %cst {dimension_numbers = #tpu.dot_dimension_numbers<[1], [0], [0], [1], [0, 0, 1, 1], [], []>} : vector<128x56xbf16>, vector<56x128xbf16>, vector<128x128xf32> -> vector<128x128xf32>
    %c0_16 = arith.constant 0 : index
    %c0_17 = arith.constant 0 : index
    %11 = vector.load %arg3[%c0_16, %c0_17] : memref<1x128xf32, #tpu.memory_space<vmem>>, vector<1x128xf32>
    %12 = vector.broadcast %11 : vector<1x128xf32> to vector<128x128xf32>
    %13 = arith.addf %10, %12 : vector<128x128xf32>
    %cst_18 = arith.constant 0.000000e+00 : f32
    %14 = vector.broadcast %cst_18 : f32 to vector<128x128xf32>
    %15 = arith.maximumf %13, %14 : vector<128x128xf32>
    %16 = vector.shape_cast %15 : vector<128x128xf32> to vector<16x8x128xf32>
    %c0_19 = arith.constant 0 : index
    %c0_20 = arith.constant 0 : index
    %c0_21 = arith.constant 0 : index
    %17 = vector.load %arg4[%c0_19, %c0_20, %c0_21] : memref<16x8x128xf32, #tpu.memory_space<vmem>>, vector<16x8x128xf32>
    tpu.vector_store %arg4[%c0_19, %c0_20, %c0_21], %16 {strides = array<i32>} : memref<16x8x128xf32, #tpu.memory_space<vmem>>, vector<16x8x128xf32>,
    return
  }
  func.func @transform_0(%arg0: i32) -> (i32, i32, i32) {
    %c0_i32 = arith.constant 0 : i32
    %c0_i32_0 = arith.constant 0 : i32
    %c0_i32_1 = arith.constant 0 : i32
    return %arg0, %c0_i32, %c0_i32_0 : i32, i32, i32
  }
  func.func @transform_1(%arg0: i32) -> (i32, i32) {
    %c0_i32 = arith.constant 0 : i32
    %c0_i32_0 = arith.constant 0 : i32
    %c0_i32_1 = arith.constant 0 : i32
    return %c0_i32, %c0_i32_0 : i32, i32
  }
  func.func @transform_2(%arg0: i32) -> (i32, i32) {
    %c0_i32 = arith.constant 0 : i32
    %c0_i32_0 = arith.constant 0 : i32
    %c0_i32_1 = arith.constant 0 : i32
    return %c0_i32, %c0_i32_0 : i32, i32
  }
  func.func @transform_3(%arg0: i32) -> (i32, i32, i32) {
    %c0_i32 = arith.constant 0 : i32
    %c0_i32_0 = arith.constant 0 : i32
    %c0_i32_1 = arith.constant 0 : i32
    return %arg0, %c0_i32, %c0_i32_0 : i32, i32, i32
  }
}

module attributes {stable_mosaic.version = 11 : i64} {
  func.func @kernel(%arg0: i32, %arg1: memref<128x16xbf16, #tpu.memory_space<vmem>>, %arg2: memref<16x128xbf16, #tpu.memory_space<vmem>>, %arg3: memref<1x128xf32, #tpu.memory_space<vmem>>, %arg4: memref<128x128xf32, #tpu.memory_space<vmem>>) attributes {dimension_semantics = [#tpu.dimension_semantics<parallel>], iteration_bounds = array<i64: 1>, scalar_prefetch = 0 : i64, scratch_operands = 0 : i64, tpu.core_type = #tpu.core_type<tc>, window_params = [{transform_indices = @transform_0, window_bounds = array<i64: 128, 16>}, {pipeline_mode = #tpu.pipeline_mode<synchronous>, transform_indices = @transform_1, window_bounds = array<i64: 16, 128>}, {pipeline_mode = #tpu.pipeline_mode<synchronous>, transform_indices = @transform_2, window_bounds = array<i64: 1, 128>}, {transform_indices = @transform_3, window_bounds = array<i64: 128, 128>}]} {
    %c0 = arith.constant 0 : index
    %c0_0 = arith.constant 0 : index
    %0 = vector.load %arg1[%c0, %c0_0] : memref<128x16xbf16, #tpu.memory_space<vmem>>, vector<128x16xbf16>
    %c0_1 = arith.constant 0 : index
    %c0_2 = arith.constant 0 : index
    %1 = vector.load %arg2[%c0_1, %c0_2] : memref<16x128xbf16, #tpu.memory_space<vmem>>, vector<16x128xbf16>
    %cst = arith.constant dense<0.000000e+00> : vector<128x128xf32>
    %2 = tpu.matmul %0, %1, %cst {dimension_numbers = #tpu.dot_dimension_numbers<[1], [0], [0], [1], [0, 0, 1, 1], [], []>} : vector<128x16xbf16>, vector<16x128xbf16>, vector<128x128xf32> -> vector<128x128xf32>
    %c0_3 = arith.constant 0 : index
    %c0_4 = arith.constant 0 : index
    %3 = vector.load %arg3[%c0_3, %c0_4] : memref<1x128xf32, #tpu.memory_space<vmem>>, vector<1x128xf32>
    %4 = vector.broadcast %3 : vector<1x128xf32> to vector<128x128xf32>
    %5 = arith.addf %2, %4 : vector<128x128xf32>
    %cst_5 = arith.constant 0.000000e+00 : f32
    %6 = vector.broadcast %cst_5 : f32 to vector<128x128xf32>
    %7 = arith.maximumf %5, %6 : vector<128x128xf32>
    %c0_6 = arith.constant 0 : index
    %c0_7 = arith.constant 0 : index
    %8 = vector.load %arg4[%c0_6, %c0_7] : memref<128x128xf32, #tpu.memory_space<vmem>>, vector<128x128xf32>
    tpu.vector_store %arg4[%c0_6, %c0_7], %7 {strides = array<i32>} : memref<128x128xf32, #tpu.memory_space<vmem>>, vector<128x128xf32>,
    return
  }
  func.func @transform_0(%arg0: i32) -> (i32, i32) {
    %c0_i32 = arith.constant 0 : i32
    %c0_i32_0 = arith.constant 0 : i32
    return %arg0, %c0_i32 : i32, i32
  }
  func.func @transform_1(%arg0: i32) -> (i32, i32) {
    %c0_i32 = arith.constant 0 : i32
    %c0_i32_0 = arith.constant 0 : i32
    %c0_i32_1 = arith.constant 0 : i32
    return %c0_i32, %c0_i32_0 : i32, i32
  }
  func.func @transform_2(%arg0: i32) -> (i32, i32) {
    %c0_i32 = arith.constant 0 : i32
    %c0_i32_0 = arith.constant 0 : i32
    %c0_i32_1 = arith.constant 0 : i32
    return %c0_i32, %c0_i32_0 : i32, i32
  }
  func.func @transform_3(%arg0: i32) -> (i32, i32) {
    %c0_i32 = arith.constant 0 : i32
    %c0_i32_0 = arith.constant 0 : i32
    return %arg0, %c0_i32 : i32, i32
  }
}

module attributes {stable_mosaic.version = 11 : i64} {
  func.func @kernel(%arg0: i32, %arg1: memref<128x16xbf16, #tpu.memory_space<vmem>>, %arg2: memref<16x128xbf16, #tpu.memory_space<vmem>>, %arg3: memref<1x128xf32, #tpu.memory_space<vmem>>, %arg4: memref<128x128xf32, #tpu.memory_space<vmem>>) attributes {dimension_semantics = [#tpu.dimension_semantics<parallel>], iteration_bounds = array<i64: 1>, scalar_prefetch = 0 : i64, scratch_operands = 0 : i64, tpu.core_type = #tpu.core_type<tc>, window_params = [{transform_indices = @transform_0, window_bounds = array<i64: 128, 16>}, {pipeline_mode = #tpu.pipeline_mode<synchronous>, transform_indices = @transform_1, window_bounds = array<i64: 16, 128>}, {pipeline_mode = #tpu.pipeline_mode<synchronous>, transform_indices = @transform_2, window_bounds = array<i64: 1, 128>}, {transform_indices = @transform_3, window_bounds = array<i64: 128, 128>}]} {
    %c0 = arith.constant 0 : index
    %c0_0 = arith.constant 0 : index
    %0 = vector.load %arg1[%c0, %c0_0] : memref<128x16xbf16, #tpu.memory_space<vmem>>, vector<128x16xbf16>
    %c0_1 = arith.constant 0 : index
    %c0_2 = arith.constant 0 : index
    %1 = vector.load %arg2[%c0_1, %c0_2] : memref<16x128xbf16, #tpu.memory_space<vmem>>, vector<16x128xbf16>
    %cst = arith.constant dense<0.000000e+00> : vector<128x128xf32>
    %2 = tpu.matmul %0, %1, %cst {dimension_numbers = #tpu.dot_dimension_numbers<[1], [0], [0], [1], [0, 0, 1, 1], [], []>} : vector<128x16xbf16>, vector<16x128xbf16>, vector<128x128xf32> -> vector<128x128xf32>
    %c0_3 = arith.constant 0 : index
    %c0_4 = arith.constant 0 : index
    %3 = vector.load %arg3[%c0_3, %c0_4] : memref<1x128xf32, #tpu.memory_space<vmem>>, vector<1x128xf32>
    %4 = vector.broadcast %3 : vector<1x128xf32> to vector<128x128xf32>
    %5 = arith.addf %2, %4 : vector<128x128xf32>
    %c0_5 = arith.constant 0 : index
    %c0_6 = arith.constant 0 : index
    %6 = vector.load %arg4[%c0_5, %c0_6] : memref<128x128xf32, #tpu.memory_space<vmem>>, vector<128x128xf32>
    tpu.vector_store %arg4[%c0_5, %c0_6], %5 {strides = array<i32>} : memref<128x128xf32, #tpu.memory_space<vmem>>, vector<128x128xf32>,
    return
  }
  func.func @transform_0(%arg0: i32) -> (i32, i32) {
    %c0_i32 = arith.constant 0 : i32
    %c0_i32_0 = arith.constant 0 : i32
    return %arg0, %c0_i32 : i32, i32
  }
  func.func @transform_1(%arg0: i32) -> (i32, i32) {
    %c0_i32 = arith.constant 0 : i32
    %c0_i32_0 = arith.constant 0 : i32
    %c0_i32_1 = arith.constant 0 : i32
    return %c0_i32, %c0_i32_0 : i32, i32
  }
  func.func @transform_2(%arg0: i32) -> (i32, i32) {
    %c0_i32 = arith.constant 0 : i32
    %c0_i32_0 = arith.constant 0 : i32
    %c0_i32_1 = arith.constant 0 : i32
    return %c0_i32, %c0_i32_0 : i32, i32
  }
  func.func @transform_3(%arg0: i32) -> (i32, i32) {
    %c0_i32 = arith.constant 0 : i32
    %c0_i32_0 = arith.constant 0 : i32
    return %arg0, %c0_i32 : i32, i32
  }
}

module attributes {stable_mosaic.version = 11 : i64} {
  func.func @_avgpool3_bias_relu_kernel(%arg0: i32, %arg1: memref<1x10x10x128xf32, #tpu.memory_space<vmem>>, %arg2: memref<1x128xf32, #tpu.memory_space<vmem>>, %arg3: memref<1x8x8x128xf32, #tpu.memory_space<vmem>>) attributes {dimension_semantics = [#tpu.dimension_semantics<parallel>], iteration_bounds = array<i64: 2>, scalar_prefetch = 0 : i64, scratch_operands = 0 : i64, tpu.core_type = #tpu.core_type<tc>, window_params = [{transform_indices = @transform_0, window_bounds = array<i64: 1, 10, 10, 128>}, {pipeline_mode = #tpu.pipeline_mode<synchronous>, transform_indices = @transform_1, window_bounds = array<i64: 1, 128>}, {transform_indices = @transform_2, window_bounds = array<i64: 1, 8, 8, 128>}]} {
    %c0 = arith.constant 0 : index
    %c0_0 = arith.constant 0 : index
    %c0_1 = arith.constant 0 : index
    %c0_2 = arith.constant 0 : index
    %0 = vector.load %arg1[%c0, %c0_0, %c0_1, %c0_2] : memref<1x10x10x128xf32, #tpu.memory_space<vmem>>, vector<1x10x10x128xf32>
    %1 = vector.shape_cast %0 : vector<1x10x10x128xf32> to vector<10x10x128xf32>
    %2 = vector.extract_strided_slice %1 {offsets = [0, 0, 0], sizes = [10, 8, 128], strides = [1, 1, 1]} : vector<10x10x128xf32> to vector<10x8x128xf32>
    %3 = vector.extract_strided_slice %1 {offsets = [0, 1, 0], sizes = [10, 8, 128], strides = [1, 1, 1]} : vector<10x10x128xf32> to vector<10x8x128xf32>
    %4 = arith.addf %2, %3 : vector<10x8x128xf32>
    %5 = vector.extract_strided_slice %1 {offsets = [0, 2, 0], sizes = [10, 8, 128], strides = [1, 1, 1]} : vector<10x10x128xf32> to vector<10x8x128xf32>
    %6 = arith.addf %4, %5 : vector<10x8x128xf32>
    %7 = vector.extract_strided_slice %6 {offsets = [0, 0, 0], sizes = [8, 8, 128], strides = [1, 1, 1]} : vector<10x8x128xf32> to vector<8x8x128xf32>
    %8 = vector.extract_strided_slice %6 {offsets = [1, 0, 0], sizes = [8, 8, 128], strides = [1, 1, 1]} : vector<10x8x128xf32> to vector<8x8x128xf32>
    %9 = arith.addf %7, %8 : vector<8x8x128xf32>
    %10 = vector.extract_strided_slice %6 {offsets = [2, 0, 0], sizes = [8, 8, 128], strides = [1, 1, 1]} : vector<10x8x128xf32> to vector<8x8x128xf32>
    %11 = arith.addf %9, %10 : vector<8x8x128xf32>
    %c0_3 = arith.constant 0 : index
    %c0_4 = arith.constant 0 : index
    %12 = vector.load %arg2[%c0_3, %c0_4] : memref<1x128xf32, #tpu.memory_space<vmem>>, vector<1x128xf32>
    %13 = vector.shape_cast %12 : vector<1x128xf32> to vector<1x1x128xf32>
    %14 = vector.broadcast %13 : vector<1x1x128xf32> to vector<8x8x128xf32>
    %15 = arith.addf %11, %14 : vector<8x8x128xf32>
    %cst = arith.constant 0.000000e+00 : f32
    %16 = vector.broadcast %cst : f32 to vector<8x8x128xf32>
    %17 = arith.maximumf %15, %16 : vector<8x8x128xf32>
    %18 = vector.shape_cast %17 : vector<8x8x128xf32> to vector<1x8x8x128xf32>
    %c0_5 = arith.constant 0 : index
    %c0_6 = arith.constant 0 : index
    %c0_7 = arith.constant 0 : index
    %c0_8 = arith.constant 0 : index
    %19 = vector.load %arg3[%c0_5, %c0_6, %c0_7, %c0_8] : memref<1x8x8x128xf32, #tpu.memory_space<vmem>>, vector<1x8x8x128xf32>
    tpu.vector_store %arg3[%c0_5, %c0_6, %c0_7, %c0_8], %18 {strides = array<i32>} : memref<1x8x8x128xf32, #tpu.memory_space<vmem>>, vector<1x8x8x128xf32>,
    return
  }
  func.func @transform_0(%arg0: i32) -> (i32, i32, i32, i32) {
    %c0_i32 = arith.constant 0 : i32
    %c0_i32_0 = arith.constant 0 : i32
    %c0_i32_1 = arith.constant 0 : i32
    %c0_i32_2 = arith.constant 0 : i32
    return %arg0, %c0_i32, %c0_i32_0, %c0_i32_1 : i32, i32, i32, i32
  }
  func.func @transform_1(%arg0: i32) -> (i32, i32) {
    %c0_i32 = arith.constant 0 : i32
    %c0_i32_0 = arith.constant 0 : i32
    %c0_i32_1 = arith.constant 0 : i32
    return %c0_i32, %c0_i32_0 : i32, i32
  }
  func.func @transform_2(%arg0: i32) -> (i32, i32, i32, i32) {
    %c0_i32 = arith.constant 0 : i32
    %c0_i32_0 = arith.constant 0 : i32
    %c0_i32_1 = arith.constant 0 : i32
    %c0_i32_2 = arith.constant 0 : i32
    return %arg0, %c0_i32, %c0_i32_0, %c0_i32_1 : i32, i32, i32, i32
  }
}

</mosaic_0001>

<bundles_post_ra>
// kernel: inception_c_forward.15
= control target key start
LH: loop header
LB: loop body
LE: loop exit
PB: predicated region body
PF: predicated region fallthrough
CT: control target
= control target key end

     0   :  { %vm83_vm0 = vcmask 130048   ;;  %vm189_vm1 = vcmask 60416   ;;  %s407_s1 = inlined_call_operand.vmem [shape: bf16[16,8], index: 1, kind: input, shape index: {}]   ;;  %s408_s0 = inlined_call_operand.vmem [shape: bf16[128,16], index: 0, kind: input, shape index: {}]   ;;  %s409_s2 = inlined_call_operand.vmem [shape: f32[1,8], index: 2, kind: input, shape index: {}]   ;;  %s410_s3 = inlined_call_operand.vmem [shape: bf16[128,8], index: 3, kind: output, shape index: {}]  }
   0x1   :  { %v262_v0 = vld [vmem:[%s407_s1] sm:$0xff]  ;;  %v256_v2 = vld [vmem:[%s408_s0 + $0x10] sm:$0xff]  ;;  %v255_v5 = vld [vmem:[%s408_s0 + $0x8] sm:$0xff] }
   0x2   :  { %v254_v1 = vld [vmem:[%s408_s0] sm:$0xff]  ;;  %115 = vmatpush.bf16.msra.mxu0 %v262_v0  ;;  %263 = vmatpush.bf16.msra.mxu1 %v262_v0  ;;  %v260_v4 = vld [vmem:[%s408_s0 + $0x30] sm:$0xff]  ;;  %v257_v6 = vld [vmem:[%s408_s0 + $0x18] sm:$0xff] }
   0x3   :  { %v258_v3 = vld [vmem:[%s408_s0 + $0x20] sm:$0xff]  ;;  %264 = vmatpush.bf16.msra.mxu2 %v262_v0  ;;  %265 = vmatpush.bf16.msra.mxu3 %v262_v0  ;;  %v259_v7 = vld [vmem:[%s408_s0 + $0x28] sm:$0xff]  ;;  %v261_v8 = vld [vmem:[%s408_s0 + $0x38] sm:$0xff] }
   0x4   :  { %v325_v9 = vld [vmem:[%s409_s2] ss:$0 sm:$0xff] }
   0x5   :  { %246 = vmatmul.msk.bf16.vlgmr.msra.gmra.mxu0 %vm83_vm0, %v254_v1  ;;  %248 = vmatmul.msk.bf16.vlgmr.msra.gmra.mxu1 %vm83_vm0, %v256_v2 }
   0x6   :  { %250 = vmatmul.msk.bf16.vlgmr.msra.gmra.mxu2 %vm83_vm0, %v258_v3  ;;  %252 = vmatmul.msk.bf16.vlgmr.msra.gmra.mxu3 %vm83_vm0, %v260_v4 }
  0x15   :  { %247 = vmatmul.msk.bf16.gmra.mxu0 %vm83_vm0, %v255_v5  ;;  %249 = vmatmul.msk.bf16.gmra.mxu1 %vm83_vm0, %v257_v6 }
  0x16   :  { %251 = vmatmul.msk.bf16.gmra.mxu2 %vm83_vm0, %v259_v7  ;;  %253 = vmatmul.msk.bf16.gmra.mxu3 %vm83_vm0, %v261_v8 }
  0x82   :  { %v117_v10 = vpop.f32.mrf.mxu0  ;;  %v127_v11 = vpop.f32.mrf.mxu1 }
  0x83   :  { %v118_v12 = vadd.f32 %v325_v9, %v117_v10  ;;  %v128_v13 = vadd.f32 %v325_v9, %v127_v11 }
  0x85   :  { %v157_v14 = vmax.f32 %v118_v12, 0.0  ;;  %v161_v15 = vmax.f32 %v128_v13, 0.0 }
  0x87   :  { %v173_v16 = vpack.c.bf16 %v157_v14, %v157_v14  ;;  %v177_v17 = vpack.c.bf16 %v161_v15, %v161_v15 }
  0x89   :  { %190 = vst.msk [vmem:[%s410_s3] sm:$0xf] %vm189_vm1, %v173_v16  ;;  %v137_v18 = vpop.f32.mrf.mxu2  ;;  %v147_v19 = vpop.f32.mrf.mxu3 }
  0x8a   :  { %194 = vst.msk [vmem:[%s410_s3 + $0x10] sm:$0xf] %vm189_vm1, %v177_v17  ;;  %v138_v20 = vadd.f32 %v325_v9, %v137_v18  ;;  %v148_v21 = vadd.f32 %v325_v9, %v147_v19  ;;  %v119_v22 = vpop.f32.mrf.mxu0  ;;  %v129_v23 = vpop.f32.mrf.mxu1 }
  0x8b   :  { %v120_v24 = vadd.f32 %v325_v9, %v119_v22  ;;  %v130_v25 = vadd.f32 %v325_v9, %v129_v23 }
  0x8c   :  { %v165_v26 = vmax.f32 %v138_v20, 0.0  ;;  %v169_v27 = vmax.f32 %v148_v21, 0.0 }
  0x8d   :  { %v158_v28 = vmax.f32 %v120_v24, 0.0  ;;  %v162_v29 = vmax.f32 %v130_v25, 0.0 }
  0x8e   :  { %v181_v30 = vpack.c.bf16 %v165_v26, %v165_v26  ;;  %v185_v31 = vpack.c.bf16 %v169_v27, %v169_v27 }
  0x8f   :  { %v174_v32 = vpack.c.bf16 %v158_v28, %v158_v28  ;;  %v178_v33 = vpack.c.bf16 %v162_v29, %v162_v29 }
  0x90   :  { %198 = vst.msk [vmem:[%s410_s3 + $0x20] sm:$0xf] %vm189_vm1, %v181_v30 }
  0x91   :  { %202 = vst.msk [vmem:[%s410_s3 + $0x30] sm:$0xf] %vm189_vm1, %v185_v31  ;;  %v139_v34 = vpop.f32.mrf.mxu2  ;;  %v149_v35 = vpop.f32.mrf.mxu3 }
  0x92   :  { %191 = vst.msk [vmem:[%s410_s3 + $0x4] sm:$0xf] %vm189_vm1, %v174_v32  ;;  %v140_v36 = vadd.f32 %v325_v9, %v139_v34  ;;  %v150_v37 = vadd.f32 %v325_v9, %v149_v35  ;;  %v122_v38 = vpop.f32.mrf.mxu0  ;;  %v132_v39 = vpop.f32.mrf.mxu1 }
  0x93   :  { %195 = vst.msk [vmem:[%s410_s3 + $0x14] sm:$0xf] %vm189_vm1, %v178_v33  ;;  %v123_v40 = vadd.f32 %v325_v9, %v122_v38  ;;  %v133_v41 = vadd.f32 %v325_v9, %v132_v39 }
  0x94   :  { %v166_v42 = vmax.f32 %v140_v36, 0.0  ;;  %v170_v43 = vmax.f32 %v150_v37, 0.0 }
  0x95   :  { %v159_v44 = vmax.f32 %v123_v40, 0.0  ;;  %v163_v45 = vmax.f32 %v133_v41, 0.0 }
  0x96   :  { %v182_v46 = vpack.c.bf16 %v166_v42, %v166_v42  ;;  %v186_v47 = vpack.c.bf16 %v170_v43, %v170_v43 }
  0x97   :  { %v175_v48 = vpack.c.bf16 %v159_v44, %v159_v44  ;;  %v179_v49 = vpack.c.bf16 %v163_v45, %v163_v45 }
  0x98   :  { %199 = vst.msk [vmem:[%s410_s3 + $0x24] sm:$0xf] %vm189_vm1, %v182_v46 }
  0x99   :  { %203 = vst.msk [vmem:[%s410_s3 + $0x34] sm:$0xf] %vm189_vm1, %v186_v47  ;;  %v142_v50 = vpop.f32.mrf.mxu2  ;;  %v152_v51 = vpop.f32.mrf.mxu3 }
  0x9a   :  { %192 = vst.msk [vmem:[%s410_s3 + $0x8] sm:$0xf] %vm189_vm1, %v175_v48  ;;  %v143_v52 = vadd.f32 %v325_v9, %v142_v50  ;;  %v153_v53 = vadd.f32 %v325_v9, %v152_v51  ;;  %v124_v54 = vpop.f32.mrf.mxu0  ;;  %v134_v55 = vpop.f32.mrf.mxu1 }
  0x9b   :  { %196 = vst.msk [vmem:[%s410_s3 + $0x18] sm:$0xf] %vm189_vm1, %v179_v49  ;;  %v125_v56 = vadd.f32 %v325_v9, %v124_v54  ;;  %v135_v57 = vadd.f32 %v325_v9, %v134_v55 }
  0x9c   :  { %v167_v58 = vmax.f32 %v143_v52, 0.0  ;;  %v171_v59 = vmax.f32 %v153_v53, 0.0 }
  0x9d   :  { %v160_v60 = vmax.f32 %v125_v56, 0.0  ;;  %v164_v61 = vmax.f32 %v135_v57, 0.0 }
  0x9e   :  { %v183_v62 = vpack.c.bf16 %v167_v58, %v167_v58  ;;  %v187_v63 = vpack.c.bf16 %v171_v59, %v171_v59 }
  0x9f   :  { %v176_v0 = vpack.c.bf16 %v160_v60, %v160_v60  ;;  %v180_v1 = vpack.c.bf16 %v164_v61, %v164_v61 }
  0xa0   :  { %200 = vst.msk [vmem:[%s410_s3 + $0x28] sm:$0xf] %vm189_vm1, %v183_v62 }
  0xa1   :  { %204 = vst.msk [vmem:[%s410_s3 + $0x38] sm:$0xf] %vm189_vm1, %v187_v63  ;;  %v144_v2 = vpop.f32.mrf.mxu2  ;;  %v154_v3 = vpop.f32.mrf.mxu3 }
  0xa2   :  { %193 = vst.msk [vmem:[%s410_s3 + $0xc] sm:$0xf] %vm189_vm1, %v176_v0  ;;  %v145_v4 = vadd.f32 %v325_v9, %v144_v2  ;;  %v155_v5 = vadd.f32 %v325_v9, %v154_v3 }
  0xa3   :  { %197 = vst.msk [vmem:[%s410_s3 + $0x1c] sm:$0xf] %vm189_vm1, %v180_v1 }
  0xa4   :  { %v168_v6 = vmax.f32 %v145_v4, 0.0  ;;  %v172_v7 = vmax.f32 %v155_v5, 0.0 }
  0xa6   :  { %v184_v8 = vpack.c.bf16 %v168_v6, %v168_v6  ;;  %v188_v10 = vpack.c.bf16 %v172_v7, %v172_v7 }
  0xa8   :  { %201 = vst.msk [vmem:[%s410_s3 + $0x2c] sm:$0xf] %vm189_vm1, %v184_v8 }
  0xa9   :  { %205 = vst.msk [vmem:[%s410_s3 + $0x3c] sm:$0xf] %vm189_vm1, %v188_v10 }

// kernel: inception_c_forward.16
= control target key start
LH: loop header
LB: loop body
LE: loop exit
PB: predicated region body
PF: predicated region fallthrough
CT: control target
= control target key end

     0   :  { %s653_s12 = smov 0   ;;  %s852_s0 = inlined_call_operand.vmem [shape: bf16[2,8,8,8], index: 0, kind: input, shape index: {}]   ;;  %s853_s1 = inlined_call_operand.vmem [shape: bf16[56,8], index: 1, kind: input, shape index: {}]   ;;  %s854_s2 = inlined_call_operand.vmem [shape: f32[1,8], index: 2, kind: input, shape index: {}]   ;;  %s855_s3 = inlined_call_operand.vmem [shape: bf16[2,8,8,8], index: 3, kind: output, shape index: {}]  }
   0x1 LB: > { %s558_s13 = sadd.s32 4294967295, %s624_s12   ;;  %p562_p0 = scmp.ge.s32.totalorder %s624_s12, 1  ;;  %s624_s12 = sphi %s653_s12, %s13_s12  }
   0x2   : > { %p137_p1 = scmp.lt.s32.totalorder %s624_s12, 3 }
   0x4   : > { %p138_p2 = pnand %p562_p0, %p137_p1 }
   0x5   : > { %p161_p3 = scmp.lt.s32.totalorder (!%p138_p2), %s558_s13, 1  ;;  %s626_s18 = smov (!%p138_p2), 8  }
   0x6   : > { %141 = sbr.rel (%p138_p2) target bundleno = 388 (0x184), region = 32  ;;  %s627_s19 = smov (!%p138_p2), 16  }
   0x7   : > { %s628_s20 = smov (!%p138_p2), 24   ;;  %s629_s21 = smov (!%p138_p2), 32  }
   0x8   : > { %s630_s22 = smov (!%p138_p2), 40   ;;  %s632_s23 = smov (!%p138_p2), 48  }
   0xb   : > { %s857_s13 = smov (!%p161_p3, %s558_s13), 1  ;;  %v631_v6 = vmov 0   ;;  %v386_v15 = vld [vmem:[%s853_s1 + $0x18] sm:$0xf]  ;;  %vm445_vm0 = vcmask 1043456   ;;  %v589_v22 = vld [vmem:[%s853_s1 + $0x10] sm:$0xff] }
   0xc   : > { %s585_s14 = sshll.u32 %s857_s13, 5  ;;  %v424_v16 = vunpack.c.l.b16 %v386_v15  ;;  %v588_v23 = vld [vmem:[%s853_s1 + $0x8] sm:$0xff]  ;;  %v587_v26 = vld [vmem:[%s853_s1] sm:$0xff]  ;;  %vm277_vm1 = vcmask 64512   ;;  %vm298_vm2 = vcmask 130048   ;;  %vm315_vm3 = vcmask 195584  }
   0xd   : > { %s669_s17 = scalar_lea.vmem %s852_s0, %s585_s14  ;;  %vm332_vm4 = vcmask 261120   ;;  %vm349_vm5 = vcmask 326656   ;;  %vm365_vm6 = vcmask 392192   ;;  %vm432_vm7 = vcmask 457728   ;;  %s831_s9 = scalar_lea.vmem %s855_s3, %s585_s14 }
   0xe   : > { %v672_v0 = vld [vmem:[%s669_s17 + $0x10] sm:$0xf]  ;;  %v675_v1 = vld [vmem:[%s669_s17 + $0x8] sm:$0xf]  ;;  %v682_v2 = vld [vmem:[%s669_s17 + $0xc] sm:$0xf]  ;;  %v428_v17 = vpack.c.b16 %v424_v16, %v424_v16 }
   0xf   : > { %197 = vrot.lane.b32.xlu1 %v672_v0, %s626_s18  ;;  %193 = vrot.lane.b32.xlu0 %v675_v1, %s626_s18  ;;  %v177_v3 = vld [vmem:[%s669_s17 + $0x14] sm:$0xf]  ;;  %v178_v4 = vld [vmem:[%s669_s17 + $0x18] sm:$0xf]  ;;  %vm494_vm8 = vcmask 60416  }
  0x10   : > { %210 = vrot.lane.b32.xlu2 %v682_v2, %s627_s19  ;;  %v179_v5 = vld [vmem:[%s669_s17 + $0x1c] sm:$0xf]  ;;  %v707_v7 = vld [vmem:[%s669_s17] sm:$0xf]  ;;  %v710_v8 = vld [vmem:[%s669_s17 + $0x4] sm:$0xf] }
  0x11   : > { %v447_v18 = vsel %vm445_vm0, %v428_v17, 0 }
  0x12   : > { %591 = vmatpush.bf16.msra.mxu2 %v447_v18  ;;  %592 = vmatpush.bf16.msra.mxu3 %v447_v18 }
  0x13   : > { %453 = vmatpush.bf16.msra.mxu0 %v447_v18  ;;  %590 = vmatpush.bf16.msra.mxu1 %v447_v18 }
  0x16   : > { %594 = vmatpush.bf16.msra.mxu2 %v589_v22  ;;  %595 = vmatpush.bf16.msra.mxu3 %v589_v22 }
  0x17   : > { %199 = vrot.lane.b32.xlu1 %v177_v3, %s626_s18  ;;  %195 = vrot.lane.b32.xlu0 %v682_v2, %s626_s18 }
  0x18   : > { %212 = vrot.lane.b32.xlu2 %v672_v0, %s627_s19  ;;  %454 = vmatpush.bf16.msra.mxu0 %v589_v22 }
  0x19   : > { %593 = vmatpush.bf16.msra.mxu1 %v589_v22 }
  0x1a   : > { %597 = vmatpush.bf16.msra.mxu2 %v588_v23  ;;  %598 = vmatpush.bf16.msra.mxu3 %v588_v23 }
  0x1c   : > { %455 = vmatpush.bf16.msra.mxu0 %v588_v23 }
  0x1d   : > { %596 = vmatpush.bf16.msra.mxu1 %v588_v23 }
  0x1e   : > { %600 = vmatpush.bf16.msra.mxu2 %v587_v26  ;;  %601 = vmatpush.bf16.msra.mxu3 %v587_v26 }
  0x1f   : > { %216 = vrot.lane.b32.xlu1 %v178_v4, %s627_s19  ;;  %214 = vrot.lane.b32.xlu0 %v177_v3, %s627_s19 }
  0x20   : > { %227 = vrot.lane.b32.xlu2 %v672_v0, %s628_s20  ;;  %456 = vmatpush.bf16.msra.mxu0 %v587_v26 }
  0x21   : > { %599 = vmatpush.bf16.msra.mxu1 %v587_v26 }
  0x27   : > { %231 = vrot.lane.b32.xlu1 %v178_v4, %s628_s20  ;;  %229 = vrot.lane.b32.xlu0 %v177_v3, %s628_s20 }
  0x28   : > { %233 = vrot.lane.b32.xlu2 %v179_v5, %s628_s20 }
  0x2f   : > { %245 = vrot.lane.b32.xlu1 %v178_v4, %s629_s21  ;;  %243 = vrot.lane.b32.xlu0 %v177_v3, %s629_s21 }
  0x30   : > { %247 = vrot.lane.b32.xlu2 %v179_v5, %s629_s21 }
  0x37   : > { %259 = vrot.lane.b32.xlu1 %v178_v4, %s630_s22  ;;  %249 = vrot.lane.b32.xlu0 %v631_v6, %s629_s21 }
  0x38   : > { %261 = vrot.lane.b32.xlu2 %v179_v5, %s630_s22 }
  0x3f   : > { %273 = vrot.lane.b32.xlu1 %v179_v5, %s632_s23  ;;  %263 = vrot.lane.b32.xlu0 %v631_v6, %s630_s22 }
  0x40   : > { %275 = vrot.lane.b32.xlu2 %v631_v6, %s632_s23 }
  0x47   : > { %187 = vrot.lane.b32.xlu0 %v631_v6, %s626_s18  ;;  %189 = vrot.lane.b32.xlu1 %v707_v7, %s626_s18 }
  0x48   : > { %191 = vrot.lane.b32.xlu2 %v710_v8, %s626_s18 }
  0x4f   : > { %202 = vrot.lane.b32.xlu0 %v631_v6, %s627_s19  ;;  %204 = vrot.lane.b32.xlu1 %v707_v7, %s627_s19 }
  0x50   : > { %206 = vrot.lane.b32.xlu2 %v710_v8, %s627_s19 }
  0x57   : > { %208 = vrot.lane.b32.xlu0 %v675_v1, %s627_s19  ;;  %219 = vrot.lane.b32.xlu1 %v707_v7, %s628_s20 }
  0x58   : > { %221 = vrot.lane.b32.xlu2 %v710_v8, %s628_s20 }
  0x5f   : > { %223 = vrot.lane.b32.xlu0 %v675_v1, %s628_s20  ;;  %225 = vrot.lane.b32.xlu1 %v682_v2, %s628_s20 }
  0x60   : > { %235 = vrot.lane.b32.xlu2 %v710_v8, %s629_s21 }
  0x67   : > { %237 = vrot.lane.b32.xlu0 %v675_v1, %s629_s21  ;;  %239 = vrot.lane.b32.xlu1 %v682_v2, %s629_s21 }
  0x68   : > { %241 = vrot.lane.b32.xlu2 %v672_v0, %s629_s21 }
  0x6a   : > { %v736_v9 = vpop.permute.xlu2 %210 }
  0x6f   : > { %251 = vrot.lane.b32.xlu0 %v675_v1, %s630_s22  ;;  %253 = vrot.lane.b32.xlu1 %v682_v2, %s630_s22 }
  0x70   : > { %255 = vrot.lane.b32.xlu2 %v672_v0, %s630_s22 }
  0x72   : > { %v213_v10 = vpop.permute.xlu2 %212 }
  0x77   : > { %257 = vrot.lane.b32.xlu0 %v177_v3, %s630_s22  ;;  %265 = vrot.lane.b32.xlu1 %v682_v2, %s632_s23 }
  0x78   : > { %267 = vrot.lane.b32.xlu2 %v672_v0, %s632_s23 }
  0x7a   : > { %v749_v11 = vpop.permute.xlu2 %227 }
  0x7f   : > { %269 = vrot.lane.b32.xlu0 %v177_v3, %s632_s23  ;;  %271 = vrot.lane.b32.xlu1 %v178_v4, %s632_s23 }
  0x81   : > { %v198_v12 = vpop.permute.xlu1 %197  ;;  %v194_v13 = vpop.permute.xlu0 %193 }
  0x82   : > { %v234_v14 = vpop.permute.xlu2 %233  ;;  %v288_v36 = vsel %vm277_vm1, %v710_v8, %v194_v13  ;;  %v294_v41 = vsel %vm277_vm1, %v682_v2, %v198_v12 }
  0x83   : > { %v308_v42 = vsel %vm298_vm2, %v288_v36, %v736_v9 }
  0x84   : > { %v325_v48 = vsel %vm315_vm3, %v308_v42, %v749_v11 }
  0x89   : > { %v200_v19 = vpop.permute.xlu1 %199  ;;  %v196_v20 = vpop.permute.xlu0 %195 }
  0x8a   : > { %v248_v21 = vpop.permute.xlu2 %247  ;;  %v291_v33 = vsel %vm277_vm1, %v675_v1, %v196_v20  ;;  %v297_v43 = vsel %vm277_vm1, %v672_v0, %v200_v19 }
  0x8b   : > { %v310_v35 = vsel %vm298_vm2, %v291_v33, %v213_v10 }
  0x91   : > { %v217_v24 = vpop.permute.xlu1 %216  ;;  %v215_v25 = vpop.permute.xlu0 %214 }
  0x92   : > { %v262_v27 = vpop.permute.xlu2 %261  ;;  %v314_v44 = vsel %vm298_vm2, %v297_v43, %v217_v24  ;;  %v312_v45 = vsel %vm298_vm2, %v294_v41, %v215_v25 }
  0x93   : > { %v331_v51 = vsel %vm315_vm3, %v314_v44, %v234_v14 }
  0x99   : > { %v232_v28 = vpop.permute.xlu1 %231  ;;  %v230_v29 = vpop.permute.xlu0 %229 }
  0x9a   : > { %v276_v30 = vpop.permute.xlu2 %275  ;;  %v327_v37 = vsel %vm315_vm3, %v310_v35, %v230_v29  ;;  %v329_v47 = vsel %vm315_vm3, %v312_v45, %v232_v28 }
  0x9b   : > { %v346_v56 = vsel %vm332_vm4, %v329_v47, %v248_v21 }
  0xa1   : > { %v246_v31 = vpop.permute.xlu1 %245  ;;  %v244_v32 = vpop.permute.xlu0 %243 }
  0xa2   : > { %v192_v34 = vpop.permute.xlu2 %191  ;;  %v344_v40 = vsel %vm332_vm4, %v327_v37, %v246_v31  ;;  %v342_v49 = vsel %vm332_vm4, %v325_v48, %v244_v32 }
  0xa3   : > { %v361_v46 = vsel %vm349_vm5, %v344_v40, %v262_v27  ;;  %v285_v14 = vsel %vm277_vm1, %v707_v7, %v192_v34 }
  0xa4   : > { %v377_v50 = vsel %vm365_vm6, %v361_v46, %v276_v30 }
  0xa5   : > { %v404_v61 = vunpack.c.l.b16 %v377_v50 }
  0xa9   : > { %v260_v38 = vpop.permute.xlu1 %259  ;;  %v250_v39 = vpop.permute.xlu0 %249 }
  0xaa   : > { %v207_v52 = vpop.permute.xlu2 %206  ;;  %v359_v53 = vsel %vm349_vm5, %v342_v49, %v260_v38  ;;  %v348_v54 = vsel %vm332_vm4, %v331_v51, %v250_v39 }
  0xb1   : > { %v274_v55 = vpop.permute.xlu1 %273  ;;  %v264_v57 = vpop.permute.xlu0 %263 }
  0xb2   : > { %v375_v58 = vsel %vm365_vm6, %v359_v53, %v274_v55  ;;  %v363_v59 = vsel %vm349_vm5, %v346_v56, %v264_v57  ;;  %v364_v60 = vsel %vm349_vm5, %v348_v54, %v264_v57  ;;  %v222_v9 = vpop.permute.xlu2 %221  ;;  %v617_v55 = vld [vmem:[%s854_s2] ss:$0 sm:$0xff] }
  0xb3   : > { %v403_v62 = vunpack.c.l.b16 %v375_v58  ;;  %v378_v63 = vsel %vm365_vm6, %v363_v59, %v276_v30  ;;  %v379_v0 = vsel %vm365_vm6, %v364_v60, %v276_v30 }
  0xb4   : > { %v405_v1 = vunpack.c.l.b16 %v378_v63  ;;  %v406_v2 = vunpack.c.l.b16 %v379_v0 }
  0xb5   : > { %v409_v3 = vpack.c.b16 %v404_v61, %v403_v62 }
  0xb6   : > { %v410_v4 = vpack.c.b16 %v406_v2, %v405_v1 }
  0xb7   : > { %581 = vmatmul.msk.bf16.vlgmr.msra.gmra.mxu2 %vm432_vm7, %v409_v3 }
  0xb8   : > { %582 = vmatmul.msk.bf16.vlgmr.msra.gmra.mxu3 %vm432_vm7, %v410_v4 }
  0xb9   : > { %v188_v5 = vpop.permute.xlu0 %187  ;;  %v190_v6 = vpop.permute.xlu1 %189 }
  0xba   : > { %v282_v8 = vsel %vm277_vm1, 0, %v190_v6  ;;  %v236_v13 = vpop.permute.xlu2 %235  ;;  %v280_v28 = vsel %vm277_vm1, 0, %v188_v5 }
  0xbb   : > { %v304_v10 = vsel %vm298_vm2, %v282_v8, %v207_v52 }
  0xc1   : > { %v203_v11 = vpop.permute.xlu0 %202  ;;  %v205_v12 = vpop.permute.xlu1 %204 }
  0xc2   : > { %v242_v18 = vpop.permute.xlu2 %241  ;;  %v302_v29 = vsel %vm298_vm2, %v280_v28, %v205_v12  ;;  %v300_v33 = vsel %vm298_vm2, %v280_v28, %v203_v11 }
  0xc3   : > { %v319_v32 = vsel %vm315_vm3, %v302_v29, %v222_v9 }
  0xc9   : > { %v209_v15 = vpop.permute.xlu0 %208  ;;  %v220_v16 = vpop.permute.xlu1 %219 }
  0xca   : > { %v306_v17 = vsel %vm298_vm2, %v285_v14, %v209_v15  ;;  %v256_v24 = vpop.permute.xlu2 %255  ;;  %v317_v35 = vsel %vm315_vm3, %v300_v33, %v220_v16 }
  0xcb   : > { %v334_v38 = vsel %vm332_vm4, %v317_v35, %v236_v13 }
  0xd1   : > { %v224_v19 = vpop.permute.xlu0 %223  ;;  %v226_v20 = vpop.permute.xlu1 %225 }
  0xd2   : > { %v321_v21 = vsel %vm315_vm3, %v304_v10, %v224_v19  ;;  %v323_v22 = vsel %vm315_vm3, %v306_v17, %v226_v20  ;;  %v268_v37 = vpop.permute.xlu2 %267 }
  0xd3   : > { %v340_v23 = vsel %vm332_vm4, %v323_v22, %v242_v18 }
  0xd9   : > { %v238_v25 = vpop.permute.xlu0 %237  ;;  %v240_v26 = vpop.permute.xlu1 %239 }
  0xda   : > { %v338_v27 = vsel %vm332_vm4, %v321_v21, %v240_v26  ;;  %v336_v34 = vsel %vm332_vm4, %v319_v32, %v238_v25 }
  0xdb   : > { %v355_v7 = vsel %vm349_vm5, %v338_v27, %v256_v24 }
  0xe1   : > { %v252_v30 = vpop.permute.xlu0 %251  ;;  %v254_v31 = vpop.permute.xlu1 %253 }
  0xe2   : > { %v353_v36 = vsel %vm349_vm5, %v336_v34, %v254_v31  ;;  %v351_v40 = vsel %vm349_vm5, %v334_v38, %v252_v30 }
  0xe3   : > { %v369_v39 = vsel %vm365_vm6, %v353_v36, %v268_v37 }
  0xe4   : > { %v400_v45 = vunpack.c.l.b16 %v369_v39 }
  0xe9   : > { %v258_v41 = vpop.permute.xlu0 %257  ;;  %v266_v42 = vpop.permute.xlu1 %265 }
  0xea   : > { %v357_v43 = vsel %vm349_vm5, %v340_v23, %v258_v41  ;;  %v367_v44 = vsel %vm365_vm6, %v351_v40, %v266_v42 }
  0xeb   : > { %v399_v46 = vunpack.c.l.b16 %v367_v44 }
  0xed   : > { %v407_v47 = vpack.c.b16 %v400_v45, %v399_v46 }
  0xef   : > { %579 = vmatmul.msk.bf16.vlgmr.msra.gmra.mxu0 %vm432_vm7, %v407_v47 }
  0xf1   : > { %v270_v48 = vpop.permute.xlu0 %269  ;;  %v272_v49 = vpop.permute.xlu1 %271 }
  0xf2   : > { %v371_v50 = vsel %vm365_vm6, %v355_v7, %v270_v48  ;;  %v373_v51 = vsel %vm365_vm6, %v357_v43, %v272_v49 }
  0xf3   : > { %v401_v52 = vunpack.c.l.b16 %v371_v50  ;;  %v402_v53 = vunpack.c.l.b16 %v373_v51 }
  0xf5   : > { %v408_v54 = vpack.c.b16 %v402_v53, %v401_v52 }
  0xf7   : > { %580 = vmatmul.msk.bf16.vlgmr.msra.gmra.mxu1 %vm432_vm7, %v408_v54 }
 0x13a   : > { %v468_v56 = vpop.f32.mrf.mxu2 }
 0x13b   : > { %v469_v57 = vadd.f32 %v617_v55, %v468_v56  ;;  %v473_v58 = vpop.f32.mrf.mxu3 }
 0x13c   : > { %v474_v59 = vadd.f32 %v617_v55, %v473_v58 }
 0x13d   : > { %v482_v60 = vmax.f32 %v469_v57, 0.0 }
 0x13e   : > { %v484_v61 = vmax.f32 %v474_v59, 0.0 }
 0x13f   : > { %v490_v62 = vpack.c.bf16 %v482_v60, %v482_v60 }
 0x140   : > { %v492_v63 = vpack.c.bf16 %v484_v61, %v484_v61 }
 0x141   : > { %499 = vst.msk [vmem:[%s831_s9 + $0x10] sm:$0xf] %vm494_vm8, %v490_v62 }
 0x142   : > { %501 = vst.msk [vmem:[%s831_s9 + $0x18] sm:$0xf] %vm494_vm8, %v492_v63  ;;  %v470_v0 = vpop.f32.mrf.mxu2 }
 0x143   : > { %v471_v1 = vadd.f32 %v617_v55, %v470_v0  ;;  %v475_v2 = vpop.f32.mrf.mxu3 }
 0x144   : > { %v476_v3 = vadd.f32 %v617_v55, %v475_v2 }
 0x145   : > { %v483_v4 = vmax.f32 %v471_v1, 0.0 }
 0x146   : > { %v485_v5 = vmax.f32 %v476_v3, 0.0 }
 0x147   : > { %v491_v6 = vpack.c.bf16 %v483_v4, %v483_v4 }
 0x148   : > { %v493_v8 = vpack.c.bf16 %v485_v5, %v485_v5 }
 0x149   : > { %500 = vst.msk [vmem:[%s831_s9 + $0x14] sm:$0xf] %vm494_vm8, %v491_v6 }
 0x14a   : > { %502 = vst.msk [vmem:[%s831_s9 + $0x1c] sm:$0xf] %vm494_vm8, %v493_v8 }
 0x16c   : > { %v458_v9 = vpop.f32.mrf.mxu0 }
 0x16d   : > { %v459_v10 = vadd.f32 %v617_v55, %v458_v9 }
 0x16f   : > { %v478_v11 = vmax.f32 %v459_v10, 0.0 }
 0x171   : > { %v486_v12 = vpack.c.bf16 %v478_v11, %v478_v11 }
 0x173   : > { %495 = vst.msk [vmem:[%s831_s9] sm:$0xf] %vm494_vm8, %v486_v12 }
 0x174   : > { %v460_v13 = vpop.f32.mrf.mxu0  ;;  %v463_v14 = vpop.f32.mrf.mxu1 }
 0x175   : > { %v461_v15 = vadd.f32 %v617_v55, %v460_v13  ;;  %v464_v16 = vadd.f32 %v617_v55, %v463_v14 }
 0x177   : > { %v479_v17 = vmax.f32 %v461_v15, 0.0  ;;  %v480_v18 = vmax.f32 %v464_v16, 0.0 }
 0x179   : > { %v487_v19 = vpack.c.bf16 %v479_v17, %v479_v17  ;;  %v488_v20 = vpack.c.bf16 %v480_v18, %v480_v18 }
 0x17b   : > { %496 = vst.msk [vmem:[%s831_s9 + $0x4] sm:$0xf] %vm494_vm8, %v487_v19 }
 0x17c   : > { %497 = vst.msk [vmem:[%s831_s9 + $0x8] sm:$0xf] %vm494_vm8, %v488_v20  ;;  %v465_v21 = vpop.f32.mrf.mxu1 }
 0x17d   : > { %v466_v22 = vadd.f32 %v617_v55, %v465_v21 }
 0x17f   : > { %v481_v23 = vmax.f32 %v466_v22, 0.0 }
 0x181   : > { %v489_v24 = vpack.c.bf16 %v481_v23, %v481_v23 }
 0x183   : > { %498 = vst.msk [vmem:[%s831_s9 + $0xc] sm:$0xf] %vm494_vm8, %v489_v24 }
 0x184 PF: > { %s13_s12 = sadd.s32 1, %s624_s12  }
 0x185   : > { %p10_p4 = scmp.ge.s32.totalorder %s13_s12, 4  }
 0x187   :  { %12 = sbr.rel (!%p10_p4) target bundleno = 1 (0x1), region = 62 }

// kernel: inception_c_forward.14
= control target key start
LH: loop header
LB: loop body
LE: loop exit
PB: predicated region body
PF: predicated region fallthrough
CT: control target
= control target key end

     0   :  { %s644_s12 = smov 0   ;;  %s822_s0 = inlined_call_operand.vmem [shape: bf16[2,8,8,8], index: 0, kind: input, shape index: {}]   ;;  %s823_s1 = inlined_call_operand.vmem [shape: bf16[56,128], index: 1, kind: input, shape index: {}]   ;;  %s824_s2 = inlined_call_operand.vmem [shape: f32[1,128], index: 2, kind: input, shape index: {}]   ;;  %s825_s3 = inlined_call_operand.vmem [shape: f32[2,8,8,128], index: 3, kind: output, shape index: {}]  }
   0x1 LB: > { %s549_s13 = sadd.s32 4294967295, %s615_s12   ;;  %p553_p0 = scmp.ge.s32.totalorder %s615_s12, 1  ;;  %s615_s12 = sphi %s644_s12, %s13_s12  }
   0x2   : > { %p137_p1 = scmp.lt.s32.totalorder %s615_s12, 3 }
   0x4   : > { %p138_p2 = pnand %p553_p0, %p137_p1 }
   0x5   : > { %p161_p3 = scmp.lt.s32.totalorder (!%p138_p2), %s549_s13, 1  ;;  %s617_s18 = smov (!%p138_p2), 8  }
   0x6   : > { %141 = sbr.rel (%p138_p2) target bundleno = 386 (0x182), region = 32  ;;  %s618_s19 = smov (!%p138_p2), 16  }
   0x7   : > { %s619_s20 = smov (!%p138_p2), 24   ;;  %s620_s21 = smov (!%p138_p2), 32  }
   0x8   : > { %s621_s22 = smov (!%p138_p2), 40   ;;  %s623_s23 = smov (!%p138_p2), 48  }
   0xb   : > { %s827_s13 = smov (!%p161_p3, %s549_s13), 1  ;;  %v622_v6 = vmov 0   ;;  %v386_v15 = vld [vmem:[%s823_s1 + $0x18] sm:$0xf]  ;;  %vm445_vm0 = vcmask 1043456   ;;  %v580_v22 = vld [vmem:[%s823_s1 + $0x10] sm:$0xff] }
   0xc   : > { %s576_s14 = sshll.u32 %s827_s13, 5  ;;  %v424_v16 = vunpack.c.l.b16 %v386_v15  ;;  %v579_v23 = vld [vmem:[%s823_s1 + $0x8] sm:$0xff]  ;;  %v578_v26 = vld [vmem:[%s823_s1] sm:$0xff]  ;;  %vm277_vm1 = vcmask 64512   ;;  %vm298_vm2 = vcmask 130048   ;;  %vm315_vm3 = vcmask 195584  }
   0xd   : > { %s658_s17 = scalar_lea.vmem %s822_s0, %s576_s14  ;;  %vm332_vm4 = vcmask 261120   ;;  %vm349_vm5 = vcmask 326656   ;;  %vm365_vm6 = vcmask 392192   ;;  %vm432_vm7 = vcmask 457728   ;;  %s577_s7 = sshll.u32 %s827_s13, 6 }
   0xe   : > { %v661_v0 = vld [vmem:[%s658_s17 + $0x10] sm:$0xf]  ;;  %v664_v1 = vld [vmem:[%s658_s17 + $0x8] sm:$0xf]  ;;  %v671_v2 = vld [vmem:[%s658_s17 + $0xc] sm:$0xf]  ;;  %v428_v17 = vpack.c.b16 %v424_v16, %v424_v16  ;;  %s170_s10 = scalar_lea.vmem %s825_s3, %s577_s7 }
   0xf   : > { %197 = vrot.lane.b32.xlu1 %v661_v0, %s617_s18  ;;  %193 = vrot.lane.b32.xlu0 %v664_v1, %s617_s18  ;;  %v177_v3 = vld [vmem:[%s658_s17 + $0x14] sm:$0xf]  ;;  %v178_v4 = vld [vmem:[%s658_s17 + $0x18] sm:$0xf] }
  0x10   : > { %210 = vrot.lane.b32.xlu2 %v671_v2, %s618_s19  ;;  %v179_v5 = vld [vmem:[%s658_s17 + $0x1c] sm:$0xf]  ;;  %v696_v7 = vld [vmem:[%s658_s17] sm:$0xf]  ;;  %v699_v8 = vld [vmem:[%s658_s17 + $0x4] sm:$0xf] }
  0x11   : > { %v447_v18 = vsel %vm445_vm0, %v428_v17, 0 }
  0x12   : > { %582 = vmatpush.bf16.msra.mxu2 %v447_v18  ;;  %583 = vmatpush.bf16.msra.mxu3 %v447_v18 }
  0x13   : > { %453 = vmatpush.bf16.msra.mxu0 %v447_v18  ;;  %581 = vmatpush.bf16.msra.mxu1 %v447_v18 }
  0x16   : > { %585 = vmatpush.bf16.msra.mxu2 %v580_v22  ;;  %586 = vmatpush.bf16.msra.mxu3 %v580_v22 }
  0x17   : > { %199 = vrot.lane.b32.xlu1 %v177_v3, %s617_s18  ;;  %195 = vrot.lane.b32.xlu0 %v671_v2, %s617_s18 }
  0x18   : > { %212 = vrot.lane.b32.xlu2 %v661_v0, %s618_s19  ;;  %454 = vmatpush.bf16.msra.mxu0 %v580_v22 }
  0x19   : > { %584 = vmatpush.bf16.msra.mxu1 %v580_v22 }
  0x1a   : > { %588 = vmatpush.bf16.msra.mxu2 %v579_v23  ;;  %589 = vmatpush.bf16.msra.mxu3 %v579_v23 }
  0x1c   : > { %455 = vmatpush.bf16.msra.mxu0 %v579_v23 }
  0x1d   : > { %587 = vmatpush.bf16.msra.mxu1 %v579_v23 }
  0x1e   : > { %591 = vmatpush.bf16.msra.mxu2 %v578_v26  ;;  %592 = vmatpush.bf16.msra.mxu3 %v578_v26 }
  0x1f   : > { %216 = vrot.lane.b32.xlu1 %v178_v4, %s618_s19  ;;  %214 = vrot.lane.b32.xlu0 %v177_v3, %s618_s19 }
  0x20   : > { %227 = vrot.lane.b32.xlu2 %v661_v0, %s619_s20  ;;  %456 = vmatpush.bf16.msra.mxu0 %v578_v26 }
  0x21   : > { %590 = vmatpush.bf16.msra.mxu1 %v578_v26 }
  0x27   : > { %231 = vrot.lane.b32.xlu1 %v178_v4, %s619_s20  ;;  %229 = vrot.lane.b32.xlu0 %v177_v3, %s619_s20 }
  0x28   : > { %233 = vrot.lane.b32.xlu2 %v179_v5, %s619_s20 }
  0x2f   : > { %245 = vrot.lane.b32.xlu1 %v178_v4, %s620_s21  ;;  %243 = vrot.lane.b32.xlu0 %v177_v3, %s620_s21 }
  0x30   : > { %247 = vrot.lane.b32.xlu2 %v179_v5, %s620_s21 }
  0x37   : > { %259 = vrot.lane.b32.xlu1 %v178_v4, %s621_s22  ;;  %249 = vrot.lane.b32.xlu0 %v622_v6, %s620_s21 }
  0x38   : > { %261 = vrot.lane.b32.xlu2 %v179_v5, %s621_s22 }
  0x3f   : > { %273 = vrot.lane.b32.xlu1 %v179_v5, %s623_s23  ;;  %263 = vrot.lane.b32.xlu0 %v622_v6, %s621_s22 }
  0x40   : > { %275 = vrot.lane.b32.xlu2 %v622_v6, %s623_s23 }
  0x47   : > { %187 = vrot.lane.b32.xlu0 %v622_v6, %s617_s18  ;;  %189 = vrot.lane.b32.xlu1 %v696_v7, %s617_s18 }
  0x48   : > { %191 = vrot.lane.b32.xlu2 %v699_v8, %s617_s18 }
  0x4f   : > { %202 = vrot.lane.b32.xlu0 %v622_v6, %s618_s19  ;;  %204 = vrot.lane.b32.xlu1 %v696_v7, %s618_s19 }
  0x50   : > { %206 = vrot.lane.b32.xlu2 %v699_v8, %s618_s19 }
  0x57   : > { %208 = vrot.lane.b32.xlu0 %v664_v1, %s618_s19  ;;  %219 = vrot.lane.b32.xlu1 %v696_v7, %s619_s20 }
  0x58   : > { %221 = vrot.lane.b32.xlu2 %v699_v8, %s619_s20 }
  0x5f   : > { %223 = vrot.lane.b32.xlu0 %v664_v1, %s619_s20  ;;  %225 = vrot.lane.b32.xlu1 %v671_v2, %s619_s20 }
  0x60   : > { %235 = vrot.lane.b32.xlu2 %v699_v8, %s620_s21 }
  0x67   : > { %237 = vrot.lane.b32.xlu0 %v664_v1, %s620_s21  ;;  %239 = vrot.lane.b32.xlu1 %v671_v2, %s620_s21 }
  0x68   : > { %241 = vrot.lane.b32.xlu2 %v661_v0, %s620_s21 }
  0x6a   : > { %v725_v9 = vpop.permute.xlu2 %210 }
  0x6f   : > { %251 = vrot.lane.b32.xlu0 %v664_v1, %s621_s22  ;;  %253 = vrot.lane.b32.xlu1 %v671_v2, %s621_s22 }
  0x70   : > { %255 = vrot.lane.b32.xlu2 %v661_v0, %s621_s22 }
  0x72   : > { %v213_v10 = vpop.permute.xlu2 %212 }
  0x77   : > { %257 = vrot.lane.b32.xlu0 %v177_v3, %s621_s22  ;;  %265 = vrot.lane.b32.xlu1 %v671_v2, %s623_s23 }
  0x78   : > { %267 = vrot.lane.b32.xlu2 %v661_v0, %s623_s23 }
  0x7a   : > { %v738_v11 = vpop.permute.xlu2 %227 }
  0x7f   : > { %269 = vrot.lane.b32.xlu0 %v177_v3, %s623_s23  ;;  %271 = vrot.lane.b32.xlu1 %v178_v4, %s623_s23 }
  0x81   : > { %v198_v12 = vpop.permute.xlu1 %197  ;;  %v194_v13 = vpop.permute.xlu0 %193 }
  0x82   : > { %v234_v14 = vpop.permute.xlu2 %233  ;;  %v288_v36 = vsel %vm277_vm1, %v699_v8, %v194_v13  ;;  %v294_v41 = vsel %vm277_vm1, %v671_v2, %v198_v12 }
  0x83   : > { %v308_v42 = vsel %vm298_vm2, %v288_v36, %v725_v9 }
  0x84   : > { %v325_v48 = vsel %vm315_vm3, %v308_v42, %v738_v11 }
  0x89   : > { %v200_v19 = vpop.permute.xlu1 %199  ;;  %v196_v20 = vpop.permute.xlu0 %195 }
  0x8a   : > { %v248_v21 = vpop.permute.xlu2 %247  ;;  %v291_v33 = vsel %vm277_vm1, %v664_v1, %v196_v20  ;;  %v297_v43 = vsel %vm277_vm1, %v661_v0, %v200_v19 }
  0x8b   : > { %v310_v35 = vsel %vm298_vm2, %v291_v33, %v213_v10 }
  0x91   : > { %v217_v24 = vpop.permute.xlu1 %216  ;;  %v215_v25 = vpop.permute.xlu0 %214 }
  0x92   : > { %v262_v27 = vpop.permute.xlu2 %261  ;;  %v314_v44 = vsel %vm298_vm2, %v297_v43, %v217_v24  ;;  %v312_v45 = vsel %vm298_vm2, %v294_v41, %v215_v25 }
  0x93   : > { %v331_v51 = vsel %vm315_vm3, %v314_v44, %v234_v14 }
  0x99   : > { %v232_v28 = vpop.permute.xlu1 %231  ;;  %v230_v29 = vpop.permute.xlu0 %229 }
  0x9a   : > { %v276_v30 = vpop.permute.xlu2 %275  ;;  %v327_v37 = vsel %vm315_vm3, %v310_v35, %v230_v29  ;;  %v329_v47 = vsel %vm315_vm3, %v312_v45, %v232_v28 }
  0x9b   : > { %v346_v56 = vsel %vm332_vm4, %v329_v47, %v248_v21 }
  0xa1   : > { %v246_v31 = vpop.permute.xlu1 %245  ;;  %v244_v32 = vpop.permute.xlu0 %243 }
  0xa2   : > { %v192_v34 = vpop.permute.xlu2 %191  ;;  %v344_v40 = vsel %vm332_vm4, %v327_v37, %v246_v31  ;;  %v342_v49 = vsel %vm332_vm4, %v325_v48, %v244_v32 }
  0xa3   : > { %v361_v46 = vsel %vm349_vm5, %v344_v40, %v262_v27  ;;  %v285_v14 = vsel %vm277_vm1, %v696_v7, %v192_v34 }
  0xa4   : > { %v377_v50 = vsel %vm365_vm6, %v361_v46, %v276_v30 }
  0xa5   : > { %v404_v61 = vunpack.c.l.b16 %v377_v50 }
  0xa9   : > { %v260_v38 = vpop.permute.xlu1 %259  ;;  %v250_v39 = vpop.permute.xlu0 %249 }
  0xaa   : > { %v207_v52 = vpop.permute.xlu2 %206  ;;  %v359_v53 = vsel %vm349_vm5, %v342_v49, %v260_v38  ;;  %v348_v54 = vsel %vm332_vm4, %v331_v51, %v250_v39 }
  0xb1   : > { %v274_v55 = vpop.permute.xlu1 %273  ;;  %v264_v57 = vpop.permute.xlu0 %263 }
  0xb2   : > { %v375_v58 = vsel %vm365_vm6, %v359_v53, %v274_v55  ;;  %v363_v59 = vsel %vm349_vm5, %v346_v56, %v264_v57  ;;  %v364_v60 = vsel %vm349_vm5, %v348_v54, %v264_v57  ;;  %v222_v9 = vpop.permute.xlu2 %221  ;;  %v608_v55 = vld [vmem:[%s824_s2] ss:$0 sm:$0xff] }
  0xb3   : > { %v403_v62 = vunpack.c.l.b16 %v375_v58  ;;  %v378_v63 = vsel %vm365_vm6, %v363_v59, %v276_v30  ;;  %v379_v0 = vsel %vm365_vm6, %v364_v60, %v276_v30 }
  0xb4   : > { %v405_v1 = vunpack.c.l.b16 %v378_v63  ;;  %v406_v2 = vunpack.c.l.b16 %v379_v0 }
  0xb5   : > { %v409_v3 = vpack.c.b16 %v404_v61, %v403_v62 }
  0xb6   : > { %v410_v4 = vpack.c.b16 %v406_v2, %v405_v1 }
  0xb7   : > { %572 = vmatmul.msk.bf16.vlgmr.msra.gmra.mxu2 %vm432_vm7, %v409_v3 }
  0xb8   : > { %573 = vmatmul.msk.bf16.vlgmr.msra.gmra.mxu3 %vm432_vm7, %v410_v4 }
  0xb9   : > { %v188_v5 = vpop.permute.xlu0 %187  ;;  %v190_v6 = vpop.permute.xlu1 %189 }
  0xba   : > { %v282_v8 = vsel %vm277_vm1, 0, %v190_v6  ;;  %v236_v13 = vpop.permute.xlu2 %235  ;;  %v280_v28 = vsel %vm277_vm1, 0, %v188_v5 }
  0xbb   : > { %v304_v10 = vsel %vm298_vm2, %v282_v8, %v207_v52 }
  0xc1   : > { %v203_v11 = vpop.permute.xlu0 %202  ;;  %v205_v12 = vpop.permute.xlu1 %204 }
  0xc2   : > { %v242_v18 = vpop.permute.xlu2 %241  ;;  %v302_v29 = vsel %vm298_vm2, %v280_v28, %v205_v12  ;;  %v300_v33 = vsel %vm298_vm2, %v280_v28, %v203_v11 }
  0xc3   : > { %v319_v32 = vsel %vm315_vm3, %v302_v29, %v222_v9 }
  0xc9   : > { %v209_v15 = vpop.permute.xlu0 %208  ;;  %v220_v16 = vpop.permute.xlu1 %219 }
  0xca   : > { %v306_v17 = vsel %vm298_vm2, %v285_v14, %v209_v15  ;;  %v256_v24 = vpop.permute.xlu2 %255  ;;  %v317_v35 = vsel %vm315_vm3, %v300_v33, %v220_v16 }
  0xcb   : > { %v334_v38 = vsel %vm332_vm4, %v317_v35, %v236_v13 }
  0xd1   : > { %v224_v19 = vpop.permute.xlu0 %223  ;;  %v226_v20 = vpop.permute.xlu1 %225 }
  0xd2   : > { %v321_v21 = vsel %vm315_vm3, %v304_v10, %v224_v19  ;;  %v323_v22 = vsel %vm315_vm3, %v306_v17, %v226_v20  ;;  %v268_v37 = vpop.permute.xlu2 %267 }
  0xd3   : > { %v340_v23 = vsel %vm332_vm4, %v323_v22, %v242_v18 }
  0xd9   : > { %v238_v25 = vpop.permute.xlu0 %237  ;;  %v240_v26 = vpop.permute.xlu1 %239 }
  0xda   : > { %v338_v27 = vsel %vm332_vm4, %v321_v21, %v240_v26  ;;  %v336_v34 = vsel %vm332_vm4, %v319_v32, %v238_v25 }
  0xdb   : > { %v355_v7 = vsel %vm349_vm5, %v338_v27, %v256_v24 }
  0xe1   : > { %v252_v30 = vpop.permute.xlu0 %251  ;;  %v254_v31 = vpop.permute.xlu1 %253 }
  0xe2   : > { %v353_v36 = vsel %vm349_vm5, %v336_v34, %v254_v31  ;;  %v351_v40 = vsel %vm349_vm5, %v334_v38, %v252_v30 }
  0xe3   : > { %v369_v39 = vsel %vm365_vm6, %v353_v36, %v268_v37 }
  0xe4   : > { %v400_v45 = vunpack.c.l.b16 %v369_v39 }
  0xe9   : > { %v258_v41 = vpop.permute.xlu0 %257  ;;  %v266_v42 = vpop.permute.xlu1 %265 }
  0xea   : > { %v357_v43 = vsel %vm349_vm5, %v340_v23, %v258_v41  ;;  %v367_v44 = vsel %vm365_vm6, %v351_v40, %v266_v42 }
  0xeb   : > { %v399_v46 = vunpack.c.l.b16 %v367_v44 }
  0xed   : > { %v407_v47 = vpack.c.b16 %v400_v45, %v399_v46 }
  0xef   : > { %570 = vmatmul.msk.bf16.vlgmr.msra.gmra.mxu0 %vm432_vm7, %v407_v47 }
  0xf1   : > { %v270_v48 = vpop.permute.xlu0 %269  ;;  %v272_v49 = vpop.permute.xlu1 %271 }
  0xf2   : > { %v371_v50 = vsel %vm365_vm6, %v355_v7, %v270_v48  ;;  %v373_v51 = vsel %vm365_vm6, %v357_v43, %v272_v49 }
  0xf3   : > { %v401_v52 = vunpack.c.l.b16 %v371_v50  ;;  %v402_v53 = vunpack.c.l.b16 %v373_v51 }
  0xf5   : > { %v408_v54 = vpack.c.b16 %v402_v53, %v401_v52 }
  0xf7   : > { %571 = vmatmul.msk.bf16.vlgmr.msra.gmra.mxu1 %vm432_vm7, %v408_v54 }
 0x13a   : > { %v468_v56 = vpop.f32.mrf.mxu2 }
 0x13b   : > { %v469_v57 = vadd.f32 %v608_v55, %v468_v56  ;;  %v473_v58 = vpop.f32.mrf.mxu3 }
 0x13c   : > { %v474_v59 = vadd.f32 %v608_v55, %v473_v58 }
 0x13d   : > { %v482_v60 = vmax.f32 %v469_v57, 0.0 }
 0x13e   : > { %v484_v61 = vmax.f32 %v474_v59, 0.0 }
 0x13f   : > { %490 = vst [vmem:[%s170_s10 + $0x20] sm:$0xff] %v482_v60 }
 0x140   : > { %492 = vst [vmem:[%s170_s10 + $0x30] sm:$0xff] %v484_v61 }
 0x142   : > { %v470_v62 = vpop.f32.mrf.mxu2 }
 0x143   : > { %v471_v63 = vadd.f32 %v608_v55, %v470_v62  ;;  %v475_v0 = vpop.f32.mrf.mxu3 }
 0x144   : > { %v476_v1 = vadd.f32 %v608_v55, %v475_v0 }
 0x145   : > { %v483_v2 = vmax.f32 %v471_v63, 0.0 }
 0x146   : > { %v485_v3 = vmax.f32 %v476_v1, 0.0 }
 0x147   : > { %491 = vst [vmem:[%s170_s10 + $0x28] sm:$0xff] %v483_v2 }
 0x148   : > { %493 = vst [vmem:[%s170_s10 + $0x38] sm:$0xff] %v485_v3 }
 0x16c   : > { %v458_v4 = vpop.f32.mrf.mxu0 }
 0x16d   : > { %v459_v5 = vadd.f32 %v608_v55, %v458_v4 }
 0x16f   : > { %v478_v6 = vmax.f32 %v459_v5, 0.0 }
 0x171   : > { %486 = vst [vmem:[%s170_s10] sm:$0xff] %v478_v6 }
 0x174   : > { %v460_v8 = vpop.f32.mrf.mxu0  ;;  %v463_v9 = vpop.f32.mrf.mxu1 }
 0x175   : > { %v461_v10 = vadd.f32 %v608_v55, %v460_v8  ;;  %v464_v11 = vadd.f32 %v608_v55, %v463_v9 }
 0x177   : > { %v479_v12 = vmax.f32 %v461_v10, 0.0  ;;  %v480_v13 = vmax.f32 %v464_v11, 0.0 }
 0x179   : > { %487 = vst [vmem:[%s170_s10 + $0x8] sm:$0xff] %v479_v12 }
 0x17a   : > { %488 = vst [vmem:[%s170_s10 + $0x10] sm:$0xff] %v480_v13 }
 0x17c   : > { %v465_v14 = vpop.f32.mrf.mxu1 }
 0x17d   : > { %v466_v15 = vadd.f32 %v608_v55, %v465_v14 }
 0x17f   : > { %v481_v16 = vmax.f32 %v466_v15, 0.0 }
 0x181   : > { %489 = vst [vmem:[%s170_s10 + $0x18] sm:$0xff] %v481_v16 }
 0x182 PF: > { %s13_s12 = sadd.s32 1, %s615_s12  }
 0x183   : > { %p10_p4 = scmp.ge.s32.totalorder %s13_s12, 4  }
 0x185   :  { %12 = sbr.rel (!%p10_p4) target bundleno = 1 (0x1), region = 62 }

// kernel: inception_c_forward.13
= control target key start
LH: loop header
LB: loop body
LE: loop exit
PB: predicated region body
PF: predicated region fallthrough
CT: control target
= control target key end

     0   :  { %s1524_s25 = smov 8   ;;  %s1525_s7 = smov 16   ;;  %vm1104_vm0 = vcmask 130048   ;;  %vm1055_vm1 = vcmask 64512   ;;  %vm1366_vm2 = vcmask 1043456   ;;  %vm1137_vm3 = vcmask 195584   ;;  %s2692_s0 = inlined_call_operand.vmem [shape: bf16[16,14,8], index: 0, kind: input, shape index: {}]   ;;  %s2693_s1 = inlined_call_operand.vmem [shape: bf16[56,8], index: 1, kind: input, shape index: {}]   ;;  %s2694_s2 = inlined_call_operand.vmem [shape: f32[1,8], index: 2, kind: input, shape index: {}]   ;;  %s2695_s3 = inlined_call_operand.vmem [shape: bf16[16,8,8], index: 3, kind: output, shape index: {}]  }
   0x1   :  { %v1553_v0 = vld [vmem:[%s2692_s0 + $0x20] sm:$0xf]  ;;  %v1558_v1 = vld [vmem:[%s2692_s0 + $0x24] sm:$0x1]  ;;  %v17_v2 = vld [vmem:[%s2692_s0 + $0x10] sm:$0xf] }
   0x2   :  { %v167_v3 = vunpack.c.l.b16 %v1553_v0  ;;  %v168_v4 = vunpack.c.l.b16 %v1558_v1  ;;  %v1568_v5 = vld [vmem:[%s2692_s0 + $0x14] sm:$0x1]  ;;  %v163_v6 = vunpack.c.l.b16 %v17_v2  ;;  %v1573_v7 = vld [vmem:[%s2692_s0] sm:$0xf]  ;;  %v1578_v8 = vld [vmem:[%s2692_s0 + $0x4] sm:$0x1] }
   0x3   :  { %v164_v9 = vunpack.c.l.b16 %v1568_v5  ;;  %v159_v10 = vunpack.c.l.b16 %v1573_v7  ;;  %v160_v11 = vunpack.c.l.b16 %v1578_v8  ;;  %v20_v12 = vld [vmem:[%s2692_s0 + $0x28] sm:$0xf]  ;;  %v1589_v13 = vld [vmem:[%s2692_s0 + $0x2c] sm:$0x1]  ;;  %v1594_v14 = vld [vmem:[%s2692_s0 + $0x18] sm:$0xf] }
   0x4   :  { %v195_v15 = vpack.c.b16 %v168_v4, %v167_v3  ;;  %v169_v16 = vunpack.c.l.b16 %v20_v12  ;;  %v170_v17 = vunpack.c.l.b16 %v1589_v13  ;;  %v1602_v18 = vld [vmem:[%s2692_s0 + $0x1c] sm:$0x1]  ;;  %v165_v19 = vunpack.c.l.b16 %v1594_v14  ;;  %v1608_v20 = vld [vmem:[%s2692_s0 + $0x8] sm:$0xf]  ;;  %v1613_v21 = vld [vmem:[%s2692_s0 + $0xc] sm:$0x1] }
   0x5   :  { %v193_v22 = vpack.c.b16 %v164_v9, %v163_v6  ;;  %v191_v23 = vpack.c.b16 %v160_v11, %v159_v10  ;;  %v166_v24 = vunpack.c.l.b16 %v1602_v18  ;;  %v161_v25 = vunpack.c.l.b16 %v1608_v20  ;;  %v23_v34 = vld [vmem:[%s2692_s0 + $0x40] sm:$0xf]  ;;  %v1632_v38 = vld [vmem:[%s2692_s0 + $0x44] sm:$0x1]  ;;  %v1637_v39 = vld [vmem:[%s2692_s0 + $0x38] sm:$0xf] }
   0x6   :  { %v236_v26 = vshrl.u32 %v195_v15, 16  ;;  %v238_v27 = vshll.u32 %v195_v15, 16  ;;  %v196_v28 = vpack.c.b16 %v170_v17, %v169_v16  ;;  %v162_v29 = vunpack.c.l.b16 %v1613_v21  ;;  %v1644_v44 = vld [vmem:[%s2692_s0 + $0x3c] sm:$0x1]  ;;  %v1649_v49 = vld [vmem:[%s2692_s0 + $0x30] sm:$0xf] }
   0x7   :  { %v222_v30 = vshrl.u32 %v193_v22, 16  ;;  %v224_v31 = vshll.u32 %v193_v22, 16  ;;  %v208_v32 = vshrl.u32 %v191_v23, 16  ;;  %v210_v33 = vshll.u32 %v191_v23, 16  ;;  %v1654_v50 = vld [vmem:[%s2692_s0 + $0x34] sm:$0x1] }
   0x8   :  { %v240_v35 = vrot.slane %v238_v27, 1  ;;  %v245_v36 = vshll.u32 %v196_v28, 16  ;;  %v194_v37 = vpack.c.b16 %v166_v24, %v165_v19  ;;  %v243_v42 = vshrl.u32 %v196_v28, 16  ;;  %v26_v55 = vld [vmem:[%s2692_s0 + $0x58] sm:$0xf]  ;;  %s1526_s5 = smov 24  }
   0x9   :  { %v226_v40 = vrot.slane %v224_v31, 1  ;;  %v212_v41 = vrot.slane %v210_v33, 1  ;;  %v192_v43 = vpack.c.b16 %v162_v29, %v161_v25  ;;  %v175_v48 = vunpack.c.l.b16 %v23_v34  ;;  %v1662_v56 = vld [vmem:[%s2692_s0 + $0x5c] sm:$0x1]  ;;  %v25_v61 = vld [vmem:[%s2692_s0 + $0x50] sm:$0xf] }
   0xa   :  { %v241_v45 = vor.u32 %v240_v35, %v236_v26  ;;  %v247_v46 = vrot.slane %v245_v36, 1  ;;  %v231_v47 = vshll.u32 %v194_v37, 16  ;;  %v229_v53 = vshrl.u32 %v194_v37, 16  ;;  %v1678_v6 = vld [vmem:[%s2692_s0 + $0x54] sm:$0x1]  ;;  %s1527_s18 = smov 32  }
   0xb   :  { %v227_v51 = vor.u32 %v226_v40, %v222_v30  ;;  %v213_v52 = vor.u32 %v212_v41, %v208_v32  ;;  %v217_v54 = vshll.u32 %v192_v43, 16  ;;  %v215_v58 = vshrl.u32 %v192_v43, 16  ;;  %v24_v27 = vld [vmem:[%s2692_s0 + $0x48] sm:$0xf]  ;;  %v1694_v28 = vld [vmem:[%s2692_s0 + $0x4c] sm:$0x1] }
   0xc   :  { %327 = vrot.lane.b32.xlu2 %v241_v45, %s1524_s25  ;;  %v233_v57 = vrot.slane %v231_v47, 1  ;;  %v176_v59 = vunpack.c.l.b16 %v1632_v38  ;;  %v173_v60 = vunpack.c.l.b16 %v1637_v39  ;;  %v174_v63 = vunpack.c.l.b16 %v1644_v44  ;;  %v29_v47 = vld [vmem:[%s2692_s0 + $0x70] sm:$0xf]  ;;  %v1787_v21 = vld [vmem:[%s2692_s0 + $0x18] sm:$0xe]  ;;  %s1528_s28 = smov 40  }
   0xd   :  { %323 = vrot.lane.b32.xlu1 %v227_v51, %s1524_s25  ;;  %319 = vrot.lane.b32.xlu0 %v213_v52, %s1524_s25  ;;  %v219_v62 = vrot.slane %v217_v54, 1  ;;  %v171_v2 = vunpack.c.l.b16 %v1649_v49  ;;  %v172_v3 = vunpack.c.l.b16 %v1654_v50  ;;  %v181_v12 = vunpack.c.l.b16 %v26_v55  ;;  %v1712_v51 = vld [vmem:[%s2692_s0 + $0x74] sm:$0x1]  ;;  %v28_v52 = vld [vmem:[%s2692_s0 + $0x68] sm:$0xf]  ;;  %s1529_s13 = smov 48  }
   0xe   :  { %v199_v10 = vpack.c.b16 %v176_v59, %v175_v48  ;;  %v182_v15 = vunpack.c.l.b16 %v1662_v56  ;;  %v198_v16 = vpack.c.b16 %v174_v63, %v173_v60  ;;  %v179_v22 = vunpack.c.l.b16 %v25_v61  ;;  %v27_v54 = vld [vmem:[%s2692_s0 + $0x60] sm:$0xf]  ;;  %v1728_v55 = vld [vmem:[%s2692_s0 + $0x64] sm:$0x1]  ;;  %v1820_v1 = vld [vmem:[%s2692_s0 + $0x30] sm:$0xe] }
   0xf   :  { %v197_v19 = vpack.c.b16 %v172_v3, %v171_v2  ;;  %v248_v23 = vor.u32 %v247_v46, %v243_v42  ;;  %v180_v26 = vunpack.c.l.b16 %v1678_v6  ;;  %v234_v30 = vor.u32 %v233_v57, %v229_v53  ;;  %v1720_v53 = vld [vmem:[%s2692_s0 + $0x6c] sm:$0x1]  ;;  %v75_v38 = vld [vmem:[%s2692_s0 + $0x64] sm:$0x3]  ;;  %v62_v56 = vld [vmem:[%s2692_s0 + $0x78] sm:$0xe] }
  0x10   :  { %v266_v25 = vshll.u32 %v199_v10, 16  ;;  %v220_v31 = vor.u32 %v219_v62, %v215_v58  ;;  %v259_v32 = vshll.u32 %v198_v16, 16  ;;  %v264_v34 = vshrl.u32 %v199_v10, 16  ;;  %v2142_v6 = vld [vmem:[%s2692_s0 + $0x74] sm:$0x3] }
  0x11   :  { %v252_v33 = vshll.u32 %v197_v19, 16  ;;  %v257_v36 = vshrl.u32 %v198_v16, 16  ;;  %v202_v37 = vpack.c.b16 %v182_v15, %v181_v12  ;;  %v201_v41 = vpack.c.b16 %v180_v26, %v179_v22 }
  0x12   :  { %v268_v35 = vrot.slane %v266_v25, 1  ;;  %v261_v40 = vrot.slane %v259_v32, 1  ;;  %v177_v42 = vunpack.c.l.b16 %v24_v27  ;;  %v178_v43 = vunpack.c.l.b16 %v1694_v28  ;;  %v60_v28 = vld [vmem:[%s2692_s0 + $0x68] sm:$0xe] }
  0x13   :  { %v250_v45 = vshrl.u32 %v197_v19, 16  ;;  %v254_v46 = vrot.slane %v252_v33, 1  ;;  %v287_v60 = vshll.u32 %v202_v37, 16  ;;  %v280_v61 = vshll.u32 %v201_v41, 16 }
  0x14   :  { %329 = vrot.lane.b32.xlu2 %v248_v23, %s1524_s25  ;;  %v200_v48 = vpack.c.b16 %v178_v43, %v177_v42  ;;  %v269_v57 = vor.u32 %v268_v35, %v264_v34  ;;  %v262_v58 = vor.u32 %v261_v40, %v257_v36  ;;  %v187_v2 = vunpack.c.l.b16 %v29_v47  ;;  %v1748_v40 = vld [vmem:[%s2692_s0 + $0x7c] sm:$0x1] }
  0x15   :  { %325 = vrot.lane.b32.xlu1 %v234_v30, %s1524_s25  ;;  %321 = vrot.lane.b32.xlu0 %v220_v31, %s1524_s25  ;;  %v255_v62 = vor.u32 %v254_v46, %v250_v45  ;;  %v188_v10 = vunpack.c.l.b16 %v1712_v51  ;;  %v185_v12 = vunpack.c.l.b16 %v28_v52  ;;  %v186_v19 = vunpack.c.l.b16 %v1720_v53  ;;  %v2132_v51 = vld [vmem:[%s2692_s0 + $0x7c] sm:$0x3] }
  0x16   :  { %v273_v16 = vshll.u32 %v200_v48, 16  ;;  %v183_v22 = vunpack.c.l.b16 %v27_v54  ;;  %v184_v23 = vunpack.c.l.b16 %v1728_v55  ;;  %v285_v25 = vshrl.u32 %v202_v37, 16  ;;  %v30_v37 = vld [vmem:[%s2692_s0 + $0x78] sm:$0xf]  ;;  %v76_v55 = vld [vmem:[%s2692_s0 + $0x6c] sm:$0x3] }
  0x17   :  { %v289_v27 = vrot.slane %v287_v60, 1  ;;  %v278_v30 = vshrl.u32 %v201_v41, 16  ;;  %v282_v31 = vrot.slane %v280_v61, 1  ;;  %v205_v32 = vpack.c.b16 %v188_v10, %v187_v2 }
  0x18   :  { %v271_v33 = vshrl.u32 %v200_v48, 16  ;;  %v275_v34 = vrot.slane %v273_v16, 1  ;;  %v204_v35 = vpack.c.b16 %v186_v19, %v185_v12  ;;  %v203_v36 = vpack.c.b16 %v184_v23, %v183_v22  ;;  %v1757_v12 = vld [vmem:[%s2692_s0 + $0x8] sm:$0xe]  ;;  %v1764_v22 = vld [vmem:[%s2692_s0] sm:$0xe] }
  0x19   :  { %v290_v41 = vor.u32 %v289_v27, %v285_v25  ;;  %v283_v42 = vor.u32 %v282_v31, %v278_v30  ;;  %v308_v45 = vshll.u32 %v205_v32, 16  ;;  %v189_v46 = vunpack.c.l.b16 %v30_v37 }
  0x1a   :  { %v276_v47 = vor.u32 %v275_v34, %v271_v33  ;;  %v301_v48 = vshll.u32 %v204_v35, 16  ;;  %v294_v52 = vshll.u32 %v203_v36, 16  ;;  %v190_v54 = vunpack.c.l.b16 %v1748_v40 }
  0x1b   :  { %v299_v60 = vshrl.u32 %v204_v35, 16  ;;  %v368_v27 = vunpack.c.l.b16 %v1757_v12  ;;  %v83_v12 = vld [vmem:[%s2692_s0 + $0x20] sm:$0xc]  ;;  %vm1170_vm4 = vcmask 261120   ;;  %vm1203_vm5 = vcmask 326656  }
  0x1c   :  { %335 = vrot.lane.b32.xlu2 %v269_v57, %s1524_s25  ;;  %v306_v57 = vshrl.u32 %v205_v32, 16  ;;  %v303_v61 = vrot.slane %v301_v48, 1  ;;  %v296_v2 = vrot.slane %v294_v52, 1  ;;  %v206_v16 = vpack.c.b16 %v190_v54, %v189_v46 }
  0x1d   :  { %333 = vrot.lane.b32.xlu1 %v262_v58, %s1524_s25  ;;  %331 = vrot.lane.b32.xlu0 %v255_v62, %s1524_s25  ;;  %v310_v58 = vrot.slane %v308_v45, 1  ;;  %v292_v62 = vshrl.u32 %v203_v36, 16  ;;  %v367_v32 = vunpack.c.l.b16 %v1764_v22  ;;  %v384_v34 = vpack.c.b16 %v162_v29, %v368_v27  ;;  %v1792_v29 = vld [vmem:[%s2692_s0 + $0x10] sm:$0xe]  ;;  %v123_v22 = vld [vmem:[%s2692_s0 + $0x60] sm:$0x8] }
  0x1e   :  { %v304_v30 = vor.u32 %v303_v61, %v299_v60  ;;  %v315_v33 = vshll.u32 %v206_v16, 16  ;;  %v313_v36 = vshrl.u32 %v206_v16, 16  ;;  %v370_v46 = vunpack.c.l.b16 %v1787_v21  ;;  %v56_v16 = vld [vmem:[%s2692_s0 + $0x48] sm:$0xe]  ;;  %v2363_v21 = vld [vmem:[%s2692_s0 + $0x14] sm:$0x7] }
  0x1f   :  { %v311_v25 = vor.u32 %v310_v58, %v306_v57  ;;  %v297_v31 = vor.u32 %v296_v2, %v292_v62  ;;  %v383_v35 = vpack.c.b16 %v160_v11, %v367_v32  ;;  %v1815_v58 = vld [vmem:[%s2692_s0 + $0x38] sm:$0xe]  ;;  %v373_v60 = vunpack.c.l.b16 %v1820_v1  ;;  %v59_v2 = vld [vmem:[%s2692_s0 + $0x60] sm:$0xe] }
  0x20   :  { %v317_v37 = vrot.slane %v315_v33, 1  ;;  %v386_v52 = vpack.c.b16 %v166_v24, %v370_v46  ;;  %v374_v24 = vunpack.c.l.b16 %v1815_v58  ;;  %v379_v50 = vunpack.c.l.b16 %v59_v2 }
  0x21   :  { %v399_v11 = vrot.slane %v383_v35, 1  ;;  %v475_v2 = vunpack.c.l.b16 %v75_v38  ;;  %vm1236_vm6 = vcmask 392192   ;;  %vm1341_vm7 = vcmask 457728  }
  0x22   :  { %v318_v45 = vor.u32 %v317_v37, %v313_v36  ;;  %v402_v5 = vrot.slane %v386_v52, 1  ;;  %v390_v62 = vpack.c.b16 %v174_v63, %v374_v24  ;;  %v55_v63 = vld [vmem:[%s2692_s0 + $0x40] sm:$0xe]  ;;  %v395_v37 = vpack.c.b16 %v184_v23, %v379_v50 }
  0x23   :  { %vm1451_vm8 = vcmask 60416  }
  0x24   :  { %341 = vrot.lane.b32.xlu2 %v290_v41, %s1524_s25  ;;  %v1782_v41 = vld [vmem:[%s2692_s0 + $0x20] sm:$0xe]  ;;  %v406_v33 = vrot.slane %v390_v62, 1  ;;  %v380_v62 = vunpack.c.l.b16 %v60_v28 }
  0x25   :  { %339 = vrot.lane.b32.xlu1 %v283_v42, %s1524_s25  ;;  %337 = vrot.lane.b32.xlu0 %v276_v47, %s1524_s25  ;;  %v400_v42 = vrot.slane %v384_v34, 1  ;;  %v371_v8 = vunpack.c.l.b16 %v1782_v41  ;;  %v369_v47 = vunpack.c.l.b16 %v1792_v29  ;;  %v375_v34 = vunpack.c.l.b16 %v55_v63 }
  0x27   :  { %v387_v48 = vpack.c.b16 %v168_v4, %v371_v8  ;;  %v385_v57 = vpack.c.b16 %v164_v9, %v369_v47  ;;  %v1825_v4 = vld [vmem:[%s2692_s0 + $0x28] sm:$0xe] }
  0x28   :  { %v372_v61 = vunpack.c.l.b16 %v1825_v4 }
  0x29   :  { %v403_v18 = vrot.slane %v387_v48, 1  ;;  %v401_v9 = vrot.slane %v385_v57, 1 }
  0x2a   :  { %v388_v44 = vpack.c.b16 %v170_v17, %v372_v61 }
  0x2c   :  { %347 = vrot.lane.b32.xlu2 %v311_v25, %s1524_s25  ;;  %v389_v25 = vpack.c.b16 %v172_v3, %v373_v60  ;;  %v376_v3 = vunpack.c.l.b16 %v56_v16  ;;  %v404_v35 = vrot.slane %v388_v44, 1 }
  0x2d   :  { %345 = vrot.lane.b32.xlu1 %v304_v30, %s1524_s25  ;;  %343 = vrot.lane.b32.xlu0 %v297_v31, %s1524_s25  ;;  %v1857_v30 = vld [vmem:[%s2692_s0 + $0x4c] sm:$0x3]  ;;  %v71_v31 = vld [vmem:[%s2692_s0 + $0x44] sm:$0x3] }
  0x2e   :  { %v472_v13 = vunpack.c.l.b16 %v1857_v30  ;;  %v405_v17 = vrot.slane %v389_v25, 1  ;;  %v471_v36 = vunpack.c.l.b16 %v71_v31 }
  0x30   :  { %v487_v48 = vpack.c.b16 %v471_v36, %v375_v34 }
  0x34   :  { %417 = vrot.lane.b32.xlu2 %v400_v42, %s1525_s7  ;;  %v392_v42 = vpack.c.b16 %v178_v43, %v376_v3 }
  0x35   :  { %415 = vrot.lane.b32.xlu1 %v399_v11, %s1525_s7  ;;  %349 = vrot.lane.b32.xlu0 %v318_v45, %s1524_s25  ;;  %v391_v11 = vpack.c.b16 %v176_v59, %v375_v34  ;;  %v488_v45 = vpack.c.b16 %v472_v13, %v376_v3  ;;  %v411_v59 = vrot.slane %v395_v37, 1  ;;  %v396_v3 = vpack.c.b16 %v186_v19, %v380_v62  ;;  %v92_v19 = vld [vmem:[%s2692_s0 + $0x68] sm:$0xc] }
  0x36   :  { %v408_v43 = vrot.slane %v392_v42, 1  ;;  %v491_v34 = vpack.c.b16 %v475_v2, %v379_v50  ;;  %v91_v50 = vld [vmem:[%s2692_s0 + $0x60] sm:$0xc] }
  0x37   :  { %v407_v23 = vrot.slane %v391_v11, 1  ;;  %v568_v52 = vshrl.u32 %v488_v45, 16  ;;  %v571_v57 = vshll.u32 %v488_v45, 16  ;;  %v412_v45 = vrot.slane %v396_v3, 1 }
  0x39   :  { %v570_v16 = vrot.slane %v568_v52, 1  ;;  %v573_v25 = vrot.slane %v571_v57, 2  ;;  %v88_v52 = vld [vmem:[%s2692_s0 + $0x48] sm:$0xc]  ;;  %v103_v57 = vld [vmem:[%s2692_s0 + $0x44] sm:$0x7] }
  0x3a   :  { %v775_v3 = vunpack.c.l.b16 %v103_v57 }
  0x3c   :  { %423 = vrot.lane.b32.xlu2 %v403_v18, %s1525_s7  ;;  %v476_v18 = vunpack.c.l.b16 %v76_v55  ;;  %v595_v55 = vshll.u32 %v491_v34, 16 }
  0x3d   :  { %421 = vrot.lane.b32.xlu1 %v402_v5, %s1525_s7  ;;  %419 = vrot.lane.b32.xlu0 %v401_v9, %s1525_s7  ;;  %v560_v5 = vshrl.u32 %v487_v48, 16  ;;  %v563_v9 = vshll.u32 %v487_v48, 16  ;;  %v592_v48 = vshrl.u32 %v491_v34, 16 }
  0x3e   :  { %v492_v44 = vpack.c.b16 %v476_v18, %v380_v62 }
  0x3f   :  { %v562_v63 = vrot.slane %v560_v5, 1  ;;  %v565_v31 = vrot.slane %v563_v9, 2  ;;  %v684_v5 = vunpack.c.l.b16 %v92_v19  ;;  %v683_v9 = vunpack.c.l.b16 %v91_v50 }
  0x40   :  { %v600_v37 = vshrl.u32 %v492_v44, 16  ;;  %v603_v42 = vshll.u32 %v492_v44, 16 }
  0x41   :  { %v566_v11 = vor.u32 %v565_v31, %v562_v63  ;;  %v680_v31 = vunpack.c.l.b16 %v88_v52  ;;  %v699_v34 = vpack.c.b16 %v475_v2, %v683_v9 }
  0x42   :  { %v602_v38 = vrot.slane %v600_v37, 1  ;;  %v605_v53 = vrot.slane %v603_v42, 2 }
  0x43   :  { %v696_v42 = vpack.c.b16 %v472_v13, %v680_v31 }
  0x44   :  { %429 = vrot.lane.b32.xlu2 %v406_v33, %s1525_s7  ;;  %v87_v33 = vld [vmem:[%s2692_s0 + $0x40] sm:$0xc]  ;;  %v606_v44 = vor.u32 %v605_v53, %v602_v38 }
  0x45   :  { %427 = vrot.lane.b32.xlu1 %v405_v17, %s1525_s7  ;;  %425 = vrot.lane.b32.xlu0 %v404_v35, %s1525_s7  ;;  %v574_v17 = vor.u32 %v573_v25, %v570_v16  ;;  %v679_v35 = vunpack.c.l.b16 %v87_v33  ;;  %v700_v33 = vpack.c.b16 %v476_v18, %v684_v5  ;;  %v1925_v18 = vld [vmem:[%s2692_s0 + $0x6c] sm:$0x7]  ;;  %v712_v53 = vrot.slane %v696_v42, 2 }
  0x47   :  { %v695_v28 = vpack.c.b16 %v471_v36, %v679_v35  ;;  %v1903_v36 = vld [vmem:[%s2692_s0 + $0x64] sm:$0x7]  ;;  %v716_v2 = vrot.slane %v700_v33, 2 }
  0x48   :  { %v779_v16 = vunpack.c.l.b16 %v1903_v36 }
  0x49   :  { %v711_v62 = vrot.slane %v695_v28, 2 }
  0x4c   :  { %439 = vrot.lane.b32.xlu2 %v411_v59, %s1525_s7  ;;  %v594_v59 = vrot.slane %v592_v48, 1 }
  0x4d   :  { %433 = vrot.lane.b32.xlu1 %v408_v43, %s1525_s7  ;;  %431 = vrot.lane.b32.xlu0 %v407_v23, %s1525_s7  ;;  %v597_v43 = vrot.slane %v595_v55, 2  ;;  %v104_v23 = vld [vmem:[%s2692_s0 + $0x4c] sm:$0x7] }
  0x4e   :  { %v776_v25 = vunpack.c.l.b16 %v104_v23  ;;  %v1932_v23 = vld [vmem:[%s2692_s0 + $0x4] sm:$0x3] }
  0x4f   :  { %v598_v63 = vor.u32 %v597_v43, %v594_v59  ;;  %v780_v59 = vunpack.c.l.b16 %v1925_v18 }
  0x50   :  { %v792_v37 = vpack.c.b16 %v776_v25, %v680_v31  ;;  %v463_v31 = vunpack.c.l.b16 %v1932_v23 }
  0x52   :  { %v872_v28 = vshrl.u32 %v792_v37, 16  ;;  %v875_v38 = vshll.u32 %v792_v37, 16 }
  0x54   :  { %641 = vrot.lane.b32.xlu2 %v574_v17, %s1526_s5  ;;  %v795_v17 = vpack.c.b16 %v779_v16, %v683_v9  ;;  %v877_v43 = vrot.slane %v875_v38, 3  ;;  %v120_v9 = vld [vmem:[%s2692_s0 + $0x48] sm:$0x8]  ;;  %v67_v38 = vld [vmem:[%s2692_s0 + $0x24] sm:$0x3] }
  0x55   :  { %639 = vrot.lane.b32.xlu1 %v566_v11, %s1526_s5  ;;  %441 = vrot.lane.b32.xlu0 %v412_v45, %s1525_s7  ;;  %v791_v11 = vpack.c.b16 %v775_v3, %v679_v35  ;;  %v715_v45 = vrot.slane %v699_v34, 2  ;;  %v874_v35 = vrot.slane %v872_v28, 2 }
  0x56   :  { %v896_v48 = vshrl.u32 %v795_v17, 16  ;;  %v899_v55 = vshll.u32 %v795_v17, 16  ;;  %v984_v17 = vunpack.c.l.b16 %v120_v9 }
  0x57   :  { %v864_v19 = vshrl.u32 %v791_v11, 16  ;;  %v867_v50 = vshll.u32 %v791_v11, 16  ;;  %v878_v34 = vor.u32 %v877_v43, %v874_v35 }
  0x58   :  { %v898_v30 = vrot.slane %v896_v48, 2  ;;  %v901_v13 = vrot.slane %v899_v55, 3 }
  0x59   :  { %v866_v52 = vrot.slane %v864_v19, 2  ;;  %v869_v57 = vrot.slane %v867_v50, 3 }
  0x5a   :  { %v902_v33 = vor.u32 %v901_v13, %v898_v30  ;;  %v987_v13 = vunpack.c.l.b16 %v123_v22 }
  0x5b   :  { %v870_v37 = vor.u32 %v869_v57, %v866_v52  ;;  %v467_v57 = vunpack.c.l.b16 %v67_v38  ;;  %v2004_v38 = vld [vmem:[%s2692_s0 + $0x4] sm:$0x7] }
  0x5c   :  { %735 = vrot.lane.b32.xlu2 %v711_v62, %s1527_s18  ;;  %v796_v62 = vpack.c.b16 %v780_v59, %v684_v5  ;;  %v479_v5 = vpack.c.b16 %v463_v31, %v367_v32  ;;  %v1961_v32 = vld [vmem:[%s2692_s0 + $0x2c] sm:$0x3] }
  0x5d   :  { %649 = vrot.lane.b32.xlu1 %v606_v44, %s1526_s5  ;;  %647 = vrot.lane.b32.xlu0 %v598_v63, %s1526_s5  ;;  %v119_v63 = vld [vmem:[%s2692_s0 + $0x40] sm:$0x8]  ;;  %v468_v35 = vunpack.c.l.b16 %v1961_v32 }
  0x5e   :  { %v983_v42 = vunpack.c.l.b16 %v119_v63  ;;  %v904_v11 = vshrl.u32 %v796_v62, 16  ;;  %v907_v18 = vshll.u32 %v796_v62, 16  ;;  %v499_v19 = vshll.u32 %v479_v5, 16 }
  0x60   :  { %v999_v48 = vpack.c.b16 %v775_v3, %v983_v42  ;;  %v906_v55 = vrot.slane %v904_v11, 2  ;;  %v909_v28 = vrot.slane %v907_v18, 3  ;;  %v1971_v3 = vld [vmem:[%s2692_s0 + $0xc] sm:$0x3]  ;;  %v501_v63 = vrot.slane %v499_v19, 2 }
  0x61   :  { %v464_v9 = vunpack.c.l.b16 %v1971_v3  ;;  %v79_v19 = vld [vmem:[%s2692_s0] sm:$0xc] }
  0x62   :  { %v1015_v43 = vrot.slane %v999_v48, 3  ;;  %v910_v52 = vor.u32 %v909_v28, %v906_v55 }
  0x63   :  { %v480_v42 = vpack.c.b16 %v464_v9, %v368_v27  ;;  %v1997_v27 = vld [vmem:[%s2692_s0 + $0xc] sm:$0x7] }
  0x64   :  { %745 = vrot.lane.b32.xlu2 %v716_v2, %s1527_s18  ;;  %v1000_v2 = vpack.c.b16 %v776_v25, %v984_v17  ;;  %v484_v17 = vpack.c.b16 %v468_v35, %v372_v61 }
  0x65   :  { %743 = vrot.lane.b32.xlu1 %v715_v45, %s1527_s18  ;;  %737 = vrot.lane.b32.xlu0 %v712_v53, %s1527_s18  ;;  %v124_v45 = vld [vmem:[%s2692_s0 + $0x68] sm:$0x8]  ;;  %v496_v53 = vshrl.u32 %v479_v5, 16  ;;  %v504_v61 = vshrl.u32 %v480_v42, 16 }
  0x66   :  { %v1939_v44 = vpop.permute.xlu2 %327  ;;  %v1016_v50 = vrot.slane %v1000_v2, 3  ;;  %v988_v30 = vunpack.c.l.b16 %v124_v45  ;;  %v536_v18 = vshrl.u32 %v484_v17, 16  ;;  %v539_v4 = vshll.u32 %v484_v17, 16 }
  0x67   :  { %v498_v62 = vrot.slane %v496_v53, 1  ;;  %v507_v45 = vshll.u32 %v480_v42, 16  ;;  %v506_v28 = vrot.slane %v504_v61, 1  ;;  %v80_v53 = vld [vmem:[%s2692_s0 + $0x8] sm:$0xc]  ;;  %v671_v17 = vunpack.c.l.b16 %v79_v19 }
  0x68   :  { %v538_v48 = vrot.slane %v536_v18, 1  ;;  %v541_v55 = vrot.slane %v539_v4, 2  ;;  %v84_v18 = vld [vmem:[%s2692_s0 + $0x28] sm:$0xc] }
  0x69   :  { %v509_v22 = vrot.slane %v507_v45, 2 }
  0x6c   :  { %951 = vrot.lane.b32.xlu2 %v902_v33, %s1528_s28  ;;  %v1004_v33 = vpack.c.b16 %v780_v59, %v988_v30  ;;  %v502_v59 = vor.u32 %v501_v63, %v498_v62  ;;  %v767_v62 = vunpack.c.l.b16 %v2004_v38 }
  0x6d   :  { %945 = vrot.lane.b32.xlu1 %v878_v34, %s1528_s28  ;;  %943 = vrot.lane.b32.xlu0 %v870_v37, %s1528_s28  ;;  %v1003_v34 = vpack.c.b16 %v779_v16, %v987_v13  ;;  %v483_v37 = vpack.c.b16 %v467_v57, %v371_v8  ;;  %v675_v13 = vunpack.c.l.b16 %v83_v12 }
  0x6e   :  { %v1963_v25 = vpop.permute.xlu2 %329  ;;  %v1020_v36 = vrot.slane %v1004_v33, 3  ;;  %v510_v33 = vor.u32 %v509_v22, %v506_v28 }
  0x6f   :  { %v1019_v16 = vrot.slane %v1003_v34, 3  ;;  %v528_v5 = vshrl.u32 %v483_v37, 16  ;;  %v531_v2 = vshll.u32 %v483_v37, 16  ;;  %v672_v34 = vunpack.c.l.b16 %v80_v53 }
  0x70   :  { %v691_v37 = vpack.c.b16 %v467_v57, %v675_v13  ;;  %v2035_v57 = vld [vmem:[%s2692_s0 + $0x2c] sm:$0x7] }
  0x71   :  { %v530_v41 = vrot.slane %v528_v5, 1  ;;  %v533_v8 = vrot.slane %v531_v2, 2  ;;  %v2040_v5 = vld [vmem:[%s2692_s0 + $0x24] sm:$0x7] }
  0x72   :  { %v771_v28 = vunpack.c.l.b16 %v2040_v5 }
  0x73   :  { %v534_v63 = vor.u32 %v533_v8, %v530_v41  ;;  %v772_v8 = vunpack.c.l.b16 %v2035_v57 }
  0x74   :  { %1041 = vrot.lane.b32.xlu2 %v1016_v50, %s1529_s13 }
  0x75   :  { %1039 = vrot.lane.b32.xlu1 %v1015_v43, %s1529_s13  ;;  %953 = vrot.lane.b32.xlu0 %v910_v52, %s1528_s28  ;;  %v768_v43 = vunpack.c.l.b16 %v1997_v27  ;;  %v542_v52 = vor.u32 %v541_v55, %v538_v48  ;;  %v676_v55 = vunpack.c.l.b16 %v84_v18 }
  0x76   :  { %v1988_v11 = vpop.permute.xlu2 %335 }
  0x77   :  { %v784_v42 = vpack.c.b16 %v768_v43, %v672_v34 }
  0x79   :  { %v808_v2 = vshrl.u32 %v784_v42, 16  ;;  %v811_v61 = vshll.u32 %v784_v42, 16 }
  0x7b   :  { %v810_v22 = vrot.slane %v808_v2, 2  ;;  %v813_v38 = vrot.slane %v811_v61, 3 }
  0x7c   :  { %623 = vrot.lane.b32.xlu2 %v502_v59, %s1526_s5  ;;  %v783_v59 = vpack.c.b16 %v767_v62, %v671_v17 }
  0x7d   :  { %1049 = vrot.lane.b32.xlu1 %v1020_v36, %s1529_s13  ;;  %1047 = vrot.lane.b32.xlu0 %v1019_v16, %s1529_s13  ;;  %v688_v36 = vpack.c.b16 %v464_v9, %v672_v34  ;;  %v687_v16 = vpack.c.b16 %v463_v31, %v671_v17  ;;  %v707_v31 = vrot.slane %v691_v37, 2  ;;  %v787_v34 = vpack.c.b16 %v771_v28, %v675_v13 }
  0x7e   :  { %v2006_v3 = vpop.permute.xlu2 %341  ;;  %v800_v45 = vshrl.u32 %v783_v59, 16  ;;  %v803_v48 = vshll.u32 %v783_v59, 16  ;;  %v814_v59 = vor.u32 %v813_v38, %v810_v22 }
  0x7f   :  { %v2014_v50 = vpop.permute.xlu1 %323  ;;  %v2016_v30 = vpop.permute.xlu0 %319  ;;  %v704_v12 = vrot.slane %v688_v36, 2  ;;  %v703_v41 = vrot.slane %v687_v16, 2  ;;  %v835_v2 = vshll.u32 %v787_v34, 16 }
  0x80   :  { %v802_v53 = vrot.slane %v800_v45, 2  ;;  %v805_v19 = vrot.slane %v803_v48, 3  ;;  %v116_v48 = vld [vmem:[%s2692_s0 + $0x28] sm:$0x8] }
  0x81   :  { %v837_v45 = vrot.slane %v835_v2, 3 }
  0x82   :  { %v806_v36 = vor.u32 %v805_v19, %v802_v53 }
  0x84   :  { %633 = vrot.lane.b32.xlu2 %v542_v52, %s1526_s5  ;;  %v692_v52 = vpack.c.b16 %v468_v35, %v676_v55 }
  0x85   :  { %631 = vrot.lane.b32.xlu1 %v534_v63, %s1526_s5  ;;  %625 = vrot.lane.b32.xlu0 %v510_v33, %s1526_s5  ;;  %v111_v63 = vld [vmem:[%s2692_s0] sm:$0x8]  ;;  %v788_v33 = vpack.c.b16 %v772_v8, %v676_v55  ;;  %v1070_v55 = vsel %vm1055_vm1, %v1553_v0, %v1939_v44 }
  0x86   :  { %v2030_v4 = vpop.permute.xlu2 %347  ;;  %v708_v16 = vrot.slane %v692_v52, 2  ;;  %v975_v18 = vunpack.c.l.b16 %v111_v63  ;;  %v980_v52 = vunpack.c.l.b16 %v116_v48 }
  0x87   :  { %v2042_v9 = vpop.permute.xlu1 %325  ;;  %v322_v23 = vpop.permute.xlu0 %321  ;;  %v840_v57 = vshrl.u32 %v788_v33, 16  ;;  %v843_v5 = vshll.u32 %v788_v33, 16 }
  0x88   :  { %v1061_v17 = vsel %vm1055_vm1, %v1608_v20, %v322_v23  ;;  %v991_v13 = vpack.c.b16 %v767_v62, %v975_v18  ;;  %v115_v62 = vld [vmem:[%s2692_s0 + $0x20] sm:$0x8] }
  0x89   :  { %v842_v20 = vrot.slane %v840_v57, 2  ;;  %v845_v23 = vrot.slane %v843_v5, 3  ;;  %v979_v44 = vunpack.c.l.b16 %v115_v62  ;;  %v2107_v5 = vld [vmem:[%s2692_s0 + $0x54] sm:$0x3] }
  0x8a   :  { %v1007_v19 = vrot.slane %v991_v13, 3 }
  0x8b   :  { %v846_v63 = vor.u32 %v845_v23, %v842_v20 }
  0x8c   :  { %727 = vrot.lane.b32.xlu2 %v707_v31, %s1527_s18  ;;  %v832_v31 = vshrl.u32 %v787_v34, 16  ;;  %v996_v34 = vpack.c.b16 %v772_v8, %v980_v52  ;;  %v58_v8 = vld [vmem:[%s2692_s0 + $0x58] sm:$0xe] }
  0x8d   :  { %721 = vrot.lane.b32.xlu1 %v704_v12, %s1527_s18  ;;  %719 = vrot.lane.b32.xlu0 %v703_v41, %s1527_s18  ;;  %v112_v41 = vld [vmem:[%s2692_s0 + $0x8] sm:$0x8]  ;;  %v378_v20 = vunpack.c.l.b16 %v58_v8  ;;  %v477_v8 = vunpack.c.l.b16 %v2142_v6  ;;  %v2257_v6 = vld [vmem:[%s2692_s0 + $0x7c] sm:$0x7] }
  0x8e   :  { %v418_v37 = vpop.permute.xlu2 %417  ;;  %v834_v61 = vrot.slane %v832_v31, 2  ;;  %v976_v33 = vunpack.c.l.b16 %v112_v41  ;;  %v1012_v13 = vrot.slane %v996_v34, 3  ;;  %v478_v34 = vunpack.c.l.b16 %v2132_v51 }
  0x8f   :  { %v2057_v42 = vsel %vm1104_vm0, %v1061_v17, %v418_v37  ;;  %v334_v32 = vpop.permute.xlu1 %333  ;;  %v2059_v35 = vpop.permute.xlu0 %331  ;;  %v61_v17 = vld [vmem:[%s2692_s0 + $0x70] sm:$0xe]  ;;  %v2090_v37 = vld [vmem:[%s2692_s0 + $0x5c] sm:$0x3] }
  0x90   :  { %v838_v0 = vor.u32 %v837_v45, %v834_v61  ;;  %v1079_v18 = vsel %vm1055_vm1, %v1637_v39, %v334_v32  ;;  %v381_v31 = vunpack.c.l.b16 %v61_v17  ;;  %v474_v2 = vunpack.c.l.b16 %v2090_v37 }
  0x91   :  { %v473_v61 = vunpack.c.l.b16 %v2107_v5 }
  0x92   :  { %v397_v45 = vpack.c.b16 %v188_v10, %v381_v31  ;;  %v490_v48 = vpack.c.b16 %v474_v2, %v378_v20 }
  0x94   :  { %929 = vrot.lane.b32.xlu2 %v814_v59, %s1528_s28  ;;  %v995_v59 = vpack.c.b16 %v771_v28, %v979_v44  ;;  %v584_v52 = vshrl.u32 %v490_v48, 16 }
  0x95   :  { %927 = vrot.lane.b32.xlu1 %v806_v36, %s1528_s28  ;;  %729 = vrot.lane.b32.xlu0 %v708_v16, %s1527_s18  ;;  %v992_v36 = vpack.c.b16 %v768_v43, %v976_v33  ;;  %v57_v16 = vld [vmem:[%s2692_s0 + $0x50] sm:$0xe] }
  0x96   :  { %v424_v12 = vpop.permute.xlu2 %423  ;;  %v377_v23 = vunpack.c.l.b16 %v57_v16  ;;  %v1011_v39 = vrot.slane %v995_v59, 3  ;;  %v586_v16 = vrot.slane %v584_v52, 1 }
  0x97   :  { %v2077_v22 = vsel %vm1104_vm0, %v1070_v55, %v424_v12  ;;  %v2079_v38 = vpop.permute.xlu1 %339  ;;  %v2081_v53 = vpop.permute.xlu0 %337  ;;  %v1008_v32 = vrot.slane %v992_v36, 3  ;;  %v394_v55 = vpack.c.b16 %v182_v15, %v378_v20  ;;  %v1058_v15 = vsel %vm1055_vm1, %v1573_v7, %v2016_v30  ;;  %v2158_v30 = vld [vmem:[%s2692_s0 + $0x50] sm:$0xc] }
  0x98   :  { %v393_v12 = vpack.c.b16 %v180_v26, %v377_v23  ;;  %v489_v62 = vpack.c.b16 %v473_v61, %v377_v23  ;;  %v382_v36 = vunpack.c.l.b16 %v62_v56  ;;  %v493_v20 = vpack.c.b16 %v477_v8, %v381_v31 }
  0x99   :  { %v410_v44 = vrot.slane %v394_v55, 1 }
  0x9a   :  { %v409_v33 = vrot.slane %v393_v12, 1  ;;  %v576_v17 = vshrl.u32 %v489_v62, 16  ;;  %v579_v59 = vshll.u32 %v489_v62, 16 }
  0x9c   :  { %1023 = vrot.lane.b32.xlu2 %v1007_v19, %s1529_s13  ;;  %v413_v19 = vrot.slane %v397_v45, 1  ;;  %v581_v5 = vrot.slane %v579_v59, 2  ;;  %v1067_v45 = vsel %vm1055_vm1, %v1594_v14, %v2042_v9  ;;  %v2204_v59 = vld [vmem:[%s2692_s0 + $0x5c] sm:$0x7] }
  0x9d   :  { %937 = vrot.lane.b32.xlu1 %v846_v63, %s1528_s28  ;;  %935 = vrot.lane.b32.xlu0 %v838_v0, %s1528_s28  ;;  %v587_v63 = vshll.u32 %v490_v48, 16 }
  0x9e   :  { %v430_v57 = vpop.permute.xlu2 %429 }
  0x9f   :  { %v2110_v27 = vsel %vm1104_vm0, %v1079_v18, %v430_v57  ;;  %v2112_v43 = vpop.permute.xlu1 %345  ;;  %v2114_v28 = vpop.permute.xlu0 %343  ;;  %v589_v7 = vrot.slane %v587_v63, 2  ;;  %v494_v18 = vpack.c.b16 %v478_v34, %v382_v36  ;;  %v578_v57 = vrot.slane %v576_v17, 1  ;;  %v2189_v63 = vld [vmem:[%s2692_s0 + $0x78] sm:$0xc]  ;;  %v93_v17 = vld [vmem:[%s2692_s0 + $0x70] sm:$0xc] }
  0xa1   :  { %v590_v40 = vor.u32 %v589_v7, %v586_v16  ;;  %v616_v62 = vshrl.u32 %v494_v18, 16  ;;  %v619_v56 = vshll.u32 %v494_v18, 16  ;;  %v2219_v18 = vld [vmem:[%s2692_s0 + $0x54] sm:$0x7] }
  0xa3   :  { %v618_v14 = vrot.slane %v616_v62, 1  ;;  %v621_v9 = vrot.slane %v619_v56, 2  ;;  %v777_v56 = vunpack.c.l.b16 %v2219_v18  ;;  %v126_v18 = vld [vmem:[%s2692_s0 + $0x78] sm:$0x8] }
  0xa4   :  { %1033 = vrot.lane.b32.xlu2 %v1012_v13, %s1529_s13  ;;  %v398_v13 = vpack.c.b16 %v190_v54, %v382_v36  ;;  %v681_v54 = vunpack.c.l.b16 %v2158_v30  ;;  %v1515_v36 = vld [vmem:[%s2692_s0 + $0x28] sm:$0xf]  ;;  %v90_v30 = vld [vmem:[%s2692_s0 + $0x58] sm:$0xc] }
  0xa5   :  { %1031 = vrot.lane.b32.xlu1 %v1011_v39, %s1529_s13  ;;  %1025 = vrot.lane.b32.xlu0 %v1008_v32, %s1529_s13  ;;  %v1514_v39 = vld [vmem:[%s2692_s0 + $0x10] sm:$0xf]  ;;  %v1073_v16 = vsel %vm1055_vm1, %v1515_v36, %v1963_v25  ;;  %v686_v25 = vunpack.c.l.b16 %v2189_v63  ;;  %v682_v62 = vunpack.c.l.b16 %v90_v30 }
  0xa6   :  { %v2134_v10 = vpop.permute.xlu2 %439  ;;  %v1064_v32 = vsel %vm1055_vm1, %v1514_v39, %v2014_v50  ;;  %v608_v50 = vshrl.u32 %v493_v20, 16  ;;  %v697_v52 = vpack.c.b16 %v473_v61, %v681_v54 }
  0xa7   :  { %v416_v26 = vpop.permute.xlu1 %415  ;;  %v2147_v41 = vpop.permute.xlu0 %349  ;;  %v698_v51 = vpack.c.b16 %v474_v2, %v682_v62 }
  0xa8   :  { %v2150_v0 = vsel %vm1104_vm0, %v1058_v15, %v416_v26  ;;  %v582_v15 = vor.u32 %v581_v5, %v578_v57  ;;  %v414_v26 = vrot.slane %v398_v13, 1  ;;  %v1076_v57 = vsel %vm1055_vm1, %v1649_v49, %v2059_v35  ;;  %v1275_v49 = vld [vmem:[%s2693_s1 + $0x18] sm:$0xf] }
  0xa9   :  { %v622_v35 = vor.u32 %v621_v9, %v618_v14  ;;  %v714_v30 = vrot.slane %v698_v51, 2 }
  0xac   :  { %443 = vrot.lane.b32.xlu2 %v413_v19, %s1525_s7  ;;  %v611_v19 = vshll.u32 %v493_v20, 16  ;;  %v713_v20 = vrot.slane %v697_v52, 2 }
  0xad   :  { %437 = vrot.lane.b32.xlu1 %v410_v44, %s1525_s7  ;;  %435 = vrot.lane.b32.xlu0 %v409_v33, %s1525_s7  ;;  %v2194_v44 = vld [vmem:[%s2692_s0 + $0x74] sm:$0x7]  ;;  %v610_v33 = vrot.slane %v608_v50, 1 }
  0xae   :  { %v2168_v23 = vpop.permute.xlu2 %641  ;;  %v613_v61 = vrot.slane %v611_v19, 2  ;;  %v781_v39 = vunpack.c.l.b16 %v2194_v44 }
  0xaf   :  { %v422_v48 = vpop.permute.xlu1 %421  ;;  %v420_v55 = vpop.permute.xlu0 %419 }
  0xb0   :  { %v2180_v31 = vsel %vm1104_vm0, %v1067_v45, %v422_v48  ;;  %v2183_v12 = vsel %vm1104_vm0, %v1064_v32, %v420_v55  ;;  %v685_v48 = vunpack.c.l.b16 %v93_v17  ;;  %v778_v55 = vunpack.c.l.b16 %v2204_v59  ;;  %v2315_v59 = vld [vmem:[%s2692_s0 + $0x34] sm:$0x3] }
  0xb2   :  { %v797_v50 = vpack.c.b16 %v781_v39, %v685_v48  ;;  %v701_v19 = vpack.c.b16 %v477_v8, %v685_v48  ;;  %v794_v52 = vpack.c.b16 %v778_v55, %v682_v62  ;;  %v1493_v62 = vld [vmem:[%s2693_s1 + $0x8] sm:$0xff] }
  0xb4   :  { %645 = vrot.lane.b32.xlu2 %v590_v40, %s1526_s5  ;;  %v614_v40 = vor.u32 %v613_v61, %v610_v33  ;;  %v912_v17 = vshrl.u32 %v797_v50, 16  ;;  %v717_v37 = vrot.slane %v701_v19, 2  ;;  %v915_v2 = vshll.u32 %v797_v50, 16  ;;  %v122_v50 = vld [vmem:[%s2692_s0 + $0x58] sm:$0x8] }
  0xb5   :  { %643 = vrot.lane.b32.xlu1 %v582_v15, %s1526_s5  ;;  %445 = vrot.lane.b32.xlu0 %v414_v26, %s1525_s7  ;;  %v1333_v15 = vunpack.c.l.b16 %v1275_v49  ;;  %v702_v26 = vpack.c.b16 %v478_v34, %v686_v25  ;;  %v793_v34 = vpack.c.b16 %v777_v56, %v681_v54  ;;  %v888_v36 = vshrl.u32 %v794_v52, 16  ;;  %v121_v19 = vld [vmem:[%s2692_s0 + $0x50] sm:$0x8] }
  0xb6   :  { %v2211_v7 = vpop.permute.xlu2 %735  ;;  %v891_v54 = vshll.u32 %v794_v52, 16  ;;  %v917_v48 = vrot.slane %v915_v2, 3  ;;  %v1492_v2 = vld [vmem:[%s2693_s1] sm:$0xff] }
  0xb7   :  { %v428_v5 = vpop.permute.xlu1 %427  ;;  %v426_v13 = vpop.permute.xlu0 %425  ;;  %v1337_v14 = vpack.c.b16 %v1333_v15, %v1333_v15  ;;  %v718_v61 = vrot.slane %v702_v26, 2  ;;  %v890_v49 = vrot.slane %v888_v36, 2 }
  0xb8   :  { %v2227_v32 = vsel %vm1104_vm0, %v1076_v57, %v428_v5  ;;  %v2230_v45 = vsel %vm1104_vm0, %v1073_v16, %v426_v13  ;;  %v1494_v16 = vld [vmem:[%s2693_s1 + $0x10] sm:$0xff]  ;;  %v880_v57 = vshrl.u32 %v793_v34, 16  ;;  %v883_v5 = vshll.u32 %v793_v34, 16 }
  0xb9   :  { %v1368_v8 = vsel %vm1366_vm2, %v1337_v14, 0  ;;  %v782_v13 = vunpack.c.l.b16 %v2257_v6 }
  0xba   :  { %1496 = vmatpush.bf16.msra.mxu2 %v1368_v8  ;;  %1497 = vmatpush.bf16.msra.mxu3 %v1368_v8  ;;  %v882_v15 = vrot.slane %v880_v57, 2  ;;  %v885_v26 = vrot.slane %v883_v5, 3 }
  0xbb   :  { %1374 = vmatpush.bf16.msra.mxu0 %v1368_v8  ;;  %1495 = vmatpush.bf16.msra.mxu1 %v1368_v8  ;;  %v798_v52 = vpack.c.b16 %v782_v13, %v686_v25 }
  0xbc   :  { %739 = vrot.lane.b32.xlu2 %v713_v20, %s1527_s18  ;;  %v914_v20 = vrot.slane %v912_v17, 2  ;;  %v986_v17 = vunpack.c.l.b16 %v122_v50  ;;  %v886_v36 = vor.u32 %v885_v26, %v882_v15 }
  0xbd   :  { %653 = vrot.lane.b32.xlu1 %v622_v35, %s1526_s5  ;;  %651 = vrot.lane.b32.xlu0 %v614_v40, %s1526_s5  ;;  %v893_v35 = vrot.slane %v891_v54, 3  ;;  %v2271_v40 = vld [vmem:[%s2692_s0 + $0x14] sm:$0x3]  ;;  %v920_v54 = vshrl.u32 %v798_v52, 16 }
  0xbe   :  { %v2252_v9 = vpop.permute.xlu2 %745  ;;  %1499 = vmatpush.bf16.msra.mxu2 %v1494_v16  ;;  %1500 = vmatpush.bf16.msra.mxu3 %v1494_v16  ;;  %v465_v8 = vunpack.c.l.b16 %v2271_v40  ;;  %v1002_v57 = vpack.c.b16 %v778_v55, %v986_v17  ;;  %v990_v17 = vunpack.c.l.b16 %v126_v18 }
  0xbf   :  { %v2259_v63 = vpop.permute.xlu1 %433  ;;  %v2261_v33 = vpop.permute.xlu0 %431  ;;  %1375 = vmatpush.bf16.msra.mxu0 %v1494_v16  ;;  %1498 = vmatpush.bf16.msra.mxu1 %v1494_v16  ;;  %v894_v25 = vor.u32 %v893_v35, %v890_v49  ;;  %v923_v16 = vshll.u32 %v798_v52, 16  ;;  %v469_v52 = vunpack.c.l.b16 %v2315_v59 }
  0xc0   :  { %v1018_v26 = vrot.slane %v1002_v57, 3 }
  0xc1   :  { %v925_v29 = vrot.slane %v923_v16, 3  ;;  %v485_v16 = vpack.c.b16 %v469_v52, %v373_v60 }
  0xc2   :  { %1502 = vmatpush.bf16.msra.mxu2 %v1493_v62  ;;  %1503 = vmatpush.bf16.msra.mxu3 %v1493_v62 }
  0xc3   :  { %1376 = vmatpush.bf16.msra.mxu0 %v1493_v62  ;;  %1501 = vmatpush.bf16.msra.mxu1 %v1493_v62  ;;  %v544_v18 = vshrl.u32 %v485_v16, 16 }
  0xc4   :  { %749 = vrot.lane.b32.xlu2 %v718_v61, %s1527_s18  ;;  %v918_v61 = vor.u32 %v917_v48, %v914_v20  ;;  %v922_v20 = vrot.slane %v920_v54, 2  ;;  %v2328_v48 = vld [vmem:[%s2692_s0 + $0x1c] sm:$0x3] }
  0xc5   :  { %747 = vrot.lane.b32.xlu1 %v717_v37, %s1527_s18  ;;  %741 = vrot.lane.b32.xlu0 %v714_v30, %s1527_s18  ;;  %v985_v37 = vunpack.c.l.b16 %v121_v19  ;;  %v481_v30 = vpack.c.b16 %v465_v8, %v369_v47  ;;  %v2310_v47 = vld [vmem:[%s2692_s0 + $0x3c] sm:$0x3] }
  0xc6   :  { %v2286_v14 = vpop.permute.xlu2 %951  ;;  %1505 = vmatpush.bf16.msra.mxu2 %v1492_v2  ;;  %1506 = vmatpush.bf16.msra.mxu3 %v1492_v2  ;;  %v470_v19 = vunpack.c.l.b16 %v2310_v47 }
  0xc7   :  { %v2288_v51 = vpop.permute.xlu1 %639  ;;  %v2290_v34 = vpop.permute.xlu0 %441  ;;  %v1001_v5 = vpack.c.b16 %v777_v56, %v985_v37  ;;  %1377 = vmatpush.bf16.msra.mxu0 %v1492_v2  ;;  %v125_v56 = vld [vmem:[%s2692_s0 + $0x70] sm:$0x8]  ;;  %1504 = vmatpush.bf16.msra.mxu1 %v1492_v2  ;;  %v512_v62 = vshrl.u32 %v481_v30, 16  ;;  %v515_v15 = vshll.u32 %v481_v30, 16  ;;  %v1006_v30 = vpack.c.b16 %v782_v13, %v990_v17 }
  0xc8   :  { %v989_v37 = vunpack.c.l.b16 %v125_v56  ;;  %v486_v2 = vpack.c.b16 %v470_v19, %v374_v24  ;;  %v547_v56 = vshll.u32 %v485_v16, 16 }
  0xc9   :  { %v1017_v50 = vrot.slane %v1001_v5, 3  ;;  %v517_v54 = vrot.slane %v515_v15, 2  ;;  %v1022_v6 = vrot.slane %v1006_v30, 3  ;;  %v546_v15 = vrot.slane %v544_v18, 1 }
  0xca   :  { %v1005_v57 = vpack.c.b16 %v781_v39, %v989_v37  ;;  %v769_v30 = vunpack.c.l.b16 %v2363_v21  ;;  %v117_v21 = vld [vmem:[%s2692_s0 + $0x30] sm:$0x8] }
  0xcc   :  { %955 = vrot.lane.b32.xlu2 %v918_v61, %s1528_s28  ;;  %v926_v61 = vor.u32 %v925_v29, %v922_v20  ;;  %v552_v20 = vshrl.u32 %v486_v2, 16  ;;  %v555_v29 = vshll.u32 %v486_v2, 16  ;;  %v1021_v13 = vrot.slane %v1005_v57, 3  ;;  %v2382_v2 = vld [vmem:[%s2692_s0 + $0x1c] sm:$0x7] }
  0xcd   :  { %949 = vrot.lane.b32.xlu1 %v894_v25, %s1528_s28  ;;  %947 = vrot.lane.b32.xlu0 %v886_v36, %s1528_s28  ;;  %v466_v25 = vunpack.c.l.b16 %v2328_v48  ;;  %v514_v36 = vrot.slane %v512_v62, 1  ;;  %v1517_v57 = vld [vmem:[%s2692_s0 + $0x40] sm:$0xf]  ;;  %v2430_v48 = vld [vmem:[%s2692_s0 + $0x3c] sm:$0x7] }
  0xce   :  { %v2317_v55 = vpop.permute.xlu2 %1041  ;;  %v557_v39 = vrot.slane %v555_v29, 2 }
  0xcf   :  { %v2330_v49 = vpop.permute.xlu1 %649  ;;  %v2332_v35 = vpop.permute.xlu0 %647  ;;  %v482_v58 = vpack.c.b16 %v466_v25, %v370_v46  ;;  %v518_v5 = vor.u32 %v517_v54, %v514_v36  ;;  %v554_v46 = vrot.slane %v552_v20, 1  ;;  %v81_v54 = vld [vmem:[%s2692_s0 + $0x10] sm:$0xc] }
  0xd1   :  { %v520_v62 = vshrl.u32 %v482_v58, 16  ;;  %v523_v44 = vshll.u32 %v482_v58, 16  ;;  %v1082_v58 = vsel %vm1055_vm1, %v1517_v57, %v1988_v11  ;;  %v558_v18 = vor.u32 %v557_v39, %v554_v46 }
  0xd3   :  { %v522_v37 = vrot.slane %v520_v62, 1  ;;  %v525_v36 = vrot.slane %v523_v44, 2 }
  0xd4   :  { %1045 = vrot.lane.b32.xlu2 %v1018_v26, %s1529_s13  ;;  %v549_v26 = vrot.slane %v547_v56, 2  ;;  %v673_v56 = vunpack.c.l.b16 %v81_v54 }
  0xd5   :  { %1043 = vrot.lane.b32.xlu1 %v1017_v50, %s1529_s13  ;;  %957 = vrot.lane.b32.xlu0 %v926_v61, %s1528_s28  ;;  %v82_v50 = vld [vmem:[%s2692_s0 + $0x18] sm:$0xc]  ;;  %v1516_v61 = vld [vmem:[%s2692_s0 + $0x48] sm:$0xf]  ;;  %v526_v44 = vor.u32 %v525_v36, %v522_v37 }
  0xd6   :  { %v2356_v24 = vpop.permute.xlu2 %623  ;;  %v1085_v17 = vsel %vm1055_vm1, %v1516_v61, %v2081_v53  ;;  %v674_v29 = vunpack.c.l.b16 %v82_v50  ;;  %v550_v62 = vor.u32 %v549_v26, %v546_v15  ;;  %v1519_v15 = vld [vmem:[%s2692_s0 + $0x60] sm:$0xf] }
  0xd7   :  { %v2358_v1 = vpop.permute.xlu1 %743  ;;  %v738_v60 = vpop.permute.xlu0 %737  ;;  %v1124_v16 = vsel %vm1104_vm0, %v1085_v17, %v2259_v63  ;;  %v2397_v63 = vld [vmem:[%s2692_s0 + $0x30] sm:$0xc]  ;;  %v785_v17 = vpack.c.b16 %v769_v30, %v673_v56  ;;  %v1094_v26 = vsel %vm1055_vm1, %v1519_v15, %v2114_v28  ;;  %v689_v28 = vpack.c.b16 %v465_v8, %v673_v56 }
  0xd8   :  { %v1157_v11 = vsel %vm1137_vm3, %v1124_v16, %v2168_v23  ;;  %v677_v46 = vunpack.c.l.b16 %v2397_v63  ;;  %v86_v23 = vld [vmem:[%s2692_s0 + $0x38] sm:$0xc]  ;;  %v1130_v37 = vsel %vm1104_vm0, %v1094_v26, %v2134_v10  ;;  %v2451_v10 = vld [vmem:[%s2692_s0 + $0x34] sm:$0x7] }
  0xd9   :  { %v1190_v61 = vsel %vm1170_vm4, %v1157_v11, %v738_v60  ;;  %v816_v54 = vshrl.u32 %v785_v17, 16  ;;  %v819_v16 = vshll.u32 %v785_v17, 16  ;;  %v678_v57 = vunpack.c.l.b16 %v86_v23 }
  0xda   :  { %v1163_v17 = vsel %vm1137_vm3, %v1130_v37, %v2332_v35 }
  0xdb   :  { %v1196_v23 = vsel %vm1170_vm4, %v1163_v17, %v2358_v1 }
  0xdc   :  { %627 = vrot.lane.b32.xlu2 %v518_v5, %s1526_s5 }
  0xdd   :  { %1053 = vrot.lane.b32.xlu1 %v1022_v6, %s1529_s13  ;;  %1051 = vrot.lane.b32.xlu0 %v1021_v13, %s1529_s13  ;;  %v770_v6 = vunpack.c.l.b16 %v2382_v2  ;;  %v1122_v13 = vsel %vm1104_vm0, %v1082_v58, %v2261_v33  ;;  %v690_v33 = vpack.c.b16 %v466_v25, %v674_v29  ;;  %v693_v25 = vpack.c.b16 %v469_v52, %v677_v46 }
  0xde   :  { %v2386_v53 = vpop.permute.xlu2 %633  ;;  %v1155_v50 = vsel %vm1137_vm3, %v1122_v13, %v2288_v51  ;;  %v1518_v51 = vld [vmem:[%s2692_s0 + $0x68] sm:$0xf] }
  0xdf   :  { %v946_v5 = vpop.permute.xlu1 %945  ;;  %v944_v20 = vpop.permute.xlu0 %943  ;;  %v1097_v60 = vsel %vm1055_vm1, %v1518_v51, %v2112_v43  ;;  %v786_v43 = vpack.c.b16 %v770_v6, %v674_v29  ;;  %v1188_v36 = vsel %vm1170_vm4, %v1155_v50, %v2211_v7  ;;  %v709_v63 = vrot.slane %v693_v25, 2 }
  0xe0   :  { %v1223_v39 = vsel %vm1203_vm5, %v1190_v61, %v946_v5  ;;  %v1132_v7 = vsel %vm1104_vm0, %v1097_v60, %v2290_v34  ;;  %v1221_v58 = vsel %vm1203_vm5, %v1188_v36, %v944_v20  ;;  %v706_v5 = vrot.slane %v690_v33, 2 }
  0xe1   :  { %v1256_v59 = vsel %vm1236_vm6, %v1223_v39, %v2317_v55  ;;  %v774_v55 = vunpack.c.l.b16 %v2430_v48  ;;  %v827_v56 = vshll.u32 %v786_v43, 16  ;;  %v818_v50 = vrot.slane %v816_v54, 2 }
  0xe2   :  { %v1305_v13 = vunpack.c.l.b16 %v1256_v59  ;;  %v821_v34 = vrot.slane %v819_v16, 3  ;;  %v694_v20 = vpack.c.b16 %v470_v19, %v678_v57  ;;  %v1165_v61 = vsel %vm1137_vm3, %v1132_v7, %v2330_v49  ;;  %v113_v49 = vld [vmem:[%s2692_s0 + $0x10] sm:$0x8] }
  0xe3   :  { %v790_v33 = vpack.c.b16 %v774_v55, %v678_v57  ;;  %v829_v60 = vrot.slane %v827_v56, 3  ;;  %v1198_v35 = vsel %vm1170_vm4, %v1165_v61, %v2252_v9  ;;  %v977_v54 = vunpack.c.l.b16 %v113_v49 }
  0xe4   :  { %637 = vrot.lane.b32.xlu2 %v558_v18, %s1526_s5  ;;  %v824_v18 = vshrl.u32 %v786_v43, 16  ;;  %v822_v1 = vor.u32 %v821_v34, %v818_v50  ;;  %v710_v15 = vrot.slane %v694_v20, 2  ;;  %v1229_v43 = vsel %vm1203_vm5, %v1196_v23, %v2286_v14 }
  0xe5   :  { %635 = vrot.lane.b32.xlu1 %v550_v62, %s1526_s5  ;;  %629 = vrot.lane.b32.xlu0 %v526_v44, %s1526_s5  ;;  %v705_v62 = vrot.slane %v689_v28, 2  ;;  %v773_v44 = vunpack.c.l.b16 %v2451_v10  ;;  %v856_v37 = vshrl.u32 %v790_v33, 16  ;;  %v859_v36 = vshll.u32 %v790_v33, 16 }
  0xe6   :  { %v2446_v52 = vpop.permute.xlu2 %727  ;;  %v826_v51 = vrot.slane %v824_v18, 2  ;;  %v118_v18 = vld [vmem:[%s2692_s0 + $0x38] sm:$0x8]  ;;  %v981_v61 = vunpack.c.l.b16 %v117_v21 }
  0xe7   :  { %v1040_v40 = vpop.permute.xlu1 %1039  ;;  %v954_v8 = vpop.permute.xlu0 %953  ;;  %v789_v47 = vpack.c.b16 %v773_v44, %v677_v46  ;;  %v858_v14 = vrot.slane %v856_v37, 2  ;;  %v982_v50 = vunpack.c.l.b16 %v118_v18 }
  0xe8   :  { %v1254_v29 = vsel %vm1236_vm6, %v1221_v58, %v1040_v40  ;;  %v1231_v26 = vsel %vm1203_vm5, %v1198_v35, %v954_v8  ;;  %v830_v9 = vor.u32 %v829_v60, %v826_v51  ;;  %v993_v8 = vpack.c.b16 %v769_v30, %v977_v54  ;;  %v114_v30 = vld [vmem:[%s2692_s0 + $0x18] sm:$0x8] }
  0xe9   :  { %v1304_v11 = vunpack.c.l.b16 %v1254_v29  ;;  %v848_v7 = vshrl.u32 %v789_v47, 16  ;;  %v851_v58 = vshll.u32 %v789_v47, 16  ;;  %v978_v17 = vunpack.c.l.b16 %v114_v30 }
  0xea   :  { %v997_v33 = vpack.c.b16 %v773_v44, %v981_v61 }
  0xeb   :  { %v1316_v39 = vpack.c.b16 %v1305_v13, %v1304_v11  ;;  %v850_v29 = vrot.slane %v848_v7, 2  ;;  %v994_v23 = vpack.c.b16 %v770_v6, %v978_v17  ;;  %v1139_v6 = vsel %vm1137_vm3, %v2150_v0, %v2356_v24 }
  0xec   :  { %731 = vrot.lane.b32.xlu2 %v709_v63, %s1527_s18  ;;  %v853_v63 = vrot.slane %v851_v58, 3  ;;  %v1013_v35 = vrot.slane %v997_v33, 3 }
  0xed   :  { %725 = vrot.lane.b32.xlu1 %v706_v5, %s1527_s18  ;;  %723 = vrot.lane.b32.xlu0 %v705_v62, %s1527_s18  ;;  %v861_v5 = vrot.slane %v859_v36, 3  ;;  %v1009_v62 = vrot.slane %v993_v8, 3 }
  0xee   :  { %1488 = vmatmul.msk.bf16.vlgmr.msra.gmra.mxu2 %vm1341_vm7, %v1316_v39  ;;  %v2480_v19 = vpop.permute.xlu2 %929  ;;  %v854_v20 = vor.u32 %v853_v63, %v850_v29  ;;  %v998_v39 = vpack.c.b16 %v774_v55, %v982_v50  ;;  %v1520_v50 = vld [vmem:[%s2692_s0 + $0x58] sm:$0xf] }
  0xef   :  { %v1050_v25 = vpop.permute.xlu1 %1049  ;;  %v1048_v46 = vpop.permute.xlu0 %1047  ;;  %v862_v34 = vor.u32 %v861_v5, %v858_v14 }
  0xf0   :  { %v1264_v28 = vsel %vm1236_vm6, %v1231_v26, %v1050_v25  ;;  %v1262_v59 = vsel %vm1236_vm6, %v1229_v43, %v1048_v46  ;;  %v1014_v49 = vrot.slane %v998_v39, 3  ;;  %v1149_v26 = vsel %vm1137_vm3, %v2230_v45, %v2386_v53  ;;  %v1521_v39 = vld [vmem:[%s2692_s0 + $0x50] sm:$0xf] }
  0xf1   :  { %v1309_v16 = vunpack.c.l.b16 %v1264_v28  ;;  %v1308_v57 = vunpack.c.l.b16 %v1262_v59  ;;  %v1088_v33 = vsel %vm1055_vm1, %v1521_v39, %v2079_v38 }
  0xf3   :  { %v1318_v40 = vpack.c.b16 %v1309_v16, %v1308_v57 }
  0xf4   :  { %933 = vrot.lane.b32.xlu2 %v830_v9, %s1528_s28 }
  0xf5   :  { %931 = vrot.lane.b32.xlu1 %v822_v1, %s1528_s28  ;;  %733 = vrot.lane.b32.xlu0 %v710_v15, %s1527_s18  ;;  %v1010_v1 = vrot.slane %v994_v23, 3 }
  0xf6   :  { %1490 = vmatmul.msk.bf16.vlgmr.msra.gmra.mxu3 %vm1341_vm7, %v1318_v40  ;;  %v1024_v56 = vpop.permute.xlu2 %1023 }
  0xf7   :  { %v632_v13 = vpop.permute.xlu1 %631  ;;  %v626_v11 = vpop.permute.xlu0 %625 }
  0xf8   :  { %v1147_v46 = vsel %vm1137_vm3, %v2077_v22, %v632_v13  ;;  %v1141_v37 = vsel %vm1137_vm3, %v2057_v42, %v626_v11 }
  0xf9   :  { %v1180_v53 = vsel %vm1170_vm4, %v1147_v46, %v2446_v52 }
  0xfc   :  { %1027 = vrot.lane.b32.xlu2 %v1009_v62, %s1529_s13 }
  0xfd   :  { %941 = vrot.lane.b32.xlu1 %v862_v34, %s1528_s28  ;;  %939 = vrot.lane.b32.xlu0 %v854_v20, %s1528_s28  ;;  %v1091_v34 = vsel %vm1055_vm1, %v1520_v50, %v2006_v3 }
  0xfe   :  { %v1034_v51 = vpop.permute.xlu2 %1033 }
  0xff   :  { %v722_v60 = vpop.permute.xlu1 %721  ;;  %v720_v47 = vpop.permute.xlu0 %719 }
 0x100   :  { %v1172_v25 = vsel %vm1170_vm4, %v1139_v6, %v720_v47  ;;  %v1174_v0 = vsel %vm1170_vm4, %v1141_v37, %v722_v60  ;;  %v1523_v6 = vld [vmem:[%s2692_s0 + $0x78] sm:$0xf] }
 0x101   :  { %v1207_v22 = vsel %vm1203_vm5, %v1174_v0, %v2480_v19 }
 0x104   :  { %1037 = vrot.lane.b32.xlu2 %v1014_v49, %s1529_s13 }
 0x105   :  { %1035 = vrot.lane.b32.xlu1 %v1013_v35, %s1529_s13  ;;  %1029 = vrot.lane.b32.xlu0 %v1010_v1, %s1529_s13 }
 0x106   :  { %v2514_v48 = vpop.permute.xlu2 %443 }
 0x107   :  { %v928_v55 = vpop.permute.xlu1 %927  ;;  %v730_v10 = vpop.permute.xlu0 %729 }
 0x108   :  { %v1182_v43 = vsel %vm1170_vm4, %v1149_v26, %v730_v10  ;;  %v1205_v36 = vsel %vm1203_vm5, %v1172_v25, %v928_v55  ;;  %v1103_v26 = vsel %vm1055_vm1, %v1523_v6, %v2147_v41 }
 0x109   :  { %v1238_v24 = vsel %vm1236_vm6, %v1205_v36, %v1024_v56 }
 0x10a   :  { %v1296_v57 = vunpack.c.l.b16 %v1238_v24 }
 0x10e   :  { %v646_v2 = vpop.permute.xlu2 %645 }
 0x10f   :  { %v938_v44 = vpop.permute.xlu1 %937  ;;  %v936_v15 = vpop.permute.xlu0 %935 }
 0x110   :  { %v1215_v28 = vsel %vm1203_vm5, %v1182_v43, %v938_v44  ;;  %v1213_v59 = vsel %vm1203_vm5, %v1180_v53, %v936_v15  ;;  %v1522_v15 = vld [vmem:[%s2692_s0 + $0x70] sm:$0xf] }
 0x111   :  { %v1248_v45 = vsel %vm1236_vm6, %v1215_v28, %v1034_v51 }
 0x112   :  { %v1301_v7 = vunpack.c.l.b16 %v1248_v45 }
 0x116   :  { %v740_v8 = vpop.permute.xlu2 %739 }
 0x117   :  { %v1032_v9 = vpop.permute.xlu1 %1031  ;;  %v1026_v42 = vpop.permute.xlu0 %1025 }
 0x118   :  { %v1246_v54 = vsel %vm1236_vm6, %v1213_v59, %v1032_v9  ;;  %v1240_v16 = vsel %vm1236_vm6, %v1207_v22, %v1026_v42 }
 0x119   :  { %v1300_v58 = vunpack.c.l.b16 %v1246_v54  ;;  %v1297_v40 = vunpack.c.l.b16 %v1240_v16 }
 0x11b   :  { %v1312_v14 = vpack.c.b16 %v1297_v40, %v1296_v57  ;;  %v1314_v5 = vpack.c.b16 %v1301_v7, %v1300_v58 }
 0x11d   :  { %1484 = vmatmul.msk.bf16.vlgmr.msra.gmra.mxu0 %vm1341_vm7, %v1312_v14  ;;  %1486 = vmatmul.msk.bf16.vlgmr.msra.gmra.mxu1 %vm1341_vm7, %v1314_v5 }
 0x11e   :  { %v750_v63 = vpop.permute.xlu2 %749 }
 0x11f   :  { %v438_v52 = vpop.permute.xlu1 %437  ;;  %v436_v29 = vpop.permute.xlu0 %435 }
 0x120   :  { %v1128_v20 = vsel %vm1104_vm0, %v1091_v34, %v438_v52  ;;  %v1126_v51 = vsel %vm1104_vm0, %v1088_v33, %v436_v29 }
 0x121   :  { %v1161_v23 = vsel %vm1137_vm3, %v1128_v20, %v646_v2  ;;  %v1100_v2 = vsel %vm1055_vm1, %v1522_v15, %v2030_v4 }
 0x122   :  { %v1134_v46 = vsel %vm1104_vm0, %v1100_v2, %v2514_v48 }
 0x126   :  { %v956_v56 = vpop.permute.xlu2 %955 }
 0x127   :  { %v644_v19 = vpop.permute.xlu1 %643  ;;  %v446_v18 = vpop.permute.xlu0 %445 }
 0x128   :  { %v1159_v3 = vsel %vm1137_vm3, %v1126_v51, %v644_v19  ;;  %v1136_v37 = vsel %vm1104_vm0, %v1103_v26, %v446_v18 }
 0x129   :  { %v1192_v1 = vsel %vm1170_vm4, %v1159_v3, %v740_v8 }
 0x12e   :  { %v1046_v62 = vpop.permute.xlu2 %1045 }
 0x12f   :  { %v654_v21 = vpop.permute.xlu1 %653  ;;  %v652_v30 = vpop.permute.xlu0 %651 }
 0x130   :  { %v1169_v36 = vsel %vm1137_vm3, %v1136_v37, %v654_v21  ;;  %v1167_v28 = vsel %vm1137_vm3, %v1134_v46, %v652_v30 }
 0x131   :  { %v1202_v45 = vsel %vm1170_vm4, %v1169_v36, %v750_v63  ;;  %v2588_v63 = vld [vmem:[%s2694_s2] ss:$0 sm:$0xff] }
 0x136   :  { %v628_v60 = vpop.permute.xlu2 %627 }
 0x137   :  { %v748_v13 = vpop.permute.xlu1 %747  ;;  %v742_v11 = vpop.permute.xlu0 %741 }
 0x138   :  { %v1194_v47 = vsel %vm1170_vm4, %v1161_v23, %v742_v11  ;;  %v1200_v4 = vsel %vm1170_vm4, %v1167_v28, %v748_v13 }
 0x139   :  { %v1233_v59 = vsel %vm1203_vm5, %v1200_v4, %v956_v56  ;;  %v1143_v56 = vsel %vm1137_vm3, %v2183_v12, %v628_v60 }
 0x13e   :  { %v638_v24 = vpop.permute.xlu2 %637 }
 0x13f   :  { %v950_v61 = vpop.permute.xlu1 %949  ;;  %v948_v17 = vpop.permute.xlu0 %947  ;;  %v1153_v21 = vsel %vm1137_vm3, %v2110_v27, %v638_v24 }
 0x140   :  { %v1227_v49 = vsel %vm1203_vm5, %v1194_v47, %v950_v61  ;;  %v1225_v55 = vsel %vm1203_vm5, %v1192_v1, %v948_v17 }
 0x141   :  { %v1260_v35 = vsel %vm1236_vm6, %v1227_v49, %v1046_v62 }
 0x142   :  { %v1307_v25 = vunpack.c.l.b16 %v1260_v35 }
 0x146   :  { %v732_v57 = vpop.permute.xlu2 %731 }
 0x147   :  { %v1044_v10 = vpop.permute.xlu1 %1043  ;;  %v958_v44 = vpop.permute.xlu0 %957 }
 0x148   :  { %v1258_v38 = vsel %vm1236_vm6, %v1225_v55, %v1044_v10  ;;  %v1235_v41 = vsel %vm1203_vm5, %v1202_v45, %v958_v44 }
 0x149   :  { %v1306_v43 = vunpack.c.l.b16 %v1258_v38 }
 0x14b   :  { %v1317_v0 = vpack.c.b16 %v1307_v25, %v1306_v43 }
 0x14d   :  { %1489 = vmatmul.msk.bf16.gmra.mxu2 %vm1341_vm7, %v1317_v0 }
 0x14e   :  { %v934_v40 = vpop.permute.xlu2 %933 }
 0x14f   :  { %v1054_v53 = vpop.permute.xlu1 %1053  ;;  %v1052_v48 = vpop.permute.xlu0 %1051 }
 0x150   :  { %v1268_v9 = vsel %vm1236_vm6, %v1235_v41, %v1054_v53  ;;  %v1266_v22 = vsel %vm1236_vm6, %v1233_v59, %v1052_v48 }
 0x151   :  { %v1311_v42 = vunpack.c.l.b16 %v1268_v9  ;;  %v1310_v54 = vunpack.c.l.b16 %v1266_v22 }
 0x153   :  { %v1319_v16 = vpack.c.b16 %v1311_v42, %v1310_v54 }
 0x155   :  { %1491 = vmatmul.msk.bf16.gmra.mxu3 %vm1341_vm7, %v1319_v16 }
 0x156   :  { %v1028_v29 = vpop.permute.xlu2 %1027 }
 0x157   :  { %v636_v7 = vpop.permute.xlu1 %635  ;;  %v630_v58 = vpop.permute.xlu0 %629 }
 0x158   :  { %v1151_v50 = vsel %vm1137_vm3, %v2227_v32, %v636_v7  ;;  %v1145_v34 = vsel %vm1137_vm3, %v2180_v31, %v630_v58 }
 0x159   :  { %v1184_v39 = vsel %vm1170_vm4, %v1151_v50, %v732_v57 }
 0x15e   :  { %v1038_v61 = vpop.permute.xlu2 %1037 }
 0x15f   :  { %v726_v8 = vpop.permute.xlu1 %725  ;;  %v724_v14 = vpop.permute.xlu0 %723 }
 0x160   :  { %v1176_v13 = vsel %vm1170_vm4, %v1143_v56, %v724_v14  ;;  %v1178_v27 = vsel %vm1170_vm4, %v1145_v34, %v726_v8 }
 0x161   :  { %v1211_v32 = vsel %vm1203_vm5, %v1178_v27, %v934_v40 }
 0x167   :  { %v932_v5 = vpop.permute.xlu1 %931  ;;  %v734_v52 = vpop.permute.xlu0 %733 }
 0x168   :  { %v1186_v11 = vsel %vm1170_vm4, %v1153_v21, %v734_v52  ;;  %v1209_v20 = vsel %vm1203_vm5, %v1176_v13, %v932_v5 }
 0x169   :  { %v1242_v33 = vsel %vm1236_vm6, %v1209_v20, %v1028_v29 }
 0x16a   :  { %v1298_v35 = vunpack.c.l.b16 %v1242_v33 }
 0x16f   :  { %v942_v19 = vpop.permute.xlu1 %941  ;;  %v940_v18 = vpop.permute.xlu0 %939 }
 0x170   :  { %v1219_v12 = vsel %vm1203_vm5, %v1186_v11, %v942_v19  ;;  %v1217_v31 = vsel %vm1203_vm5, %v1184_v39, %v940_v18 }
 0x171   :  { %v1399_v30 = vpop.f32.mrf.mxu2  ;;  %v1252_v23 = vsel %vm1236_vm6, %v1219_v12, %v1038_v61 }
 0x172   :  { %v1400_v62 = vadd.f32 %v2588_v63, %v1399_v30  ;;  %v1303_v1 = vunpack.c.l.b16 %v1252_v23 }
 0x174   :  { %v1427_v17 = vmax.f32 %v1400_v62, 0.0 }
 0x176   :  { %v1443_v51 = vpack.c.bf16 %v1427_v17, %v1427_v17 }
 0x177   :  { %v1036_v60 = vpop.permute.xlu1 %1035  ;;  %v1030_v47 = vpop.permute.xlu0 %1029 }
 0x178   :  { %1460 = vst.msk [vmem:[%s2695_s3 + $0x20] sm:$0xf] %vm1451_vm8, %v1443_v51  ;;  %v1250_v3 = vsel %vm1236_vm6, %v1217_v31, %v1036_v60  ;;  %v1244_v49 = vsel %vm1236_vm6, %v1211_v32, %v1030_v47 }
 0x179   :  { %v1302_v55 = vunpack.c.l.b16 %v1250_v3  ;;  %v1299_v10 = vunpack.c.l.b16 %v1244_v49  ;;  %v1401_v44 = vpop.f32.mrf.mxu2  ;;  %v1409_v38 = vpop.f32.mrf.mxu3 }
 0x17a   :  { %v1402_v15 = vadd.f32 %v2588_v63, %v1401_v44  ;;  %v1410_v2 = vadd.f32 %v2588_v63, %v1409_v38 }
 0x17b   :  { %v1313_v6 = vpack.c.b16 %v1299_v10, %v1298_v35  ;;  %v1315_v26 = vpack.c.b16 %v1303_v1, %v1302_v55 }
 0x17c   :  { %v1428_v25 = vmax.f32 %v1402_v15, 0.0  ;;  %v1431_v43 = vmax.f32 %v1410_v2, 0.0 }
 0x17d   :  { %1485 = vmatmul.msk.bf16.gmra.mxu0 %vm1341_vm7, %v1313_v6  ;;  %1487 = vmatmul.msk.bf16.gmra.mxu1 %vm1341_vm7, %v1315_v26 }
 0x17e   :  { %v1444_v46 = vpack.c.bf16 %v1428_v25, %v1428_v25  ;;  %v1447_v37 = vpack.c.bf16 %v1431_v43, %v1431_v43 }
 0x180   :  { %1461 = vst.msk [vmem:[%s2695_s3 + $0x24] sm:$0xf] %vm1451_vm8, %v1444_v46 }
 0x181   :  { %1464 = vst.msk [vmem:[%s2695_s3 + $0x30] sm:$0xf] %vm1451_vm8, %v1447_v37  ;;  %v1411_v36 = vpop.f32.mrf.mxu3 }
 0x182   :  { %v1412_v28 = vadd.f32 %v2588_v63, %v1411_v36 }
 0x184   :  { %v1432_v0 = vmax.f32 %v1412_v28, 0.0 }
 0x186   :  { %v1448_v4 = vpack.c.bf16 %v1432_v0, %v1432_v0 }
 0x188   :  { %1465 = vst.msk [vmem:[%s2695_s3 + $0x34] sm:$0xf] %vm1451_vm8, %v1448_v4 }
 0x19a   :  { %v1379_v24 = vpop.f32.mrf.mxu0  ;;  %v1389_v45 = vpop.f32.mrf.mxu1 }
 0x19b   :  { %v1380_v41 = vadd.f32 %v2588_v63, %v1379_v24  ;;  %v1390_v53 = vadd.f32 %v2588_v63, %v1389_v45 }
 0x19d   :  { %v1419_v59 = vmax.f32 %v1380_v41, 0.0  ;;  %v1423_v48 = vmax.f32 %v1390_v53, 0.0 }
 0x19f   :  { %v1435_v9 = vpack.c.bf16 %v1419_v59, %v1419_v59  ;;  %v1439_v22 = vpack.c.bf16 %v1423_v48, %v1423_v48 }
 0x1a1   :  { %1452 = vst.msk [vmem:[%s2695_s3] sm:$0xf] %vm1451_vm8, %v1435_v9 }
 0x1a2   :  { %1456 = vst.msk [vmem:[%s2695_s3 + $0x10] sm:$0xf] %vm1451_vm8, %v1439_v22  ;;  %v1381_v42 = vpop.f32.mrf.mxu0  ;;  %v1391_v54 = vpop.f32.mrf.mxu1 }
 0x1a3   :  { %v1382_v16 = vadd.f32 %v2588_v63, %v1381_v42  ;;  %v1392_v57 = vadd.f32 %v2588_v63, %v1391_v54 }
 0x1a5   :  { %v1420_v7 = vmax.f32 %v1382_v16, 0.0  ;;  %v1424_v58 = vmax.f32 %v1392_v57, 0.0 }
 0x1a7   :  { %v1436_v40 = vpack.c.bf16 %v1420_v7, %v1420_v7  ;;  %v1440_v8 = vpack.c.bf16 %v1424_v58, %v1424_v58 }
 0x1a9   :  { %1453 = vst.msk [vmem:[%s2695_s3 + $0x4] sm:$0xf] %vm1451_vm8, %v1436_v40 }
 0x1aa   :  { %1457 = vst.msk [vmem:[%s2695_s3 + $0x14] sm:$0xf] %vm1451_vm8, %v1440_v8 }
 0x1d0   :  { %v1404_v14 = vpop.f32.mrf.mxu2 }
 0x1d1   :  { %v1405_v5 = vadd.f32 %v2588_v63, %v1404_v14 }
 0x1d3   :  { %v1429_v52 = vmax.f32 %v1405_v5, 0.0 }
 0x1d5   :  { %v1445_v29 = vpack.c.bf16 %v1429_v52, %v1429_v52 }
 0x1d7   :  { %1462 = vst.msk [vmem:[%s2695_s3 + $0x28] sm:$0xf] %vm1451_vm8, %v1445_v29 }
 0x1d8   :  { %v1406_v19 = vpop.f32.mrf.mxu2  ;;  %v1414_v18 = vpop.f32.mrf.mxu3 }
 0x1d9   :  { %v1407_v56 = vadd.f32 %v2588_v63, %v1406_v19  ;;  %v1415_v21 = vadd.f32 %v2588_v63, %v1414_v18 }
 0x1db   :  { %v1430_v30 = vmax.f32 %v1407_v56, 0.0  ;;  %v1433_v13 = vmax.f32 %v1415_v21, 0.0 }
 0x1dd   :  { %v1446_v11 = vpack.c.bf16 %v1430_v30, %v1430_v30  ;;  %v1449_v62 = vpack.c.bf16 %v1433_v13, %v1433_v13 }
 0x1df   :  { %1463 = vst.msk [vmem:[%s2695_s3 + $0x2c] sm:$0xf] %vm1451_vm8, %v1446_v11 }
 0x1e0   :  { %1466 = vst.msk [vmem:[%s2695_s3 + $0x38] sm:$0xf] %vm1451_vm8, %v1449_v62  ;;  %v1416_v50 = vpop.f32.mrf.mxu3 }
 0x1e1   :  { %v1417_v34 = vadd.f32 %v2588_v63, %v1416_v50 }
 0x1e3   :  { %v1434_v20 = vmax.f32 %v1417_v34, 0.0 }
 0x1e5   :  { %v1450_v12 = vpack.c.bf16 %v1434_v20, %v1434_v20 }
 0x1e7   :  { %1467 = vst.msk [vmem:[%s2695_s3 + $0x3c] sm:$0xf] %vm1451_vm8, %v1450_v12 }
 0x1fa   :  { %v1384_v61 = vpop.f32.mrf.mxu0  ;;  %v1394_v27 = vpop.f32.mrf.mxu1 }
 0x1fb   :  { %v1385_v17 = vadd.f32 %v2588_v63, %v1384_v61  ;;  %v1395_v39 = vadd.f32 %v2588_v63, %v1394_v27 }
 0x1fd   :  { %v1421_v33 = vmax.f32 %v1385_v17, 0.0  ;;  %v1425_v23 = vmax.f32 %v1395_v39, 0.0 }
 0x1ff   :  { %v1437_v51 = vpack.c.bf16 %v1421_v33, %v1421_v33  ;;  %v1441_v32 = vpack.c.bf16 %v1425_v23, %v1425_v23 }
 0x201   :  { %1454 = vst.msk [vmem:[%s2695_s3 + $0x8] sm:$0xf] %vm1451_vm8, %v1437_v51 }
 0x202   :  { %1458 = vst.msk [vmem:[%s2695_s3 + $0x18] sm:$0xf] %vm1451_vm8, %v1441_v32  ;;  %v1386_v31 = vpop.f32.mrf.mxu0  ;;  %v1396_v60 = vpop.f32.mrf.mxu1 }
 0x203   :  { %v1387_v47 = vadd.f32 %v2588_v63, %v1386_v31  ;;  %v1397_v3 = vadd.f32 %v2588_v63, %v1396_v60 }
 0x205   :  { %v1422_v49 = vmax.f32 %v1387_v47, 0.0  ;;  %v1426_v35 = vmax.f32 %v1397_v3, 0.0 }
 0x207   :  { %v1438_v1 = vpack.c.bf16 %v1422_v49, %v1422_v49  ;;  %v1442_v55 = vpack.c.bf16 %v1426_v35, %v1426_v35 }
 0x209   :  { %1455 = vst.msk [vmem:[%s2695_s3 + $0xc] sm:$0xf] %vm1451_vm8, %v1438_v1 }
 0x20a   :  { %1459 = vst.msk [vmem:[%s2695_s3 + $0x1c] sm:$0xf] %vm1451_vm8, %v1442_v55 }

// kernel: inception_c_forward.11
= control target key start
LH: loop header
LB: loop body
LE: loop exit
PB: predicated region body
PF: predicated region fallthrough
CT: control target
= control target key end

     0   :  { %vm83_vm0 = vcmask 130048   ;;  %s356_s1 = inlined_call_operand.vmem [shape: bf16[16,128], index: 1, kind: input, shape index: {}]   ;;  %s357_s0 = inlined_call_operand.vmem [shape: bf16[128,16], index: 0, kind: input, shape index: {}]   ;;  %s358_s2 = inlined_call_operand.vmem [shape: f32[1,128], index: 2, kind: input, shape index: {}]   ;;  %s359_s3 = inlined_call_operand.vmem [shape: f32[128,128], index: 3, kind: output, shape index: {}]  }
   0x1   :  { %v245_v0 = vld [vmem:[%s356_s1] sm:$0xff]  ;;  %v239_v2 = vld [vmem:[%s357_s0 + $0x10] sm:$0xff]  ;;  %v238_v5 = vld [vmem:[%s357_s0 + $0x8] sm:$0xff] }
   0x2   :  { %v237_v1 = vld [vmem:[%s357_s0] sm:$0xff]  ;;  %115 = vmatpush.bf16.msra.mxu0 %v245_v0  ;;  %246 = vmatpush.bf16.msra.mxu1 %v245_v0  ;;  %v243_v4 = vld [vmem:[%s357_s0 + $0x30] sm:$0xff]  ;;  %v240_v6 = vld [vmem:[%s357_s0 + $0x18] sm:$0xff] }
   0x3   :  { %v241_v3 = vld [vmem:[%s357_s0 + $0x20] sm:$0xff]  ;;  %247 = vmatpush.bf16.msra.mxu2 %v245_v0  ;;  %248 = vmatpush.bf16.msra.mxu3 %v245_v0  ;;  %v242_v7 = vld [vmem:[%s357_s0 + $0x28] sm:$0xff]  ;;  %v244_v8 = vld [vmem:[%s357_s0 + $0x38] sm:$0xff] }
   0x4   :  { %v249_v9 = vld [vmem:[%s358_s2] ss:$0 sm:$0xff] }
   0x5   :  { %229 = vmatmul.msk.bf16.vlgmr.msra.gmra.mxu0 %vm83_vm0, %v237_v1  ;;  %231 = vmatmul.msk.bf16.vlgmr.msra.gmra.mxu1 %vm83_vm0, %v239_v2 }
   0x6   :  { %233 = vmatmul.msk.bf16.vlgmr.msra.gmra.mxu2 %vm83_vm0, %v241_v3  ;;  %235 = vmatmul.msk.bf16.vlgmr.msra.gmra.mxu3 %vm83_vm0, %v243_v4 }
  0x15   :  { %230 = vmatmul.msk.bf16.gmra.mxu0 %vm83_vm0, %v238_v5  ;;  %232 = vmatmul.msk.bf16.gmra.mxu1 %vm83_vm0, %v240_v6 }
  0x16   :  { %234 = vmatmul.msk.bf16.gmra.mxu2 %vm83_vm0, %v242_v7  ;;  %236 = vmatmul.msk.bf16.gmra.mxu3 %vm83_vm0, %v244_v8 }
  0x82   :  { %v117_v10 = vpop.f32.mrf.mxu0  ;;  %v127_v11 = vpop.f32.mrf.mxu1 }
  0x83   :  { %v118_v12 = vadd.f32 %v249_v9, %v117_v10  ;;  %v128_v13 = vadd.f32 %v249_v9, %v127_v11 }
  0x85   :  { %v157_v14 = vmax.f32 %v118_v12, 0.0  ;;  %v161_v15 = vmax.f32 %v128_v13, 0.0 }
  0x87   :  { %173 = vst [vmem:[%s359_s3] sm:$0xff] %v157_v14 }
  0x88   :  { %177 = vst [vmem:[%s359_s3 + $0x20] sm:$0xff] %v161_v15 }
  0x89   :  { %v137_v16 = vpop.f32.mrf.mxu2  ;;  %v147_v17 = vpop.f32.mrf.mxu3 }
  0x8a   :  { %v138_v18 = vadd.f32 %v249_v9, %v137_v16  ;;  %v148_v19 = vadd.f32 %v249_v9, %v147_v17  ;;  %v119_v20 = vpop.f32.mrf.mxu0  ;;  %v129_v21 = vpop.f32.mrf.mxu1 }
  0x8b   :  { %v120_v22 = vadd.f32 %v249_v9, %v119_v20  ;;  %v130_v23 = vadd.f32 %v249_v9, %v129_v21 }
  0x8c   :  { %v165_v24 = vmax.f32 %v138_v18, 0.0  ;;  %v169_v25 = vmax.f32 %v148_v19, 0.0 }
  0x8d   :  { %v158_v26 = vmax.f32 %v120_v22, 0.0  ;;  %v162_v27 = vmax.f32 %v130_v23, 0.0 }
  0x8e   :  { %181 = vst [vmem:[%s359_s3 + $0x40] sm:$0xff] %v165_v24 }
  0x8f   :  { %185 = vst [vmem:[%s359_s3 + $0x60] sm:$0xff] %v169_v25 }
  0x90   :  { %174 = vst [vmem:[%s359_s3 + $0x8] sm:$0xff] %v158_v26 }
  0x91   :  { %178 = vst [vmem:[%s359_s3 + $0x28] sm:$0xff] %v162_v27  ;;  %v139_v28 = vpop.f32.mrf.mxu2  ;;  %v149_v29 = vpop.f32.mrf.mxu3 }
  0x92   :  { %v140_v30 = vadd.f32 %v249_v9, %v139_v28  ;;  %v150_v31 = vadd.f32 %v249_v9, %v149_v29  ;;  %v122_v32 = vpop.f32.mrf.mxu0  ;;  %v132_v33 = vpop.f32.mrf.mxu1 }
  0x93   :  { %v123_v34 = vadd.f32 %v249_v9, %v122_v32  ;;  %v133_v35 = vadd.f32 %v249_v9, %v132_v33 }
  0x94   :  { %v166_v36 = vmax.f32 %v140_v30, 0.0  ;;  %v170_v37 = vmax.f32 %v150_v31, 0.0 }
  0x95   :  { %v159_v38 = vmax.f32 %v123_v34, 0.0  ;;  %v163_v39 = vmax.f32 %v133_v35, 0.0 }
  0x96   :  { %182 = vst [vmem:[%s359_s3 + $0x48] sm:$0xff] %v166_v36 }
  0x97   :  { %186 = vst [vmem:[%s359_s3 + $0x68] sm:$0xff] %v170_v37 }
  0x98   :  { %175 = vst [vmem:[%s359_s3 + $0x10] sm:$0xff] %v159_v38 }
  0x99   :  { %179 = vst [vmem:[%s359_s3 + $0x30] sm:$0xff] %v163_v39  ;;  %v142_v40 = vpop.f32.mrf.mxu2  ;;  %v152_v41 = vpop.f32.mrf.mxu3 }
  0x9a   :  { %v143_v42 = vadd.f32 %v249_v9, %v142_v40  ;;  %v153_v43 = vadd.f32 %v249_v9, %v152_v41  ;;  %v124_v44 = vpop.f32.mrf.mxu0  ;;  %v134_v45 = vpop.f32.mrf.mxu1 }
  0x9b   :  { %v125_v46 = vadd.f32 %v249_v9, %v124_v44  ;;  %v135_v47 = vadd.f32 %v249_v9, %v134_v45 }
  0x9c   :  { %v167_v48 = vmax.f32 %v143_v42, 0.0  ;;  %v171_v49 = vmax.f32 %v153_v43, 0.0 }
  0x9d   :  { %v160_v50 = vmax.f32 %v125_v46, 0.0  ;;  %v164_v51 = vmax.f32 %v135_v47, 0.0 }
  0x9e   :  { %183 = vst [vmem:[%s359_s3 + $0x50] sm:$0xff] %v167_v48 }
  0x9f   :  { %187 = vst [vmem:[%s359_s3 + $0x70] sm:$0xff] %v171_v49 }
  0xa0   :  { %176 = vst [vmem:[%s359_s3 + $0x18] sm:$0xff] %v160_v50 }
  0xa1   :  { %180 = vst [vmem:[%s359_s3 + $0x38] sm:$0xff] %v164_v51  ;;  %v144_v52 = vpop.f32.mrf.mxu2  ;;  %v154_v53 = vpop.f32.mrf.mxu3 }
  0xa2   :  { %v145_v54 = vadd.f32 %v249_v9, %v144_v52  ;;  %v155_v55 = vadd.f32 %v249_v9, %v154_v53 }
  0xa4   :  { %v168_v56 = vmax.f32 %v145_v54, 0.0  ;;  %v172_v57 = vmax.f32 %v155_v55, 0.0 }
  0xa6   :  { %184 = vst [vmem:[%s359_s3 + $0x58] sm:$0xff] %v168_v56 }
  0xa7   :  { %188 = vst [vmem:[%s359_s3 + $0x78] sm:$0xff] %v172_v57 }

// kernel: inception_c_forward.19
= control target key start
LH: loop header
LB: loop body
LE: loop exit
PB: predicated region body
PF: predicated region fallthrough
CT: control target
= control target key end

     0   :  { %s1506_s25 = smov 8   ;;  %s1507_s7 = smov 16   ;;  %vm1104_vm0 = vcmask 130048   ;;  %vm1055_vm1 = vcmask 64512   ;;  %vm1366_vm2 = vcmask 1043456   ;;  %vm1137_vm3 = vcmask 195584   ;;  %s2663_s0 = inlined_call_operand.vmem [shape: bf16[16,14,8], index: 0, kind: input, shape index: {}]   ;;  %s2664_s1 = inlined_call_operand.vmem [shape: bf16[56,128], index: 1, kind: input, shape index: {}]   ;;  %s2665_s2 = inlined_call_operand.vmem [shape: f32[1,128], index: 2, kind: input, shape index: {}]   ;;  %s2666_s3 = inlined_call_operand.vmem [shape: f32[16,8,128], index: 3, kind: output, shape index: {}]  }
   0x1   :  { %v1535_v0 = vld [vmem:[%s2663_s0 + $0x20] sm:$0xf]  ;;  %v1540_v1 = vld [vmem:[%s2663_s0 + $0x24] sm:$0x1]  ;;  %v17_v2 = vld [vmem:[%s2663_s0 + $0x10] sm:$0xf] }
   0x2   :  { %v167_v3 = vunpack.c.l.b16 %v1535_v0  ;;  %v168_v4 = vunpack.c.l.b16 %v1540_v1  ;;  %v1550_v5 = vld [vmem:[%s2663_s0 + $0x14] sm:$0x1]  ;;  %v163_v6 = vunpack.c.l.b16 %v17_v2  ;;  %v1555_v7 = vld [vmem:[%s2663_s0] sm:$0xf]  ;;  %v1560_v8 = vld [vmem:[%s2663_s0 + $0x4] sm:$0x1] }
   0x3   :  { %v164_v9 = vunpack.c.l.b16 %v1550_v5  ;;  %v159_v10 = vunpack.c.l.b16 %v1555_v7  ;;  %v160_v11 = vunpack.c.l.b16 %v1560_v8  ;;  %v20_v12 = vld [vmem:[%s2663_s0 + $0x28] sm:$0xf]  ;;  %v1571_v13 = vld [vmem:[%s2663_s0 + $0x2c] sm:$0x1]  ;;  %v1576_v14 = vld [vmem:[%s2663_s0 + $0x18] sm:$0xf] }
   0x4   :  { %v195_v15 = vpack.c.b16 %v168_v4, %v167_v3  ;;  %v169_v16 = vunpack.c.l.b16 %v20_v12  ;;  %v170_v17 = vunpack.c.l.b16 %v1571_v13  ;;  %v1584_v18 = vld [vmem:[%s2663_s0 + $0x1c] sm:$0x1]  ;;  %v165_v19 = vunpack.c.l.b16 %v1576_v14  ;;  %v1590_v20 = vld [vmem:[%s2663_s0 + $0x8] sm:$0xf]  ;;  %v1595_v21 = vld [vmem:[%s2663_s0 + $0xc] sm:$0x1] }
   0x5   :  { %v193_v22 = vpack.c.b16 %v164_v9, %v163_v6  ;;  %v191_v23 = vpack.c.b16 %v160_v11, %v159_v10  ;;  %v166_v24 = vunpack.c.l.b16 %v1584_v18  ;;  %v161_v25 = vunpack.c.l.b16 %v1590_v20  ;;  %v23_v34 = vld [vmem:[%s2663_s0 + $0x40] sm:$0xf]  ;;  %v1614_v38 = vld [vmem:[%s2663_s0 + $0x44] sm:$0x1]  ;;  %v1619_v39 = vld [vmem:[%s2663_s0 + $0x38] sm:$0xf] }
   0x6   :  { %v236_v26 = vshrl.u32 %v195_v15, 16  ;;  %v238_v27 = vshll.u32 %v195_v15, 16  ;;  %v196_v28 = vpack.c.b16 %v170_v17, %v169_v16  ;;  %v162_v29 = vunpack.c.l.b16 %v1595_v21  ;;  %v1626_v44 = vld [vmem:[%s2663_s0 + $0x3c] sm:$0x1]  ;;  %v1631_v49 = vld [vmem:[%s2663_s0 + $0x30] sm:$0xf] }
   0x7   :  { %v222_v30 = vshrl.u32 %v193_v22, 16  ;;  %v224_v31 = vshll.u32 %v193_v22, 16  ;;  %v208_v32 = vshrl.u32 %v191_v23, 16  ;;  %v210_v33 = vshll.u32 %v191_v23, 16  ;;  %v1636_v50 = vld [vmem:[%s2663_s0 + $0x34] sm:$0x1] }
   0x8   :  { %v240_v35 = vrot.slane %v238_v27, 1  ;;  %v245_v36 = vshll.u32 %v196_v28, 16  ;;  %v194_v37 = vpack.c.b16 %v166_v24, %v165_v19  ;;  %v243_v42 = vshrl.u32 %v196_v28, 16  ;;  %v26_v55 = vld [vmem:[%s2663_s0 + $0x58] sm:$0xf]  ;;  %s1508_s5 = smov 24  }
   0x9   :  { %v226_v40 = vrot.slane %v224_v31, 1  ;;  %v212_v41 = vrot.slane %v210_v33, 1  ;;  %v192_v43 = vpack.c.b16 %v162_v29, %v161_v25  ;;  %v175_v48 = vunpack.c.l.b16 %v23_v34  ;;  %v1644_v56 = vld [vmem:[%s2663_s0 + $0x5c] sm:$0x1]  ;;  %v1652_v61 = vld [vmem:[%s2663_s0 + $0x50] sm:$0xf] }
   0xa   :  { %v241_v45 = vor.u32 %v240_v35, %v236_v26  ;;  %v247_v46 = vrot.slane %v245_v36, 1  ;;  %v231_v47 = vshll.u32 %v194_v37, 16  ;;  %v229_v53 = vshrl.u32 %v194_v37, 16  ;;  %v1662_v6 = vld [vmem:[%s2663_s0 + $0x54] sm:$0x1]  ;;  %s1509_s22 = smov 32  }
   0xb   :  { %v227_v51 = vor.u32 %v226_v40, %v222_v30  ;;  %v213_v52 = vor.u32 %v212_v41, %v208_v32  ;;  %v217_v54 = vshll.u32 %v192_v43, 16  ;;  %v215_v58 = vshrl.u32 %v192_v43, 16  ;;  %v24_v27 = vld [vmem:[%s2663_s0 + $0x48] sm:$0xf]  ;;  %v1679_v28 = vld [vmem:[%s2663_s0 + $0x4c] sm:$0x1] }
   0xc   :  { %327 = vrot.lane.b32.xlu2 %v241_v45, %s1506_s25  ;;  %v233_v57 = vrot.slane %v231_v47, 1  ;;  %v176_v59 = vunpack.c.l.b16 %v1614_v38  ;;  %v173_v60 = vunpack.c.l.b16 %v1619_v39  ;;  %v174_v63 = vunpack.c.l.b16 %v1626_v44  ;;  %v29_v47 = vld [vmem:[%s2663_s0 + $0x70] sm:$0xf]  ;;  %v1772_v21 = vld [vmem:[%s2663_s0 + $0x18] sm:$0xe]  ;;  %s1510_s26 = smov 40  }
   0xd   :  { %323 = vrot.lane.b32.xlu1 %v227_v51, %s1506_s25  ;;  %319 = vrot.lane.b32.xlu0 %v213_v52, %s1506_s25  ;;  %v219_v62 = vrot.slane %v217_v54, 1  ;;  %v171_v2 = vunpack.c.l.b16 %v1631_v49  ;;  %v172_v3 = vunpack.c.l.b16 %v1636_v50  ;;  %v181_v12 = vunpack.c.l.b16 %v26_v55  ;;  %v1697_v51 = vld [vmem:[%s2663_s0 + $0x74] sm:$0x1]  ;;  %v28_v52 = vld [vmem:[%s2663_s0 + $0x68] sm:$0xf]  ;;  %s1511_s13 = smov 48  }
   0xe   :  { %v199_v10 = vpack.c.b16 %v176_v59, %v175_v48  ;;  %v182_v15 = vunpack.c.l.b16 %v1644_v56  ;;  %v198_v16 = vpack.c.b16 %v174_v63, %v173_v60  ;;  %v179_v22 = vunpack.c.l.b16 %v1652_v61  ;;  %v27_v54 = vld [vmem:[%s2663_s0 + $0x60] sm:$0xf]  ;;  %v1713_v55 = vld [vmem:[%s2663_s0 + $0x64] sm:$0x1]  ;;  %v1805_v1 = vld [vmem:[%s2663_s0 + $0x30] sm:$0xe] }
   0xf   :  { %v197_v19 = vpack.c.b16 %v172_v3, %v171_v2  ;;  %v248_v23 = vor.u32 %v247_v46, %v243_v42  ;;  %v180_v26 = vunpack.c.l.b16 %v1662_v6  ;;  %v234_v30 = vor.u32 %v233_v57, %v229_v53  ;;  %v1705_v53 = vld [vmem:[%s2663_s0 + $0x6c] sm:$0x1] }
  0x10   :  { %v266_v25 = vshll.u32 %v199_v10, 16  ;;  %v220_v31 = vor.u32 %v219_v62, %v215_v58  ;;  %v259_v32 = vshll.u32 %v198_v16, 16  ;;  %v264_v34 = vshrl.u32 %v199_v10, 16 }
  0x11   :  { %v252_v33 = vshll.u32 %v197_v19, 16  ;;  %v257_v36 = vshrl.u32 %v198_v16, 16  ;;  %v202_v37 = vpack.c.b16 %v182_v15, %v181_v12  ;;  %v201_v41 = vpack.c.b16 %v180_v26, %v179_v22 }
  0x12   :  { %v268_v35 = vrot.slane %v266_v25, 1  ;;  %v261_v40 = vrot.slane %v259_v32, 1  ;;  %v177_v42 = vunpack.c.l.b16 %v24_v27  ;;  %v178_v43 = vunpack.c.l.b16 %v1679_v28  ;;  %v60_v28 = vld [vmem:[%s2663_s0 + $0x68] sm:$0xe] }
  0x13   :  { %v250_v45 = vshrl.u32 %v197_v19, 16  ;;  %v254_v46 = vrot.slane %v252_v33, 1  ;;  %v287_v60 = vshll.u32 %v202_v37, 16  ;;  %v280_v62 = vshll.u32 %v201_v41, 16 }
  0x14   :  { %329 = vrot.lane.b32.xlu2 %v248_v23, %s1506_s25  ;;  %v200_v48 = vpack.c.b16 %v178_v43, %v177_v42  ;;  %v269_v57 = vor.u32 %v268_v35, %v264_v34  ;;  %v262_v58 = vor.u32 %v261_v40, %v257_v36  ;;  %v187_v10 = vunpack.c.l.b16 %v29_v47  ;;  %v30_v40 = vld [vmem:[%s2663_s0 + $0x78] sm:$0xf] }
  0x15   :  { %325 = vrot.lane.b32.xlu1 %v234_v30, %s1506_s25  ;;  %321 = vrot.lane.b32.xlu0 %v220_v31, %s1506_s25  ;;  %v255_v2 = vor.u32 %v254_v46, %v250_v45  ;;  %v188_v12 = vunpack.c.l.b16 %v1697_v51  ;;  %v185_v16 = vunpack.c.l.b16 %v28_v52  ;;  %v186_v22 = vunpack.c.l.b16 %v1705_v53  ;;  %v2126_v51 = vld [vmem:[%s2663_s0 + $0x7c] sm:$0x3] }
  0x16   :  { %v273_v19 = vshll.u32 %v200_v48, 16  ;;  %v183_v23 = vunpack.c.l.b16 %v27_v54  ;;  %v184_v25 = vunpack.c.l.b16 %v1713_v55  ;;  %v285_v27 = vshrl.u32 %v202_v37, 16  ;;  %v91_v55 = vld [vmem:[%s2663_s0 + $0x60] sm:$0xc] }
  0x17   :  { %v289_v30 = vrot.slane %v287_v60, 1  ;;  %v278_v31 = vshrl.u32 %v201_v41, 16  ;;  %v282_v32 = vrot.slane %v280_v62, 1  ;;  %v205_v33 = vpack.c.b16 %v188_v12, %v187_v10  ;;  %v1733_v41 = vld [vmem:[%s2663_s0 + $0x7c] sm:$0x1] }
  0x18   :  { %v271_v34 = vshrl.u32 %v200_v48, 16  ;;  %v275_v35 = vrot.slane %v273_v19, 1  ;;  %v204_v36 = vpack.c.b16 %v186_v22, %v185_v16  ;;  %v203_v37 = vpack.c.b16 %v184_v25, %v183_v23  ;;  %v1742_v19 = vld [vmem:[%s2663_s0 + $0x8] sm:$0xe] }
  0x19   :  { %v290_v42 = vor.u32 %v289_v30, %v285_v27  ;;  %v283_v45 = vor.u32 %v282_v32, %v278_v31  ;;  %v308_v46 = vshll.u32 %v205_v33, 16  ;;  %v189_v47 = vunpack.c.l.b16 %v30_v40  ;;  %v1749_v27 = vld [vmem:[%s2663_s0] sm:$0xe] }
  0x1a   :  { %v276_v48 = vor.u32 %v275_v35, %v271_v34  ;;  %v301_v52 = vshll.u32 %v204_v36, 16  ;;  %v294_v54 = vshll.u32 %v203_v37, 16  ;;  %v299_v62 = vshrl.u32 %v204_v36, 16 }
  0x1b   :  { %v310_v60 = vrot.slane %v308_v46, 1  ;;  %v292_v10 = vshrl.u32 %v203_v37, 16  ;;  %v368_v31 = vunpack.c.l.b16 %v1742_v19  ;;  %v367_v34 = vunpack.c.l.b16 %v1749_v27 }
  0x1c   :  { %335 = vrot.lane.b32.xlu2 %v269_v57, %s1506_s25  ;;  %v190_v57 = vunpack.c.l.b16 %v1733_v41  ;;  %v296_v16 = vrot.slane %v294_v54, 1  ;;  %vm1170_vm4 = vcmask 261120   ;;  %vm1203_vm5 = vcmask 326656  }
  0x1d   :  { %333 = vrot.lane.b32.xlu1 %v262_v58, %s1506_s25  ;;  %331 = vrot.lane.b32.xlu0 %v255_v2, %s1506_s25  ;;  %v306_v58 = vshrl.u32 %v205_v33, 16  ;;  %v303_v2 = vrot.slane %v301_v52, 1  ;;  %v384_v36 = vpack.c.b16 %v162_v29, %v368_v31  ;;  %v383_v37 = vpack.c.b16 %v160_v11, %v367_v34  ;;  %v1777_v29 = vld [vmem:[%s2663_s0 + $0x10] sm:$0xe] }
  0x1e   :  { %v206_v23 = vpack.c.b16 %v190_v57, %v189_v47  ;;  %v297_v33 = vor.u32 %v296_v16, %v292_v10  ;;  %v369_v52 = vunpack.c.l.b16 %v1777_v29  ;;  %vm1236_vm6 = vcmask 392192  }
  0x1f   :  { %v311_v30 = vor.u32 %v310_v60, %v306_v58  ;;  %v304_v32 = vor.u32 %v303_v2, %v299_v62  ;;  %v400_v46 = vrot.slane %v384_v36, 1  ;;  %v399_v11 = vrot.slane %v383_v37, 1  ;;  %v1800_v62 = vld [vmem:[%s2663_s0 + $0x38] sm:$0xe] }
  0x20   :  { %v315_v35 = vshll.u32 %v206_v23, 16  ;;  %v313_v40 = vshrl.u32 %v206_v23, 16  ;;  %v385_v60 = vpack.c.b16 %v164_v9, %v369_v52  ;;  %v373_v2 = vunpack.c.l.b16 %v1805_v1  ;;  %v1823_v23 = vld [vmem:[%s2663_s0 + $0x50] sm:$0xe] }
  0x21   :  { %v377_v50 = vunpack.c.l.b16 %v1823_v23  ;;  %v2139_v23 = vld [vmem:[%s2663_s0 + $0x74] sm:$0x3]  ;;  %vm1341_vm7 = vcmask 457728  }
  0x22   :  { %v401_v9 = vrot.slane %v385_v60, 1 }
  0x24   :  { %341 = vrot.lane.b32.xlu2 %v290_v42, %s1506_s25  ;;  %v317_v42 = vrot.slane %v315_v35, 1 }
  0x25   :  { %339 = vrot.lane.b32.xlu1 %v283_v45, %s1506_s25  ;;  %337 = vrot.lane.b32.xlu0 %v276_v48, %s1506_s25  ;;  %v1767_v45 = vld [vmem:[%s2663_s0 + $0x20] sm:$0xe]  ;;  %v370_v48 = vunpack.c.l.b16 %v1772_v21  ;;  %v2358_v21 = vld [vmem:[%s2663_s0 + $0x14] sm:$0x7] }
  0x26   :  { %v371_v8 = vunpack.c.l.b16 %v1767_v45  ;;  %v318_v47 = vor.u32 %v317_v42, %v313_v40  ;;  %v393_v40 = vpack.c.b16 %v180_v26, %v377_v50  ;;  %v75_v26 = vld [vmem:[%s2663_s0 + $0x64] sm:$0x3]  ;;  %v1982_v45 = vld [vmem:[%s2663_s0 + $0x2c] sm:$0x3] }
  0x27   :  { %v386_v58 = vpack.c.b16 %v166_v24, %v370_v48  ;;  %v374_v24 = vunpack.c.l.b16 %v1800_v62 }
  0x28   :  { %v387_v54 = vpack.c.b16 %v168_v4, %v371_v8  ;;  %v1810_v4 = vld [vmem:[%s2663_s0 + $0x28] sm:$0xe] }
  0x29   :  { %v402_v5 = vrot.slane %v386_v58, 1  ;;  %v372_v10 = vunpack.c.l.b16 %v1810_v4  ;;  %v390_v16 = vpack.c.b16 %v174_v63, %v374_v24  ;;  %v56_v63 = vld [vmem:[%s2663_s0 + $0x48] sm:$0xe] }
  0x2a   :  { %v403_v18 = vrot.slane %v387_v54, 1  ;;  %v376_v35 = vunpack.c.l.b16 %v56_v63  ;;  %v409_v54 = vrot.slane %v393_v40, 1 }
  0x2b   :  { %v388_v44 = vpack.c.b16 %v170_v17, %v372_v10 }
  0x2c   :  { %347 = vrot.lane.b32.xlu2 %v311_v30, %s1506_s25  ;;  %v389_v30 = vpack.c.b16 %v172_v3, %v373_v2  ;;  %v406_v3 = vrot.slane %v390_v16, 1  ;;  %v392_v42 = vpack.c.b16 %v178_v43, %v376_v35  ;;  %v59_v43 = vld [vmem:[%s2663_s0 + $0x60] sm:$0xe] }
  0x2d   :  { %345 = vrot.lane.b32.xlu1 %v304_v32, %s1506_s25  ;;  %343 = vrot.lane.b32.xlu0 %v297_v33, %s1506_s25  ;;  %v1841_v32 = vld [vmem:[%s2663_s0 + $0x44] sm:$0x3]  ;;  %v55_v33 = vld [vmem:[%s2663_s0 + $0x40] sm:$0xe]  ;;  %v404_v36 = vrot.slane %v388_v44, 1  ;;  %v379_v16 = vunpack.c.l.b16 %v59_v43 }
  0x2e   :  { %v471_v13 = vunpack.c.l.b16 %v1841_v32  ;;  %v405_v17 = vrot.slane %v389_v30, 1  ;;  %v375_v37 = vunpack.c.l.b16 %v55_v33  ;;  %v107_v32 = vld [vmem:[%s2663_s0 + $0x64] sm:$0x7] }
  0x30   :  { %v391_v6 = vpack.c.b16 %v176_v59, %v375_v37  ;;  %v408_v59 = vrot.slane %v392_v42, 1 }
  0x34   :  { %417 = vrot.lane.b32.xlu2 %v400_v46, %s1507_s7  ;;  %v487_v46 = vpack.c.b16 %v471_v13, %v375_v37 }
  0x35   :  { %415 = vrot.lane.b32.xlu1 %v399_v11, %s1507_s7  ;;  %349 = vrot.lane.b32.xlu0 %v318_v47, %s1506_s25  ;;  %v1860_v11 = vld [vmem:[%s2663_s0 + $0x6c] sm:$0x3] }
  0x36   :  { %v72_v47 = vld [vmem:[%s2663_s0 + $0x4c] sm:$0x3]  ;;  %v476_v38 = vunpack.c.l.b16 %v1860_v11  ;;  %v560_v58 = vshrl.u32 %v487_v46, 16  ;;  %v563_v60 = vshll.u32 %v487_v46, 16 }
  0x37   :  { %v472_v30 = vunpack.c.l.b16 %v72_v47 }
  0x38   :  { %v562_v63 = vrot.slane %v560_v58, 1  ;;  %v565_v33 = vrot.slane %v563_v60, 2 }
  0x39   :  { %v488_v37 = vpack.c.b16 %v472_v30, %v376_v35 }
  0x3a   :  { %v566_v46 = vor.u32 %v565_v33, %v562_v63 }
  0x3b   :  { %v568_v47 = vshrl.u32 %v488_v37, 16 }
  0x3c   :  { %423 = vrot.lane.b32.xlu2 %v403_v18, %s1507_s7  ;;  %v475_v18 = vunpack.c.l.b16 %v75_v26 }
  0x3d   :  { %421 = vrot.lane.b32.xlu1 %v402_v5, %s1507_s7  ;;  %419 = vrot.lane.b32.xlu0 %v401_v9, %s1507_s7  ;;  %v407_v5 = vrot.slane %v391_v6, 1  ;;  %v380_v9 = vunpack.c.l.b16 %v60_v28  ;;  %v570_v35 = vrot.slane %v568_v47, 1 }
  0x3f   :  { %v492_v44 = vpack.c.b16 %v476_v38, %v380_v9 }
  0x41   :  { %v600_v40 = vshrl.u32 %v492_v44, 16  ;;  %v603_v42 = vshll.u32 %v492_v44, 16  ;;  %v683_v44 = vunpack.c.l.b16 %v91_v55 }
  0x43   :  { %v602_v58 = vrot.slane %v600_v40, 1 }
  0x44   :  { %429 = vrot.lane.b32.xlu2 %v406_v3, %s1507_s7  ;;  %v491_v3 = vpack.c.b16 %v475_v18, %v379_v16 }
  0x45   :  { %427 = vrot.lane.b32.xlu1 %v405_v17, %s1507_s7  ;;  %425 = vrot.lane.b32.xlu0 %v404_v36, %s1507_s7  ;;  %v396_v17 = vpack.c.b16 %v186_v22, %v380_v9  ;;  %v395_v36 = vpack.c.b16 %v184_v25, %v379_v16  ;;  %v88_v25 = vld [vmem:[%s2663_s0 + $0x48] sm:$0xc]  ;;  %v1903_v9 = vld [vmem:[%s2663_s0 + $0x4c] sm:$0x7] }
  0x46   :  { %v592_v6 = vshrl.u32 %v491_v3, 16  ;;  %v595_v26 = vshll.u32 %v491_v3, 16  ;;  %v103_v16 = vld [vmem:[%s2663_s0 + $0x44] sm:$0x7]  ;;  %v680_v63 = vunpack.c.l.b16 %v88_v25  ;;  %v779_v25 = vunpack.c.l.b16 %v107_v32 }
  0x47   :  { %v412_v28 = vrot.slane %v396_v17, 1  ;;  %v411_v43 = vrot.slane %v395_v36, 1  ;;  %v776_v17 = vunpack.c.l.b16 %v1903_v9  ;;  %v775_v40 = vunpack.c.l.b16 %v103_v16 }
  0x48   :  { %v594_v53 = vrot.slane %v592_v6, 1  ;;  %v597_v22 = vrot.slane %v595_v26, 2 }
  0x49   :  { %v792_v26 = vpack.c.b16 %v776_v17, %v680_v63 }
  0x4a   :  { %v598_v36 = vor.u32 %v597_v22, %v594_v53 }
  0x4c   :  { %435 = vrot.lane.b32.xlu2 %v409_v54, %s1507_s7  ;;  %v571_v54 = vshll.u32 %v488_v37, 16 }
  0x4d   :  { %433 = vrot.lane.b32.xlu1 %v408_v59, %s1507_s7  ;;  %431 = vrot.lane.b32.xlu0 %v407_v5, %s1507_s7  ;;  %v605_v59 = vrot.slane %v603_v42, 2  ;;  %v87_v5 = vld [vmem:[%s2663_s0 + $0x40] sm:$0xc]  ;;  %v699_v42 = vpack.c.b16 %v475_v18, %v683_v44  ;;  %v92_v18 = vld [vmem:[%s2663_s0 + $0x68] sm:$0xc] }
  0x4e   :  { %v573_v60 = vrot.slane %v571_v54, 2  ;;  %v679_v3 = vunpack.c.l.b16 %v87_v5  ;;  %v872_v54 = vshrl.u32 %v792_v26, 16  ;;  %v684_v55 = vunpack.c.l.b16 %v92_v18 }
  0x4f   :  { %v606_v33 = vor.u32 %v605_v59, %v602_v58  ;;  %v875_v58 = vshll.u32 %v792_v26, 16 }
  0x50   :  { %v574_v37 = vor.u32 %v573_v60, %v570_v35  ;;  %v695_v6 = vpack.c.b16 %v471_v13, %v679_v3  ;;  %v715_v13 = vrot.slane %v699_v42, 2  ;;  %v874_v35 = vrot.slane %v872_v54, 2 }
  0x51   :  { %v877_v60 = vrot.slane %v875_v58, 3  ;;  %v64_v58 = vld [vmem:[%s2663_s0 + $0xc] sm:$0x3] }
  0x52   :  { %v711_v47 = vrot.slane %v695_v6, 2 }
  0x53   :  { %v878_v42 = vor.u32 %v877_v60, %v874_v35 }
  0x54   :  { %639 = vrot.lane.b32.xlu2 %v566_v46, %s1508_s5  ;;  %v696_v46 = vpack.c.b16 %v472_v30, %v680_v63 }
  0x55   :  { %441 = vrot.lane.b32.xlu1 %v412_v28, %s1507_s7  ;;  %439 = vrot.lane.b32.xlu0 %v411_v43, %s1507_s7  ;;  %v791_v28 = vpack.c.b16 %v775_v40, %v679_v3  ;;  %v108_v43 = vld [vmem:[%s2663_s0 + $0x6c] sm:$0x7]  ;;  %v119_v3 = vld [vmem:[%s2663_s0 + $0x40] sm:$0x8] }
  0x56   :  { %v712_v30 = vrot.slane %v696_v46, 2  ;;  %v780_v59 = vunpack.c.l.b16 %v108_v43  ;;  %v983_v46 = vunpack.c.l.b16 %v119_v3 }
  0x57   :  { %v864_v53 = vshrl.u32 %v791_v28, 16  ;;  %v867_v22 = vshll.u32 %v791_v28, 16 }
  0x58   :  { %v796_v5 = vpack.c.b16 %v780_v59, %v684_v55  ;;  %v999_v11 = vpack.c.b16 %v775_v40, %v983_v46  ;;  %v1947_v40 = vld [vmem:[%s2663_s0 + $0x24] sm:$0x3] }
  0x59   :  { %v866_v16 = vrot.slane %v864_v53, 2  ;;  %v869_v63 = vrot.slane %v867_v22, 3  ;;  %v120_v22 = vld [vmem:[%s2663_s0 + $0x48] sm:$0x8] }
  0x5a   :  { %v904_v6 = vshrl.u32 %v796_v5, 16  ;;  %v907_v26 = vshll.u32 %v796_v5, 16  ;;  %v1015_v5 = vrot.slane %v999_v11, 3 }
  0x5b   :  { %v870_v28 = vor.u32 %v869_v63, %v866_v16  ;;  %v467_v16 = vunpack.c.l.b16 %v1947_v40  ;;  %v464_v63 = vunpack.c.l.b16 %v64_v58 }
  0x5c   :  { %649 = vrot.lane.b32.xlu2 %v606_v33, %s1508_s5  ;;  %v700_v33 = vpack.c.b16 %v476_v38, %v684_v55  ;;  %v906_v38 = vrot.slane %v904_v6, 2  ;;  %v1960_v55 = vld [vmem:[%s2663_s0 + $0x4] sm:$0x3] }
  0x5d   :  { %647 = vrot.lane.b32.xlu1 %v598_v36, %s1508_s5  ;;  %641 = vrot.lane.b32.xlu0 %v574_v37, %s1508_s5  ;;  %v795_v36 = vpack.c.b16 %v779_v25, %v683_v44  ;;  %v124_v44 = vld [vmem:[%s2663_s0 + $0x68] sm:$0x8] }
  0x5e   :  { %v716_v43 = vrot.slane %v700_v33, 2  ;;  %v988_v35 = vunpack.c.l.b16 %v124_v44 }
  0x5f   :  { %v896_v18 = vshrl.u32 %v795_v36, 16  ;;  %v899_v32 = vshll.u32 %v795_v36, 16  ;;  %v984_v36 = vunpack.c.l.b16 %v120_v22  ;;  %v80_v22 = vld [vmem:[%s2663_s0 + $0x8] sm:$0xc] }
  0x60   :  { %v1004_v46 = vpack.c.b16 %v780_v59, %v988_v35 }
  0x61   :  { %v901_v54 = vrot.slane %v899_v32, 3 }
  0x64   :  { %743 = vrot.lane.b32.xlu2 %v715_v13, %s1509_s22  ;;  %v909_v13 = vrot.slane %v907_v26, 3  ;;  %v483_v26 = vpack.c.b16 %v467_v16, %v371_v8  ;;  %v1020_v8 = vrot.slane %v1004_v46, 3 }
  0x65   :  { %737 = vrot.lane.b32.xlu1 %v712_v30, %s1509_s22  ;;  %735 = vrot.lane.b32.xlu0 %v711_v47, %s1509_s22  ;;  %v123_v30 = vld [vmem:[%s2663_s0 + $0x60] sm:$0x8]  ;;  %v898_v47 = vrot.slane %v896_v18, 2 }
  0x66   :  { %v1933_v37 = vpop.permute.xlu2 %327  ;;  %v987_v60 = vunpack.c.l.b16 %v123_v30  ;;  %v910_v33 = vor.u32 %v909_v13, %v906_v38  ;;  %v531_v18 = vshll.u32 %v483_v26, 16 }
  0x67   :  { %v902_v3 = vor.u32 %v901_v54, %v898_v47  ;;  %v1989_v47 = vld [vmem:[%s2663_s0 + $0x4] sm:$0x7] }
  0x68   :  { %v1003_v6 = vpack.c.b16 %v779_v25, %v987_v60  ;;  %v79_v60 = vld [vmem:[%s2663_s0] sm:$0xc] }
  0x6a   :  { %v1019_v19 = vrot.slane %v1003_v6, 3  ;;  %v672_v6 = vunpack.c.l.b16 %v80_v22 }
  0x6c   :  { %945 = vrot.lane.b32.xlu2 %v878_v42, %s1510_s26  ;;  %v463_v42 = vunpack.c.l.b16 %v1960_v55 }
  0x6d   :  { %943 = vrot.lane.b32.xlu1 %v870_v28, %s1510_s26  ;;  %745 = vrot.lane.b32.xlu0 %v716_v43, %s1509_s22  ;;  %v480_v28 = vpack.c.b16 %v464_v63, %v368_v31  ;;  %v1000_v43 = vpack.c.b16 %v776_v17, %v984_v36  ;;  %v528_v31 = vshrl.u32 %v483_v26, 16  ;;  %v468_v17 = vunpack.c.l.b16 %v1982_v45  ;;  %v84_v45 = vld [vmem:[%s2663_s0 + $0x28] sm:$0xc] }
  0x6e   :  { %v1952_v53 = vpop.permute.xlu2 %329  ;;  %v479_v59 = vpack.c.b16 %v463_v42, %v367_v34  ;;  %v533_v34 = vrot.slane %v531_v18, 2  ;;  %v83_v18 = vld [vmem:[%s2663_s0 + $0x20] sm:$0xc] }
  0x6f   :  { %v504_v32 = vshrl.u32 %v480_v28, 16  ;;  %v507_v11 = vshll.u32 %v480_v28, 16  ;;  %v1016_v38 = vrot.slane %v1000_v43, 3  ;;  %v530_v27 = vrot.slane %v528_v31, 1 }
  0x70   :  { %v496_v13 = vshrl.u32 %v479_v59, 16  ;;  %v499_v9 = vshll.u32 %v479_v59, 16  ;;  %v484_v55 = vpack.c.b16 %v468_v17, %v372_v10  ;;  %v671_v28 = vunpack.c.l.b16 %v79_v60 }
  0x71   :  { %v506_v44 = vrot.slane %v504_v32, 1  ;;  %v509_v30 = vrot.slane %v507_v11, 2  ;;  %v534_v36 = vor.u32 %v533_v34, %v530_v27  ;;  %v688_v59 = vpack.c.b16 %v464_v63, %v672_v6  ;;  %v2022_v32 = vld [vmem:[%s2663_s0 + $0x2c] sm:$0x7]  ;;  %v2029_v11 = vld [vmem:[%s2663_s0 + $0x24] sm:$0x7] }
  0x72   :  { %v498_v54 = vrot.slane %v496_v13, 1  ;;  %v501_v58 = vrot.slane %v499_v9, 2  ;;  %v536_v43 = vshrl.u32 %v484_v55, 16  ;;  %v539_v4 = vshll.u32 %v484_v55, 16 }
  0x73   :  { %v510_v46 = vor.u32 %v509_v30, %v506_v44  ;;  %v704_v34 = vrot.slane %v688_v59, 2  ;;  %v676_v44 = vunpack.c.l.b16 %v84_v45  ;;  %v675_v30 = vunpack.c.l.b16 %v83_v18 }
  0x74   :  { %1039 = vrot.lane.b32.xlu2 %v1015_v5, %s1511_s13  ;;  %v502_v26 = vor.u32 %v501_v58, %v498_v54  ;;  %v541_v31 = vrot.slane %v539_v4, 2  ;;  %v772_v54 = vunpack.c.l.b16 %v2022_v32  ;;  %v771_v55 = vunpack.c.l.b16 %v2029_v11  ;;  %v62_v32 = vld [vmem:[%s2663_s0 + $0x78] sm:$0xe] }
  0x75   :  { %953 = vrot.lane.b32.xlu1 %v910_v33, %s1510_s26  ;;  %951 = vrot.lane.b32.xlu0 %v902_v3, %s1510_s26  ;;  %v767_v3 = vunpack.c.l.b16 %v1989_v47 }
  0x76   :  { %v1977_v25 = vpop.permute.xlu2 %335  ;;  %v787_v4 = vpack.c.b16 %v771_v55, %v675_v30 }
  0x77   :  { %v783_v10 = vpack.c.b16 %v767_v3, %v671_v28 }
  0x79   :  { %v800_v9 = vshrl.u32 %v783_v10, 16  ;;  %v803_v27 = vshll.u32 %v783_v10, 16 }
  0x7c   :  { %1049 = vrot.lane.b32.xlu2 %v1020_v8, %s1511_s13  ;;  %v687_v8 = vpack.c.b16 %v463_v42, %v671_v28  ;;  %v2034_v42 = vld [vmem:[%s2663_s0 + $0xc] sm:$0x7]  ;;  %v691_v28 = vpack.c.b16 %v467_v16, %v675_v30 }
  0x7d   :  { %1047 = vrot.lane.b32.xlu1 %v1019_v19, %s1511_s13  ;;  %1041 = vrot.lane.b32.xlu0 %v1016_v38, %s1511_s13  ;;  %v538_v19 = vrot.slane %v536_v43, 1  ;;  %v768_v60 = vunpack.c.l.b16 %v2034_v42  ;;  %v788_v43 = vpack.c.b16 %v772_v54, %v676_v44  ;;  %v832_v42 = vshrl.u32 %v787_v4, 16 }
  0x7e   :  { %v1998_v35 = vpop.permute.xlu2 %341  ;;  %v703_v58 = vrot.slane %v687_v8, 2 }
  0x7f   :  { %v2003_v5 = vpop.permute.xlu1 %323  ;;  %v2005_v33 = vpop.permute.xlu0 %319  ;;  %v542_v22 = vor.u32 %v541_v31, %v538_v19  ;;  %v784_v10 = vpack.c.b16 %v768_v60, %v672_v6  ;;  %v707_v31 = vrot.slane %v691_v28, 2  ;;  %v840_v18 = vshrl.u32 %v788_v43, 16  ;;  %v111_v28 = vld [vmem:[%s2663_s0] sm:$0x8] }
  0x80   :  { %v843_v11 = vshll.u32 %v788_v43, 16  ;;  %v1058_v56 = vsel %vm1055_vm1, %v1555_v7, %v2005_v33 }
  0x81   :  { %v842_v6 = vrot.slane %v840_v18, 2  ;;  %v61_v18 = vld [vmem:[%s2663_s0 + $0x70] sm:$0xe] }
  0x84   :  { %631 = vrot.lane.b32.xlu2 %v534_v36, %s1508_s5  ;;  %v802_v36 = vrot.slane %v800_v9, 2  ;;  %v835_v9 = vshll.u32 %v787_v4, 16 }
  0x85   :  { %625 = vrot.lane.b32.xlu1 %v510_v46, %s1508_s5  ;;  %623 = vrot.lane.b32.xlu0 %v502_v26, %s1508_s5  ;;  %v805_v46 = vrot.slane %v803_v27, 3  ;;  %v692_v26 = vpack.c.b16 %v468_v17, %v676_v44  ;;  %v808_v27 = vshrl.u32 %v784_v10, 16 }
  0x86   :  { %v2024_v63 = vpop.permute.xlu2 %347  ;;  %v837_v44 = vrot.slane %v835_v9, 3 }
  0x87   :  { %v2036_v38 = vpop.permute.xlu1 %325  ;;  %v322_v13 = vpop.permute.xlu0 %321  ;;  %v806_v16 = vor.u32 %v805_v46, %v802_v36  ;;  %v708_v19 = vrot.slane %v692_v26, 2  ;;  %v810_v30 = vrot.slane %v808_v27, 2  ;;  %v1070_v36 = vsel %vm1055_vm1, %v1535_v0, %v1933_v37  ;;  %v112_v26 = vld [vmem:[%s2663_s0 + $0x8] sm:$0x8] }
  0x88   :  { %v1061_v59 = vsel %vm1055_vm1, %v1590_v20, %v322_v13  ;;  %v845_v20 = vrot.slane %v843_v11, 3  ;;  %v834_v13 = vrot.slane %v832_v42, 2  ;;  %v976_v0 = vunpack.c.l.b16 %v112_v26  ;;  %v2082_v11 = vld [vmem:[%s2663_s0 + $0x5c] sm:$0x3]  ;;  %v116_v27 = vld [vmem:[%s2663_s0 + $0x28] sm:$0x8] }
  0x89   :  { %v975_v37 = vunpack.c.l.b16 %v111_v28 }
  0x8a   :  { %v992_v42 = vpack.c.b16 %v768_v60, %v976_v0 }
  0x8b   :  { %v991_v9 = vpack.c.b16 %v767_v3, %v975_v37  ;;  %v478_v37 = vunpack.c.l.b16 %v2126_v51  ;;  %v2247_v51 = vld [vmem:[%s2663_s0 + $0x7c] sm:$0x7] }
  0x8c   :  { %721 = vrot.lane.b32.xlu2 %v704_v34, %s1509_s22  ;;  %v811_v34 = vshll.u32 %v784_v10, 16 }
  0x8d   :  { %719 = vrot.lane.b32.xlu1 %v703_v58, %s1509_s22  ;;  %633 = vrot.lane.b32.xlu0 %v542_v22, %s1508_s5  ;;  %v115_v22 = vld [vmem:[%s2663_s0 + $0x20] sm:$0x8] }
  0x8e   :  { %v418_v45 = vpop.permute.xlu2 %417  ;;  %v813_v58 = vrot.slane %v811_v34, 3 }
  0x8f   :  { %v2051_v8 = vsel %vm1104_vm0, %v1061_v59, %v418_v45  ;;  %v334_v17 = vpop.permute.xlu1 %333  ;;  %v2053_v40 = vpop.permute.xlu0 %331  ;;  %v846_v59 = vor.u32 %v845_v20, %v842_v6  ;;  %v979_v45 = vunpack.c.l.b16 %v115_v22  ;;  %v2099_v20 = vld [vmem:[%s2663_s0 + $0x54] sm:$0x3]  ;;  %v980_v22 = vunpack.c.l.b16 %v116_v27 }
  0x90   :  { %v1079_v34 = vsel %vm1055_vm1, %v1619_v39, %v334_v17  ;;  %v1008_v39 = vrot.slane %v992_v42, 3  ;;  %v1007_v17 = vrot.slane %v991_v9, 3  ;;  %v382_v42 = vunpack.c.l.b16 %v62_v32 }
  0x91   :  { %v477_v9 = vunpack.c.l.b16 %v2139_v23 }
  0x94   :  { %927 = vrot.lane.b32.xlu2 %v806_v16, %s1510_s26  ;;  %v838_v16 = vor.u32 %v837_v44, %v834_v13  ;;  %v381_v13 = vunpack.c.l.b16 %v61_v18  ;;  %v474_v44 = vunpack.c.l.b16 %v2082_v11 }
  0x95   :  { %729 = vrot.lane.b32.xlu1 %v708_v19, %s1509_s22  ;;  %727 = vrot.lane.b32.xlu0 %v707_v31, %s1509_s22  ;;  %v814_v19 = vor.u32 %v813_v58, %v810_v30  ;;  %v995_v31 = vpack.c.b16 %v771_v55, %v979_v45  ;;  %v58_v55 = vld [vmem:[%s2663_s0 + $0x58] sm:$0xe] }
  0x96   :  { %v424_v46 = vpop.permute.xlu2 %423  ;;  %v378_v58 = vunpack.c.l.b16 %v58_v55 }
  0x97   :  { %v2071_v43 = vsel %vm1104_vm0, %v1070_v36, %v424_v46  ;;  %v340_v4 = vpop.permute.xlu1 %339  ;;  %v2073_v10 = vpop.permute.xlu0 %337  ;;  %v1011_v30 = vrot.slane %v995_v31, 3  ;;  %v473_v36 = vunpack.c.l.b16 %v2099_v20  ;;  %v397_v46 = vpack.c.b16 %v188_v12, %v381_v13 }
  0x98   :  { %v490_v26 = vpack.c.b16 %v474_v44, %v378_v58  ;;  %v394_v28 = vpack.c.b16 %v182_v15, %v378_v58  ;;  %v1088_v15 = vsel %vm1055_vm1, %v1652_v61, %v340_v4  ;;  %v398_v58 = vpack.c.b16 %v190_v57, %v382_v42 }
  0x99   :  { %v489_v45 = vpack.c.b16 %v473_v36, %v377_v50  ;;  %v413_v7 = vrot.slane %v397_v46, 1 }
  0x9a   :  { %v584_v33 = vshrl.u32 %v490_v26, 16  ;;  %v410_v4 = vrot.slane %v394_v28, 1  ;;  %v414_v32 = vrot.slane %v398_v58, 1 }
  0x9b   :  { %v576_v31 = vshrl.u32 %v489_v45, 16  ;;  %v579_v18 = vshll.u32 %v489_v45, 16 }
  0x9c   :  { %937 = vrot.lane.b32.xlu2 %v846_v59, %s1510_s26  ;;  %v996_v59 = vpack.c.b16 %v772_v54, %v980_v22  ;;  %v586_v55 = vrot.slane %v584_v33, 1  ;;  %v493_v22 = vpack.c.b16 %v477_v9, %v381_v13  ;;  %v2189_v33 = vld [vmem:[%s2663_s0 + $0x74] sm:$0x7] }
  0x9d   :  { %935 = vrot.lane.b32.xlu1 %v838_v16, %s1510_s26  ;;  %929 = vrot.lane.b32.xlu0 %v814_v19, %s1510_s26  ;;  %v587_v19 = vshll.u32 %v490_v26, 16  ;;  %v578_v20 = vrot.slane %v576_v31, 1  ;;  %v1067_v26 = vsel %vm1055_vm1, %v1576_v14, %v2036_v38  ;;  %v1498_v31 = vld [vmem:[%s2663_s0 + $0x28] sm:$0xf]  ;;  %v781_v58 = vunpack.c.l.b16 %v2189_v33 }
  0x9e   :  { %v430_v6 = vpop.permute.xlu2 %429  ;;  %v1012_v0 = vrot.slane %v996_v59, 3  ;;  %v611_v23 = vshll.u32 %v493_v22, 16 }
  0x9f   :  { %v2102_v47 = vsel %vm1104_vm0, %v1079_v34, %v430_v6  ;;  %v2104_v3 = vpop.permute.xlu1 %345  ;;  %v2106_v60 = vpop.permute.xlu0 %343  ;;  %v589_v27 = vrot.slane %v587_v19, 2  ;;  %v2155_v34 = vld [vmem:[%s2663_s0 + $0x50] sm:$0xc]  ;;  %v494_v6 = vpack.c.b16 %v478_v37, %v382_v42 }
  0xa0   :  { %v681_v41 = vunpack.c.l.b16 %v2155_v34  ;;  %v1076_v34 = vsel %vm1055_vm1, %v1631_v49, %v2053_v40 }
  0xa1   :  { %v590_v45 = vor.u32 %v589_v27, %v586_v55  ;;  %v90_v55 = vld [vmem:[%s2663_s0 + $0x58] sm:$0xc]  ;;  %v2214_v27 = vld [vmem:[%s2663_s0 + $0x54] sm:$0x7] }
  0xa2   :  { %v777_v49 = vunpack.c.l.b16 %v2214_v27 }
  0xa4   :  { %1031 = vrot.lane.b32.xlu2 %v1011_v30, %s1511_s13  ;;  %v581_v30 = vrot.slane %v579_v18, 2  ;;  %v1073_v18 = vsel %vm1055_vm1, %v1498_v31, %v1952_v53  ;;  %v782_v31 = vunpack.c.l.b16 %v2247_v51 }
  0xa5   :  { %1025 = vrot.lane.b32.xlu1 %v1008_v39, %s1511_s13  ;;  %1023 = vrot.lane.b32.xlu0 %v1007_v17, %s1511_s13  ;;  %v1497_v17 = vld [vmem:[%s2663_s0 + $0x10] sm:$0xf] }
  0xa6   :  { %v436_v12 = vpop.permute.xlu2 %435  ;;  %v1064_v46 = vsel %vm1055_vm1, %v1497_v17, %v2003_v5  ;;  %v608_v5 = vshrl.u32 %v493_v22, 16 }
  0xa7   :  { %v2142_v50 = vsel %vm1104_vm0, %v1088_v15, %v436_v12  ;;  %v416_v54 = vpop.permute.xlu1 %415  ;;  %v2144_v16 = vpop.permute.xlu0 %349  ;;  %v619_v15 = vshll.u32 %v494_v6, 16  ;;  %v582_v12 = vor.u32 %v581_v30, %v578_v20 }
  0xa8   :  { %v2147_v61 = vsel %vm1104_vm0, %v1058_v56, %v416_v54  ;;  %v616_v56 = vshrl.u32 %v494_v6, 16  ;;  %v697_v54 = vpack.c.b16 %v473_v36, %v681_v41  ;;  %v610_v19 = vrot.slane %v608_v5, 1 }
  0xa9   :  { %v621_v38 = vrot.slane %v619_v15, 2  ;;  %v613_v36 = vrot.slane %v611_v23, 2  ;;  %v793_v5 = vpack.c.b16 %v777_v49, %v681_v41  ;;  %v1275_v41 = vld [vmem:[%s2664_s1 + $0x18] sm:$0xf] }
  0xaa   :  { %v618_v14 = vrot.slane %v616_v56, 1  ;;  %v713_v30 = vrot.slane %v697_v54, 2 }
  0xac   :  { %443 = vrot.lane.b32.xlu2 %v413_v7, %s1507_s7  ;;  %v2184_v7 = vld [vmem:[%s2663_s0 + $0x78] sm:$0xc] }
  0xad   :  { %437 = vrot.lane.b32.xlu1 %v410_v4, %s1507_s7  ;;  %1033 = vrot.lane.b32.xlu0 %v1012_v0, %s1511_s13  ;;  %v93_v4 = vld [vmem:[%s2663_s0 + $0x70] sm:$0xc]  ;;  %v2199_v0 = vld [vmem:[%s2663_s0 + $0x5c] sm:$0x7]  ;;  %v686_v53 = vunpack.c.l.b16 %v2184_v7 }
  0xae   :  { %v2163_v39 = vpop.permute.xlu2 %639 }
  0xaf   :  { %v422_v28 = vpop.permute.xlu1 %421  ;;  %v420_v59 = vpop.permute.xlu0 %419  ;;  %v702_v56 = vpack.c.b16 %v478_v37, %v686_v53 }
  0xb0   :  { %v2175_v57 = vsel %vm1104_vm0, %v1067_v26, %v422_v28  ;;  %v2178_v13 = vsel %vm1104_vm0, %v1064_v46, %v420_v59  ;;  %v685_v46 = vunpack.c.l.b16 %v93_v4  ;;  %v778_v26 = vunpack.c.l.b16 %v2199_v0  ;;  %v2305_v0 = vld [vmem:[%s2663_s0 + $0x34] sm:$0x3] }
  0xb1   :  { %v622_v28 = vor.u32 %v621_v38, %v618_v14  ;;  %v614_v59 = vor.u32 %v613_v36, %v610_v19  ;;  %v718_v38 = vrot.slane %v702_v56, 2  ;;  %v880_v36 = vshrl.u32 %v793_v5, 16 }
  0xb2   :  { %v797_v40 = vpack.c.b16 %v781_v58, %v685_v46  ;;  %v701_v15 = vpack.c.b16 %v477_v9, %v685_v46  ;;  %v883_v4 = vshll.u32 %v793_v5, 16  ;;  %v798_v56 = vpack.c.b16 %v782_v31, %v686_v53 }
  0xb4   :  { %645 = vrot.lane.b32.xlu2 %v590_v45, %s1508_s5  ;;  %v682_v45 = vunpack.c.l.b16 %v90_v55  ;;  %v912_v54 = vshrl.u32 %v797_v40, 16  ;;  %v915_v14 = vshll.u32 %v797_v40, 16  ;;  %v717_v7 = vrot.slane %v701_v15, 2  ;;  %v121_v40 = vld [vmem:[%s2663_s0 + $0x50] sm:$0x8] }
  0xb5   :  { %643 = vrot.lane.b32.xlu1 %v582_v12, %s1508_s5  ;;  %445 = vrot.lane.b32.xlu0 %v414_v32, %s1507_s7 }
  0xb6   :  { %v2206_v42 = vpop.permute.xlu2 %649  ;;  %v794_v12 = vpack.c.b16 %v778_v26, %v682_v45  ;;  %v698_v32 = vpack.c.b16 %v474_v44, %v682_v45  ;;  %v914_v55 = vrot.slane %v912_v54, 2  ;;  %v122_v45 = vld [vmem:[%s2663_s0 + $0x58] sm:$0x8] }
  0xb7   :  { %v428_v6 = vpop.permute.xlu1 %427  ;;  %v426_v20 = vpop.permute.xlu0 %425 }
  0xb8   :  { %v2222_v22 = vsel %vm1104_vm0, %v1076_v34, %v428_v6  ;;  %v2225_v17 = vsel %vm1104_vm0, %v1073_v18, %v426_v20  ;;  %v888_v11 = vshrl.u32 %v794_v12, 16  ;;  %v891_v44 = vshll.u32 %v794_v12, 16 }
  0xb9   :  { %v714_v19 = vrot.slane %v698_v32, 2  ;;  %v1333_v18 = vunpack.c.l.b16 %v1275_v41  ;;  %v917_v34 = vrot.slane %v915_v14, 3  ;;  %v920_v41 = vshrl.u32 %v798_v56, 16 }
  0xba   :  { %v890_v6 = vrot.slane %v888_v11, 2  ;;  %v893_v20 = vrot.slane %v891_v44, 3  ;;  %v1477_v11 = vld [vmem:[%s2664_s1 + $0x10] sm:$0xff] }
  0xbb   :  { %v1337_v46 = vpack.c.b16 %v1333_v18, %v1333_v18  ;;  %v918_v14 = vor.u32 %v917_v34, %v914_v55  ;;  %v1476_v55 = vld [vmem:[%s2664_s1 + $0x8] sm:$0xff]  ;;  %v922_v29 = vrot.slane %v920_v41, 2  ;;  %v2300_v34 = vld [vmem:[%s2663_s0 + $0x3c] sm:$0x3] }
  0xbc   :  { %739 = vrot.lane.b32.xlu2 %v713_v30, %s1509_s22  ;;  %v2261_v30 = vld [vmem:[%s2663_s0 + $0x14] sm:$0x3]  ;;  %v894_v53 = vor.u32 %v893_v20, %v890_v6  ;;  %v2318_v6 = vld [vmem:[%s2663_s0 + $0x1c] sm:$0x3] }
  0xbd   :  { %653 = vrot.lane.b32.xlu1 %v622_v28, %s1508_s5  ;;  %651 = vrot.lane.b32.xlu0 %v614_v59, %s1508_s5  ;;  %v882_v28 = vrot.slane %v880_v36, 2  ;;  %v885_v59 = vrot.slane %v883_v4, 3  ;;  %v1368_v12 = vsel %vm1366_vm2, %v1337_v46, 0  ;;  %v465_v54 = vunpack.c.l.b16 %v2261_v30 }
  0xbe   :  { %v2242_v23 = vpop.permute.xlu2 %743  ;;  %1479 = vmatpush.bf16.msra.mxu2 %v1368_v12  ;;  %1480 = vmatpush.bf16.msra.mxu3 %v1368_v12 }
  0xbf   :  { %v2249_v37 = vpop.permute.xlu1 %433  ;;  %v2251_v9 = vpop.permute.xlu0 %431  ;;  %1374 = vmatpush.bf16.msra.mxu0 %v1368_v12  ;;  %1478 = vmatpush.bf16.msra.mxu1 %v1368_v12  ;;  %v886_v44 = vor.u32 %v885_v59, %v882_v28  ;;  %v481_v36 = vpack.c.b16 %v465_v54, %v369_v52  ;;  %v469_v12 = vunpack.c.l.b16 %v2305_v0 }
  0xc1   :  { %v512_v28 = vshrl.u32 %v481_v36, 16  ;;  %v515_v59 = vshll.u32 %v481_v36, 16  ;;  %v485_v36 = vpack.c.b16 %v469_v12, %v373_v2 }
  0xc2   :  { %1482 = vmatpush.bf16.msra.mxu2 %v1477_v11  ;;  %1483 = vmatpush.bf16.msra.mxu3 %v1477_v11 }
  0xc3   :  { %1375 = vmatpush.bf16.msra.mxu0 %v1477_v11  ;;  %1481 = vmatpush.bf16.msra.mxu1 %v1477_v11  ;;  %v517_v41 = vrot.slane %v515_v59, 2  ;;  %v544_v51 = vshrl.u32 %v485_v36, 16 }
  0xc4   :  { %749 = vrot.lane.b32.xlu2 %v718_v38, %s1509_s22  ;;  %v986_v38 = vunpack.c.l.b16 %v122_v45 }
  0xc5   :  { %747 = vrot.lane.b32.xlu1 %v717_v7, %s1509_s22  ;;  %741 = vrot.lane.b32.xlu0 %v714_v19, %s1509_s22  ;;  %v985_v7 = vunpack.c.l.b16 %v121_v40  ;;  %v923_v19 = vshll.u32 %v798_v56, 16  ;;  %v470_v56 = vunpack.c.l.b16 %v2300_v34  ;;  %v546_v59 = vrot.slane %v544_v51, 1 }
  0xc6   :  { %v2273_v15 = vpop.permute.xlu2 %945  ;;  %v1002_v4 = vpack.c.b16 %v778_v26, %v986_v38  ;;  %v126_v26 = vld [vmem:[%s2663_s0 + $0x78] sm:$0x8]  ;;  %1485 = vmatpush.bf16.msra.mxu2 %v1476_v55  ;;  %1486 = vmatpush.bf16.msra.mxu3 %v1476_v55 }
  0xc7   :  { %v2275_v32 = vpop.permute.xlu1 %441  ;;  %v2277_v5 = vpop.permute.xlu0 %439  ;;  %v1001_v18 = vpack.c.b16 %v777_v49, %v985_v7  ;;  %v925_v52 = vrot.slane %v923_v19, 3  ;;  %v125_v49 = vld [vmem:[%s2663_s0 + $0x70] sm:$0x8]  ;;  %1376 = vmatpush.bf16.msra.mxu0 %v1476_v55  ;;  %v990_v7 = vunpack.c.l.b16 %v126_v26  ;;  %1484 = vmatpush.bf16.msra.mxu1 %v1476_v55  ;;  %v486_v19 = vpack.c.b16 %v470_v56, %v374_v24 }
  0xc8   :  { %v1018_v45 = vrot.slane %v1002_v4, 3  ;;  %v989_v11 = vunpack.c.l.b16 %v125_v49 }
  0xc9   :  { %v1017_v40 = vrot.slane %v1001_v18, 3  ;;  %v926_v38 = vor.u32 %v925_v52, %v922_v29  ;;  %v1006_v4 = vpack.c.b16 %v782_v31, %v990_v7  ;;  %v552_v29 = vshrl.u32 %v486_v19, 16  ;;  %v82_v7 = vld [vmem:[%s2663_s0 + $0x18] sm:$0xc] }
  0xca   :  { %v1005_v18 = vpack.c.b16 %v781_v58, %v989_v11  ;;  %v555_v52 = vshll.u32 %v486_v19, 16  ;;  %v547_v31 = vshll.u32 %v485_v36, 16  ;;  %v769_v11 = vunpack.c.l.b16 %v2358_v21  ;;  %v117_v21 = vld [vmem:[%s2663_s0 + $0x30] sm:$0x8] }
  0xcb   :  { %v1022_v26 = vrot.slane %v1006_v4, 3 }
  0xcc   :  { %955 = vrot.lane.b32.xlu2 %v918_v14, %s1510_s26  ;;  %v1475_v14 = vld [vmem:[%s2664_s1] sm:$0xff]  ;;  %v1021_v33 = vrot.slane %v1005_v18, 3  ;;  %v85_v18 = vld [vmem:[%s2663_s0 + $0x30] sm:$0xc] }
  0xcd   :  { %949 = vrot.lane.b32.xlu1 %v894_v53, %s1510_s26  ;;  %947 = vrot.lane.b32.xlu0 %v886_v44, %s1510_s26  ;;  %v466_v53 = vunpack.c.l.b16 %v2318_v6  ;;  %v514_v44 = vrot.slane %v512_v28, 1  ;;  %v557_v28 = vrot.slane %v555_v52, 2 }
  0xce   :  { %v2307_v27 = vpop.permute.xlu2 %1039  ;;  %1488 = vmatpush.bf16.msra.mxu2 %v1475_v14  ;;  %1489 = vmatpush.bf16.msra.mxu3 %v1475_v14 }
  0xcf   :  { %v2320_v20 = vpop.permute.xlu1 %647  ;;  %v2322_v46 = vpop.permute.xlu0 %641  ;;  %1377 = vmatpush.bf16.msra.mxu0 %v1475_v14  ;;  %v482_v62 = vpack.c.b16 %v466_v53, %v370_v48  ;;  %1487 = vmatpush.bf16.msra.mxu1 %v1475_v14  ;;  %v518_v55 = vor.u32 %v517_v41, %v514_v44  ;;  %v554_v48 = vrot.slane %v552_v29, 1  ;;  %v2373_v44 = vld [vmem:[%s2663_s0 + $0x1c] sm:$0x7] }
  0xd0   :  { %v770_v29 = vunpack.c.l.b16 %v2373_v44 }
  0xd1   :  { %v520_v58 = vshrl.u32 %v482_v62, 16  ;;  %v523_v49 = vshll.u32 %v482_v62, 16  ;;  %v558_v62 = vor.u32 %v557_v28, %v554_v48  ;;  %v1501_v48 = vld [vmem:[%s2663_s0 + $0x68] sm:$0xf] }
  0xd2   :  { %v1097_v28 = vsel %vm1055_vm1, %v1501_v48, %v2104_v3  ;;  %v2411_v3 = vld [vmem:[%s2663_s0 + $0x3c] sm:$0x7] }
  0xd3   :  { %v522_v14 = vrot.slane %v520_v58, 1  ;;  %v1500_v58 = vld [vmem:[%s2663_s0 + $0x48] sm:$0xf] }
  0xd4   :  { %1045 = vrot.lane.b32.xlu2 %v1018_v45, %s1511_s13  ;;  %v549_v45 = vrot.slane %v547_v31, 2 }
  0xd5   :  { %1043 = vrot.lane.b32.xlu1 %v1017_v40, %s1511_s13  ;;  %957 = vrot.lane.b32.xlu0 %v926_v38, %s1510_s26  ;;  %v81_v40 = vld [vmem:[%s2663_s0 + $0x10] sm:$0xc]  ;;  %v525_v38 = vrot.slane %v523_v49, 2  ;;  %v1085_v49 = vsel %vm1055_vm1, %v1500_v58, %v2073_v10 }
  0xd6   :  { %v2349_v1 = vpop.permute.xlu2 %1049  ;;  %v673_v4 = vunpack.c.l.b16 %v81_v40  ;;  %v550_v52 = vor.u32 %v549_v45, %v546_v59  ;;  %v86_v59 = vld [vmem:[%s2663_s0 + $0x38] sm:$0xc]  ;;  %v677_v45 = vunpack.c.l.b16 %v85_v18 }
  0xd7   :  { %v2351_v24 = vpop.permute.xlu1 %737  ;;  %v2353_v2 = vpop.permute.xlu0 %735  ;;  %v526_v51 = vor.u32 %v525_v38, %v522_v14  ;;  %v1132_v14 = vsel %vm1104_vm0, %v1097_v28, %v2275_v32  ;;  %v678_v18 = vunpack.c.l.b16 %v86_v59 }
  0xd8   :  { %v785_v31 = vpack.c.b16 %v769_v11, %v673_v4  ;;  %v689_v32 = vpack.c.b16 %v465_v54, %v673_v4  ;;  %v1165_v30 = vsel %vm1137_vm3, %v1132_v14, %v2206_v42 }
  0xda   :  { %v816_v6 = vshrl.u32 %v785_v31, 16  ;;  %v705_v58 = vrot.slane %v689_v32, 2 }
  0xdc   :  { %627 = vrot.lane.b32.xlu2 %v518_v55, %s1508_s5  ;;  %v674_v55 = vunpack.c.l.b16 %v82_v7 }
  0xdd   :  { %1053 = vrot.lane.b32.xlu1 %v1022_v26, %s1511_s13  ;;  %1051 = vrot.lane.b32.xlu0 %v1021_v33, %s1511_s13  ;;  %v1499_v26 = vld [vmem:[%s2663_s0 + $0x40] sm:$0xf] }
  0xde   :  { %v2375_v41 = vpop.permute.xlu2 %631  ;;  %v1082_v33 = vsel %vm1055_vm1, %v1499_v26, %v1977_v25  ;;  %v1502_v25 = vld [vmem:[%s2663_s0 + $0x60] sm:$0xf]  ;;  %v690_v38 = vpack.c.b16 %v466_v53, %v674_v55  ;;  %v786_v7 = vpack.c.b16 %v770_v29, %v674_v55  ;;  %v819_v53 = vshll.u32 %v785_v31, 16 }
  0xdf   :  { %v944_v19 = vpop.permute.xlu1 %943  ;;  %v746_v36 = vpop.permute.xlu0 %745  ;;  %v1094_v40 = vsel %vm1055_vm1, %v1502_v25, %v2106_v60  ;;  %v1122_v10 = vsel %vm1104_vm0, %v1082_v33, %v2251_v9  ;;  %v2421_v60 = vld [vmem:[%s2663_s0 + $0x34] sm:$0x7]  ;;  %v693_v9 = vpack.c.b16 %v469_v12, %v677_v45  ;;  %v774_v12 = vunpack.c.l.b16 %v2411_v3 }
  0xe0   :  { %v1130_v55 = vsel %vm1104_vm0, %v1094_v40, %v2277_v5  ;;  %v824_v26 = vshrl.u32 %v786_v7, 16  ;;  %v827_v33 = vshll.u32 %v786_v7, 16  ;;  %v821_v48 = vrot.slane %v819_v53, 3 }
  0xe1   :  { %v709_v31 = vrot.slane %v693_v9, 2  ;;  %v694_v5 = vpack.c.b16 %v470_v56, %v678_v18  ;;  %v1198_v28 = vsel %vm1170_vm4, %v1165_v30, %v746_v36  ;;  %v790_v59 = vpack.c.b16 %v774_v12, %v678_v18 }
  0xe2   :  { %v826_v56 = vrot.slane %v824_v26, 2 }
  0xe3   :  { %v856_v9 = vshrl.u32 %v790_v59, 16 }
  0xe4   :  { %637 = vrot.lane.b32.xlu2 %v558_v62, %s1508_s5  ;;  %v1124_v62 = vsel %vm1104_vm0, %v1085_v49, %v2249_v37  ;;  %v706_v37 = vrot.slane %v690_v38, 2  ;;  %v818_v49 = vrot.slane %v816_v6, 2 }
  0xe5   :  { %635 = vrot.lane.b32.xlu1 %v550_v52, %s1508_s5  ;;  %629 = vrot.lane.b32.xlu0 %v526_v51, %s1508_s5  ;;  %v1155_v52 = vsel %vm1137_vm3, %v1122_v10, %v2163_v39  ;;  %v773_v51 = vunpack.c.l.b16 %v2421_v60  ;;  %v1163_v39 = vsel %vm1137_vm3, %v1130_v55, %v2320_v20  ;;  %v1157_v25 = vsel %vm1137_vm3, %v1124_v62, %v2322_v46 }
  0xe6   :  { %v2433_v0 = vpop.permute.xlu2 %721  ;;  %v1188_v42 = vsel %vm1170_vm4, %v1155_v52, %v2353_v2  ;;  %v1190_v20 = vsel %vm1170_vm4, %v1157_v25, %v2351_v24  ;;  %v829_v2 = vrot.slane %v827_v33, 3  ;;  %v1196_v36 = vsel %vm1170_vm4, %v1163_v39, %v2242_v23 }
  0xe7   :  { %v954_v54 = vpop.permute.xlu1 %953  ;;  %v952_v4 = vpop.permute.xlu0 %951  ;;  %v1221_v40 = vsel %vm1203_vm5, %v1188_v42, %v944_v19  ;;  %v789_v34 = vpack.c.b16 %v773_v51, %v677_v45  ;;  %v822_v46 = vor.u32 %v821_v48, %v818_v49  ;;  %v710_v19 = vrot.slane %v694_v5, 2  ;;  %v113_v45 = vld [vmem:[%s2663_s0 + $0x10] sm:$0x8]  ;;  %v118_v5 = vld [vmem:[%s2663_s0 + $0x38] sm:$0x8] }
  0xe8   :  { %v1231_v10 = vsel %vm1203_vm5, %v1198_v28, %v954_v54  ;;  %v1254_v24 = vsel %vm1236_vm6, %v1221_v40, %v2307_v27  ;;  %v859_v23 = vshll.u32 %v790_v59, 16  ;;  %v1229_v7 = vsel %vm1203_vm5, %v1196_v36, %v952_v4 }
  0xe9   :  { %v1264_v14 = vsel %vm1236_vm6, %v1231_v10, %v2349_v1  ;;  %v1223_v6 = vsel %vm1203_vm5, %v1190_v20, %v2273_v15  ;;  %v848_v18 = vshrl.u32 %v789_v34, 16  ;;  %v851_v62 = vshll.u32 %v789_v34, 16 }
  0xea   :  { %v830_v52 = vor.u32 %v829_v2, %v826_v56  ;;  %v977_v30 = vunpack.c.l.b16 %v113_v45  ;;  %v1304_v1 = vunpack.c.l.b16 %v1254_v24  ;;  %v1309_v54 = vunpack.c.l.b16 %v1264_v14 }
  0xeb   :  { %v858_v33 = vrot.slane %v856_v9, 2  ;;  %v850_v49 = vrot.slane %v848_v18, 2  ;;  %v853_v48 = vrot.slane %v851_v62, 3  ;;  %v982_v25 = vunpack.c.l.b16 %v118_v5 }
  0xec   :  { %731 = vrot.lane.b32.xlu2 %v709_v31, %s1509_s22  ;;  %v993_v15 = vpack.c.b16 %v769_v11, %v977_v30  ;;  %v114_v11 = vld [vmem:[%s2663_s0 + $0x18] sm:$0x8]  ;;  %v981_v34 = vunpack.c.l.b16 %v117_v21 }
  0xed   :  { %725 = vrot.lane.b32.xlu1 %v706_v37, %s1509_s22  ;;  %723 = vrot.lane.b32.xlu0 %v705_v58, %s1509_s22  ;;  %v861_v58 = vrot.slane %v859_v23, 3  ;;  %v854_v10 = vor.u32 %v853_v48, %v850_v49  ;;  %v978_v20 = vunpack.c.l.b16 %v114_v11  ;;  %v998_v56 = vpack.c.b16 %v774_v12, %v982_v25 }
  0xee   :  { %v2472_v38 = vpop.permute.xlu2 %927  ;;  %v1009_v59 = vrot.slane %v993_v15, 3  ;;  %v997_v2 = vpack.c.b16 %v773_v51, %v981_v34 }
  0xef   :  { %v1048_v32 = vpop.permute.xlu1 %1047  ;;  %v1042_v53 = vpop.permute.xlu0 %1041  ;;  %v862_v40 = vor.u32 %v861_v58, %v858_v33  ;;  %v994_v36 = vpack.c.b16 %v770_v29, %v978_v20  ;;  %v1014_v24 = vrot.slane %v998_v56, 3 }
  0xf0   :  { %v1262_v55 = vsel %vm1236_vm6, %v1229_v7, %v1048_v32  ;;  %v1256_v27 = vsel %vm1236_vm6, %v1223_v6, %v1042_v53  ;;  %v1013_v14 = vrot.slane %v997_v2, 3 }
  0xf1   :  { %v1308_v37 = vunpack.c.l.b16 %v1262_v55  ;;  %v1305_v31 = vunpack.c.l.b16 %v1256_v27  ;;  %v1010_v9 = vrot.slane %v994_v36, 3 }
  0xf3   :  { %v1316_v26 = vpack.c.b16 %v1305_v31, %v1304_v1  ;;  %v1318_v4 = vpack.c.b16 %v1309_v54, %v1308_v37 }
  0xf4   :  { %933 = vrot.lane.b32.xlu2 %v830_v52, %s1510_s26 }
  0xf5   :  { %931 = vrot.lane.b32.xlu1 %v822_v46, %s1510_s26  ;;  %733 = vrot.lane.b32.xlu0 %v710_v19, %s1509_s22 }
  0xf6   :  { %1471 = vmatmul.msk.bf16.vlgmr.msra.gmra.mxu2 %vm1341_vm7, %v1316_v26  ;;  %1473 = vmatmul.msk.bf16.vlgmr.msra.gmra.mxu3 %vm1341_vm7, %v1318_v4  ;;  %v938_v39 = vpop.permute.xlu2 %937 }
  0xf7   :  { %v626_v42 = vpop.permute.xlu1 %625  ;;  %v624_v28 = vpop.permute.xlu0 %623 }
  0xf8   :  { %v1141_v29 = vsel %vm1137_vm3, %v2051_v8, %v626_v42  ;;  %v1139_v7 = vsel %vm1137_vm3, %v2147_v61, %v624_v28  ;;  %v1147_v8 = vsel %vm1137_vm3, %v2071_v43, %v2375_v41 }
  0xf9   :  { %v1174_v6 = vsel %vm1170_vm4, %v1141_v29, %v2433_v0 }
  0xfc   :  { %1027 = vrot.lane.b32.xlu2 %v1009_v59, %s1511_s13 }
  0xfd   :  { %941 = vrot.lane.b32.xlu1 %v862_v40, %s1510_s26  ;;  %939 = vrot.lane.b32.xlu0 %v854_v10, %s1510_s26 }
  0xfe   :  { %v1032_v46 = vpop.permute.xlu2 %1031 }
  0xff   :  { %v720_v19 = vpop.permute.xlu1 %719  ;;  %v634_v45 = vpop.permute.xlu0 %633 }
 0x100   :  { %v1172_v32 = vsel %vm1170_vm4, %v1139_v7, %v720_v19  ;;  %v1149_v54 = vsel %vm1137_vm3, %v2225_v17, %v634_v45 }
 0x101   :  { %v1205_v62 = vsel %vm1203_vm5, %v1172_v32, %v2472_v38 }
 0x104   :  { %1037 = vrot.lane.b32.xlu2 %v1014_v24, %s1511_s13 }
 0x105   :  { %1035 = vrot.lane.b32.xlu1 %v1013_v14, %s1511_s13  ;;  %1029 = vrot.lane.b32.xlu0 %v1010_v9, %s1511_s13 }
 0x106   :  { %v2507_v3 = vpop.permute.xlu2 %443 }
 0x107   :  { %v730_v12 = vpop.permute.xlu1 %729  ;;  %v728_v60 = vpop.permute.xlu0 %727 }
 0x108   :  { %v1180_v1 = vsel %vm1170_vm4, %v1147_v8, %v728_v60  ;;  %v1182_v31 = vsel %vm1170_vm4, %v1149_v54, %v730_v12  ;;  %v1504_v60 = vld [vmem:[%s2663_s0 + $0x70] sm:$0xf] }
 0x109   :  { %v1215_v43 = vsel %vm1203_vm5, %v1182_v31, %v938_v39  ;;  %v1503_v39 = vld [vmem:[%s2663_s0 + $0x58] sm:$0xf] }
 0x10a   :  { %v1091_v40 = vsel %vm1055_vm1, %v1503_v39, %v1998_v35 }
 0x10e   :  { %v646_v44 = vpop.permute.xlu2 %645 }
 0x10f   :  { %v936_v51 = vpop.permute.xlu1 %935  ;;  %v930_v23 = vpop.permute.xlu0 %929 }
 0x110   :  { %v1207_v53 = vsel %vm1203_vm5, %v1174_v6, %v930_v23  ;;  %v1213_v37 = vsel %vm1203_vm5, %v1180_v1, %v936_v51  ;;  %v1100_v51 = vsel %vm1055_vm1, %v1504_v60, %v2024_v63 }
 0x111   :  { %v1246_v26 = vsel %vm1236_vm6, %v1213_v37, %v1032_v46  ;;  %v1134_v7 = vsel %vm1104_vm0, %v1100_v51, %v2507_v3 }
 0x112   :  { %v1300_v33 = vunpack.c.l.b16 %v1246_v26 }
 0x116   :  { %v740_v0 = vpop.permute.xlu2 %739 }
 0x117   :  { %v1026_v18 = vpop.permute.xlu1 %1025  ;;  %v1024_v55 = vpop.permute.xlu0 %1023 }
 0x118   :  { %v1240_v27 = vsel %vm1236_vm6, %v1207_v53, %v1026_v18  ;;  %v1238_v52 = vsel %vm1236_vm6, %v1205_v62, %v1024_v55 }
 0x119   :  { %v1297_v61 = vunpack.c.l.b16 %v1240_v27  ;;  %v1296_v30 = vunpack.c.l.b16 %v1238_v52 }
 0x11b   :  { %v1312_v38 = vpack.c.b16 %v1297_v61, %v1296_v30 }
 0x11d   :  { %1467 = vmatmul.msk.bf16.vlgmr.msra.gmra.mxu0 %vm1341_vm7, %v1312_v38 }
 0x11e   :  { %v750_v48 = vpop.permute.xlu2 %749 }
 0x11f   :  { %v438_v4 = vpop.permute.xlu1 %437  ;;  %v1034_v41 = vpop.permute.xlu0 %1033 }
 0x120   :  { %v1248_v15 = vsel %vm1236_vm6, %v1215_v43, %v1034_v41  ;;  %v1128_v10 = vsel %vm1104_vm0, %v1091_v40, %v438_v4 }
 0x121   :  { %v1301_v58 = vunpack.c.l.b16 %v1248_v15  ;;  %v1161_v56 = vsel %vm1137_vm3, %v1128_v10, %v646_v44 }
 0x123   :  { %v1314_v49 = vpack.c.b16 %v1301_v58, %v1300_v33 }
 0x125   :  { %1469 = vmatmul.msk.bf16.vlgmr.msra.gmra.mxu1 %vm1341_vm7, %v1314_v49 }
 0x126   :  { %v956_v21 = vpop.permute.xlu2 %955 }
 0x127   :  { %v644_v17 = vpop.permute.xlu1 %643  ;;  %v446_v5 = vpop.permute.xlu0 %445 }
 0x128   :  { %v1159_v46 = vsel %vm1137_vm3, %v2142_v50, %v644_v17  ;;  %v1505_v50 = vld [vmem:[%s2663_s0 + $0x78] sm:$0xf] }
 0x129   :  { %v1192_v24 = vsel %vm1170_vm4, %v1159_v46, %v740_v0  ;;  %v1103_v23 = vsel %vm1055_vm1, %v1505_v50, %v2144_v16 }
 0x12a   :  { %v1136_v32 = vsel %vm1104_vm0, %v1103_v23, %v446_v5 }
 0x12e   :  { %v1046_v25 = vpop.permute.xlu2 %1045 }
 0x12f   :  { %v654_v11 = vpop.permute.xlu1 %653  ;;  %v652_v42 = vpop.permute.xlu0 %651 }
 0x130   :  { %v1169_v6 = vsel %vm1137_vm3, %v1136_v32, %v654_v11  ;;  %v1167_v53 = vsel %vm1137_vm3, %v1134_v7, %v652_v42 }
 0x131   :  { %v1202_v55 = vsel %vm1170_vm4, %v1169_v6, %v750_v48 }
 0x136   :  { %v628_v2 = vpop.permute.xlu2 %627 }
 0x137   :  { %v748_v28 = vpop.permute.xlu1 %747  ;;  %v742_v59 = vpop.permute.xlu0 %741  ;;  %v1143_v49 = vsel %vm1137_vm3, %v2178_v13, %v628_v2 }
 0x138   :  { %v1194_v36 = vsel %vm1170_vm4, %v1161_v56, %v742_v59  ;;  %v1200_v63 = vsel %vm1170_vm4, %v1167_v53, %v748_v28 }
 0x139   :  { %v1233_v52 = vsel %vm1203_vm5, %v1200_v63, %v956_v21 }
 0x13e   :  { %v638_v62 = vpop.permute.xlu2 %637 }
 0x13f   :  { %v950_v34 = vpop.permute.xlu1 %949  ;;  %v948_v20 = vpop.permute.xlu0 %947  ;;  %v1153_v48 = vsel %vm1137_vm3, %v2102_v47, %v638_v62 }
 0x140   :  { %v1227_v19 = vsel %vm1203_vm5, %v1194_v36, %v950_v34  ;;  %v1225_v35 = vsel %vm1203_vm5, %v1192_v24, %v948_v20 }
 0x141   :  { %v1260_v45 = vsel %vm1236_vm6, %v1227_v19, %v1046_v25 }
 0x142   :  { %v1307_v44 = vunpack.c.l.b16 %v1260_v45 }
 0x146   :  { %v732_v54 = vpop.permute.xlu2 %731 }
 0x147   :  { %v1044_v14 = vpop.permute.xlu1 %1043  ;;  %v958_v9 = vpop.permute.xlu0 %957 }
 0x148   :  { %v1258_v12 = vsel %vm1236_vm6, %v1225_v35, %v1044_v14  ;;  %v1235_v16 = vsel %vm1203_vm5, %v1202_v55, %v958_v9 }
 0x149   :  { %v1306_v29 = vunpack.c.l.b16 %v1258_v12 }
 0x14b   :  { %v1317_v18 = vpack.c.b16 %v1307_v44, %v1306_v29 }
 0x14d   :  { %1472 = vmatmul.msk.bf16.gmra.mxu2 %vm1341_vm7, %v1317_v18 }
 0x14e   :  { %v934_v31 = vpop.permute.xlu2 %933 }
 0x14f   :  { %v1054_v27 = vpop.permute.xlu1 %1053  ;;  %v1052_v3 = vpop.permute.xlu0 %1051 }
 0x150   :  { %v1268_v8 = vsel %vm1236_vm6, %v1235_v16, %v1054_v27  ;;  %v1266_v61 = vsel %vm1236_vm6, %v1233_v52, %v1052_v3 }
 0x151   :  { %v1311_v30 = vunpack.c.l.b16 %v1268_v8  ;;  %v1310_v1 = vunpack.c.l.b16 %v1266_v61 }
 0x153   :  { %v1319_v0 = vpack.c.b16 %v1311_v30, %v1310_v1 }
 0x155   :  { %1474 = vmatmul.msk.bf16.gmra.mxu3 %vm1341_vm7, %v1319_v0 }
 0x156   :  { %v1028_v15 = vpop.permute.xlu2 %1027 }
 0x157   :  { %v636_v37 = vpop.permute.xlu1 %635  ;;  %v630_v38 = vpop.permute.xlu0 %629 }
 0x158   :  { %v1151_v21 = vsel %vm1137_vm3, %v2222_v22, %v636_v37  ;;  %v1145_v11 = vsel %vm1137_vm3, %v2175_v57, %v630_v38  ;;  %v2591_v22 = vld [vmem:[%s2665_s2] ss:$0 sm:$0xff] }
 0x159   :  { %v1184_v25 = vsel %vm1170_vm4, %v1151_v21, %v732_v54 }
 0x15e   :  { %v1038_v59 = vpop.permute.xlu2 %1037 }
 0x15f   :  { %v726_v26 = vpop.permute.xlu1 %725  ;;  %v724_v4 = vpop.permute.xlu0 %723 }
 0x160   :  { %v1176_v17 = vsel %vm1170_vm4, %v1143_v49, %v724_v4  ;;  %v1178_v13 = vsel %vm1170_vm4, %v1145_v11, %v726_v26 }
 0x161   :  { %v1211_v57 = vsel %vm1203_vm5, %v1178_v13, %v934_v31 }
 0x167   :  { %v932_v43 = vpop.permute.xlu1 %931  ;;  %v734_v41 = vpop.permute.xlu0 %733 }
 0x168   :  { %v1186_v5 = vsel %vm1170_vm4, %v1153_v48, %v734_v41  ;;  %v1209_v42 = vsel %vm1203_vm5, %v1176_v17, %v932_v43 }
 0x169   :  { %v1242_v47 = vsel %vm1236_vm6, %v1209_v42, %v1028_v15 }
 0x16a   :  { %v1298_v2 = vunpack.c.l.b16 %v1242_v47 }
 0x16f   :  { %v942_v33 = vpop.permute.xlu1 %941  ;;  %v940_v58 = vpop.permute.xlu0 %939 }
 0x170   :  { %v1219_v28 = vsel %vm1203_vm5, %v1186_v5, %v942_v33  ;;  %v1217_v40 = vsel %vm1203_vm5, %v1184_v25, %v940_v58 }
 0x171   :  { %v1252_v39 = vsel %vm1236_vm6, %v1219_v28, %v1038_v59 }
 0x172   :  { %v1303_v36 = vunpack.c.l.b16 %v1252_v39 }
 0x177   :  { %v1036_v10 = vpop.permute.xlu1 %1035  ;;  %v1030_v34 = vpop.permute.xlu0 %1029 }
 0x178   :  { %v1250_v20 = vsel %vm1236_vm6, %v1217_v40, %v1036_v10  ;;  %v1244_v56 = vsel %vm1236_vm6, %v1211_v57, %v1030_v34 }
 0x179   :  { %v1302_v46 = vunpack.c.l.b16 %v1250_v20  ;;  %v1299_v19 = vunpack.c.l.b16 %v1244_v56  ;;  %v1399_v45 = vpop.f32.mrf.mxu2  ;;  %v1409_v24 = vpop.f32.mrf.mxu3 }
 0x17a   :  { %v1400_v35 = vadd.f32 %v2591_v22, %v1399_v45  ;;  %v1410_v14 = vadd.f32 %v2591_v22, %v1409_v24 }
 0x17b   :  { %v1313_v9 = vpack.c.b16 %v1299_v19, %v1298_v2  ;;  %v1315_v12 = vpack.c.b16 %v1303_v36, %v1302_v46 }
 0x17c   :  { %v1427_v60 = vmax.f32 %v1400_v35, 0.0  ;;  %v1431_v51 = vmax.f32 %v1410_v14, 0.0 }
 0x17d   :  { %1468 = vmatmul.msk.bf16.gmra.mxu0 %vm1341_vm7, %v1313_v9  ;;  %1470 = vmatmul.msk.bf16.gmra.mxu1 %vm1341_vm7, %v1315_v12 }
 0x17e   :  { %1443 = vst [vmem:[%s2666_s3 + $0x40] sm:$0xff] %v1427_v60 }
 0x17f   :  { %1447 = vst [vmem:[%s2666_s3 + $0x60] sm:$0xff] %v1431_v51 }
 0x181   :  { %v1401_v50 = vpop.f32.mrf.mxu2  ;;  %v1411_v23 = vpop.f32.mrf.mxu3 }
 0x182   :  { %v1402_v44 = vadd.f32 %v2591_v22, %v1401_v50  ;;  %v1412_v29 = vadd.f32 %v2591_v22, %v1411_v23 }
 0x184   :  { %v1428_v7 = vmax.f32 %v1402_v44, 0.0  ;;  %v1432_v32 = vmax.f32 %v1412_v29, 0.0 }
 0x186   :  { %1444 = vst [vmem:[%s2666_s3 + $0x48] sm:$0xff] %v1428_v7 }
 0x187   :  { %1448 = vst [vmem:[%s2666_s3 + $0x68] sm:$0xff] %v1432_v32 }
 0x19a   :  { %v1379_v6 = vpop.f32.mrf.mxu0 }
 0x19b   :  { %v1380_v53 = vadd.f32 %v2591_v22, %v1379_v6 }
 0x19d   :  { %v1419_v18 = vmax.f32 %v1380_v53, 0.0 }
 0x19f   :  { %1435 = vst [vmem:[%s2666_s3] sm:$0xff] %v1419_v18 }
 0x1a2   :  { %v1381_v63 = vpop.f32.mrf.mxu0  ;;  %v1389_v62 = vpop.f32.mrf.mxu1 }
 0x1a3   :  { %v1382_v55 = vadd.f32 %v2591_v22, %v1381_v63  ;;  %v1390_v16 = vadd.f32 %v2591_v22, %v1389_v62 }
 0x1a5   :  { %v1420_v27 = vmax.f32 %v1382_v55, 0.0  ;;  %v1423_v52 = vmax.f32 %v1390_v16, 0.0 }
 0x1a7   :  { %1436 = vst [vmem:[%s2666_s3 + $0x8] sm:$0xff] %v1420_v27 }
 0x1a8   :  { %1439 = vst [vmem:[%s2666_s3 + $0x20] sm:$0xff] %v1423_v52 }
 0x1aa   :  { %v1391_v3 = vpop.f32.mrf.mxu1 }
 0x1ab   :  { %v1392_v8 = vadd.f32 %v2591_v22, %v1391_v3 }
 0x1ad   :  { %v1424_v61 = vmax.f32 %v1392_v8, 0.0 }
 0x1af   :  { %1440 = vst [vmem:[%s2666_s3 + $0x28] sm:$0xff] %v1424_v61 }
 0x1d0   :  { %v1404_v30 = vpop.f32.mrf.mxu2 }
 0x1d1   :  { %v1405_v1 = vadd.f32 %v2591_v22, %v1404_v30 }
 0x1d3   :  { %v1429_v0 = vmax.f32 %v1405_v1, 0.0 }
 0x1d5   :  { %1445 = vst [vmem:[%s2666_s3 + $0x50] sm:$0xff] %v1429_v0 }
 0x1d8   :  { %v1406_v54 = vpop.f32.mrf.mxu2  ;;  %v1414_v37 = vpop.f32.mrf.mxu3 }
 0x1d9   :  { %v1407_v38 = vadd.f32 %v2591_v22, %v1406_v54  ;;  %v1415_v31 = vadd.f32 %v2591_v22, %v1414_v37 }
 0x1db   :  { %v1430_v26 = vmax.f32 %v1407_v38, 0.0  ;;  %v1433_v4 = vmax.f32 %v1415_v31, 0.0 }
 0x1dd   :  { %1446 = vst [vmem:[%s2666_s3 + $0x58] sm:$0xff] %v1430_v26 }
 0x1de   :  { %1449 = vst [vmem:[%s2666_s3 + $0x70] sm:$0xff] %v1433_v4 }
 0x1e0   :  { %v1416_v43 = vpop.f32.mrf.mxu3 }
 0x1e1   :  { %v1417_v41 = vadd.f32 %v2591_v22, %v1416_v43 }
 0x1e3   :  { %v1434_v15 = vmax.f32 %v1417_v41, 0.0 }
 0x1e5   :  { %1450 = vst [vmem:[%s2666_s3 + $0x78] sm:$0xff] %v1434_v15 }
 0x1fa   :  { %v1384_v33 = vpop.f32.mrf.mxu0  ;;  %v1394_v58 = vpop.f32.mrf.mxu1 }
 0x1fb   :  { %v1385_v49 = vadd.f32 %v2591_v22, %v1384_v33  ;;  %v1395_v48 = vadd.f32 %v2591_v22, %v1394_v58 }
 0x1fd   :  { %v1421_v17 = vmax.f32 %v1385_v49, 0.0  ;;  %v1425_v5 = vmax.f32 %v1395_v48, 0.0 }
 0x1ff   :  { %1437 = vst [vmem:[%s2666_s3 + $0x10] sm:$0xff] %v1421_v17 }
 0x200   :  { %1441 = vst [vmem:[%s2666_s3 + $0x30] sm:$0xff] %v1425_v5 }
 0x202   :  { %v1386_v21 = vpop.f32.mrf.mxu0  ;;  %v1396_v11 = vpop.f32.mrf.mxu1 }
 0x203   :  { %v1387_v42 = vadd.f32 %v2591_v22, %v1386_v21  ;;  %v1397_v28 = vadd.f32 %v2591_v22, %v1396_v11 }
 0x205   :  { %v1422_v59 = vmax.f32 %v1387_v42, 0.0  ;;  %v1426_v13 = vmax.f32 %v1397_v28, 0.0 }
 0x207   :  { %1438 = vst [vmem:[%s2666_s3 + $0x18] sm:$0xff] %v1422_v59 }
 0x208   :  { %1442 = vst [vmem:[%s2666_s3 + $0x38] sm:$0xff] %v1426_v13 }

// kernel: inception_c_forward.20
= control target key start
LH: loop header
LB: loop body
LE: loop exit
PB: predicated region body
PF: predicated region fallthrough
CT: control target
= control target key end

     0   :  { %vm83_vm0 = vcmask 130048   ;;  %s340_s1 = inlined_call_operand.vmem [shape: bf16[16,128], index: 1, kind: input, shape index: {}]   ;;  %s341_s0 = inlined_call_operand.vmem [shape: bf16[128,16], index: 0, kind: input, shape index: {}]   ;;  %s342_s2 = inlined_call_operand.vmem [shape: f32[1,128], index: 2, kind: input, shape index: {}]   ;;  %s343_s3 = inlined_call_operand.vmem [shape: f32[128,128], index: 3, kind: output, shape index: {}]  }
   0x1   :  { %v229_v0 = vld [vmem:[%s340_s1] sm:$0xff]  ;;  %v223_v2 = vld [vmem:[%s341_s0 + $0x10] sm:$0xff]  ;;  %v222_v5 = vld [vmem:[%s341_s0 + $0x8] sm:$0xff] }
   0x2   :  { %v221_v1 = vld [vmem:[%s341_s0] sm:$0xff]  ;;  %115 = vmatpush.bf16.msra.mxu0 %v229_v0  ;;  %230 = vmatpush.bf16.msra.mxu1 %v229_v0  ;;  %v227_v4 = vld [vmem:[%s341_s0 + $0x30] sm:$0xff]  ;;  %v224_v6 = vld [vmem:[%s341_s0 + $0x18] sm:$0xff] }
   0x3   :  { %v225_v3 = vld [vmem:[%s341_s0 + $0x20] sm:$0xff]  ;;  %231 = vmatpush.bf16.msra.mxu2 %v229_v0  ;;  %232 = vmatpush.bf16.msra.mxu3 %v229_v0  ;;  %v226_v7 = vld [vmem:[%s341_s0 + $0x28] sm:$0xff]  ;;  %v228_v8 = vld [vmem:[%s341_s0 + $0x38] sm:$0xff] }
   0x4   :  { %v233_v9 = vld [vmem:[%s342_s2] ss:$0 sm:$0xff] }
   0x5   :  { %213 = vmatmul.msk.bf16.vlgmr.msra.gmra.mxu0 %vm83_vm0, %v221_v1  ;;  %215 = vmatmul.msk.bf16.vlgmr.msra.gmra.mxu1 %vm83_vm0, %v223_v2 }
   0x6   :  { %217 = vmatmul.msk.bf16.vlgmr.msra.gmra.mxu2 %vm83_vm0, %v225_v3  ;;  %219 = vmatmul.msk.bf16.vlgmr.msra.gmra.mxu3 %vm83_vm0, %v227_v4 }
  0x15   :  { %214 = vmatmul.msk.bf16.gmra.mxu0 %vm83_vm0, %v222_v5  ;;  %216 = vmatmul.msk.bf16.gmra.mxu1 %vm83_vm0, %v224_v6 }
  0x16   :  { %218 = vmatmul.msk.bf16.gmra.mxu2 %vm83_vm0, %v226_v7  ;;  %220 = vmatmul.msk.bf16.gmra.mxu3 %vm83_vm0, %v228_v8 }
  0x82   :  { %v117_v10 = vpop.f32.mrf.mxu0  ;;  %v127_v11 = vpop.f32.mrf.mxu1 }
  0x83   :  { %v118_v12 = vadd.f32 %v233_v9, %v117_v10  ;;  %v128_v13 = vadd.f32 %v233_v9, %v127_v11 }
  0x85   :  { %157 = vst [vmem:[%s343_s3] sm:$0xff] %v118_v12 }
  0x86   :  { %161 = vst [vmem:[%s343_s3 + $0x20] sm:$0xff] %v128_v13 }
  0x89   :  { %v137_v14 = vpop.f32.mrf.mxu2  ;;  %v147_v15 = vpop.f32.mrf.mxu3 }
  0x8a   :  { %v138_v16 = vadd.f32 %v233_v9, %v137_v14  ;;  %v148_v17 = vadd.f32 %v233_v9, %v147_v15  ;;  %v119_v18 = vpop.f32.mrf.mxu0  ;;  %v129_v19 = vpop.f32.mrf.mxu1 }
  0x8b   :  { %v120_v20 = vadd.f32 %v233_v9, %v119_v18  ;;  %v130_v21 = vadd.f32 %v233_v9, %v129_v19 }
  0x8c   :  { %165 = vst [vmem:[%s343_s3 + $0x40] sm:$0xff] %v138_v16 }
  0x8d   :  { %169 = vst [vmem:[%s343_s3 + $0x60] sm:$0xff] %v148_v17 }
  0x8e   :  { %158 = vst [vmem:[%s343_s3 + $0x8] sm:$0xff] %v120_v20 }
  0x8f   :  { %162 = vst [vmem:[%s343_s3 + $0x28] sm:$0xff] %v130_v21 }
  0x91   :  { %v139_v22 = vpop.f32.mrf.mxu2  ;;  %v149_v23 = vpop.f32.mrf.mxu3 }
  0x92   :  { %v140_v24 = vadd.f32 %v233_v9, %v139_v22  ;;  %v150_v25 = vadd.f32 %v233_v9, %v149_v23  ;;  %v122_v26 = vpop.f32.mrf.mxu0  ;;  %v132_v27 = vpop.f32.mrf.mxu1 }
  0x93   :  { %v123_v28 = vadd.f32 %v233_v9, %v122_v26  ;;  %v133_v29 = vadd.f32 %v233_v9, %v132_v27 }
  0x94   :  { %166 = vst [vmem:[%s343_s3 + $0x48] sm:$0xff] %v140_v24 }
  0x95   :  { %170 = vst [vmem:[%s343_s3 + $0x68] sm:$0xff] %v150_v25 }
  0x96   :  { %159 = vst [vmem:[%s343_s3 + $0x10] sm:$0xff] %v123_v28 }
  0x97   :  { %163 = vst [vmem:[%s343_s3 + $0x30] sm:$0xff] %v133_v29 }
  0x99   :  { %v142_v30 = vpop.f32.mrf.mxu2  ;;  %v152_v31 = vpop.f32.mrf.mxu3 }
  0x9a   :  { %v143_v32 = vadd.f32 %v233_v9, %v142_v30  ;;  %v153_v33 = vadd.f32 %v233_v9, %v152_v31  ;;  %v124_v34 = vpop.f32.mrf.mxu0  ;;  %v134_v35 = vpop.f32.mrf.mxu1 }
  0x9b   :  { %v125_v36 = vadd.f32 %v233_v9, %v124_v34  ;;  %v135_v37 = vadd.f32 %v233_v9, %v134_v35 }
  0x9c   :  { %167 = vst [vmem:[%s343_s3 + $0x50] sm:$0xff] %v143_v32 }
  0x9d   :  { %171 = vst [vmem:[%s343_s3 + $0x70] sm:$0xff] %v153_v33 }
  0x9e   :  { %160 = vst [vmem:[%s343_s3 + $0x18] sm:$0xff] %v125_v36 }
  0x9f   :  { %164 = vst [vmem:[%s343_s3 + $0x38] sm:$0xff] %v135_v37 }
  0xa1   :  { %v144_v38 = vpop.f32.mrf.mxu2  ;;  %v154_v39 = vpop.f32.mrf.mxu3 }
  0xa2   :  { %v145_v40 = vadd.f32 %v233_v9, %v144_v38  ;;  %v155_v41 = vadd.f32 %v233_v9, %v154_v39 }
  0xa4   :  { %168 = vst [vmem:[%s343_s3 + $0x58] sm:$0xff] %v145_v40 }
  0xa5   :  { %172 = vst [vmem:[%s343_s3 + $0x78] sm:$0xff] %v155_v41 }

// kernel: inception_c_forward.21
= control target key start
LH: loop header
LB: loop body
LE: loop exit
PB: predicated region body
PF: predicated region fallthrough
CT: control target
= control target key end

     0   :  { %s429_s9 = smov 0   ;;  %s515_s0 = inlined_call_operand.vmem [shape: f32[2,10,10,128], index: 0, kind: input, shape index: {}]   ;;  %s516_s1 = inlined_call_operand.vmem [shape: f32[1,128], index: 1, kind: input, shape index: {}]   ;;  %s517_s2 = inlined_call_operand.vmem [shape: f32[2,8,8,128], index: 2, kind: output, shape index: {}]  }
   0x1 LB: > { %s385_s10 = sadd.s32 4294967295, %s412_s9   ;;  %p389_p0 = scmp.ge.s32.totalorder %s412_s9, 1  ;;  %s412_s9 = sphi %s429_s9, %s12_s9  }
   0x2   : > { %p112_p1 = scmp.lt.s32.totalorder %s412_s9, 3 }
   0x4   : > { %p113_p2 = pnand %p389_p0, %p112_p1 }
   0x5   : > { %p134_p3 = scmp.lt.s32.totalorder (!%p113_p2), %s385_s10, 1 }
   0x6   : > { %116 = sbr.rel (%p113_p2) target bundleno = 53 (0x35), region = 28 }
   0xb   : > { %s519_s10 = smov (!%p134_p3, %s385_s10), 1  ;;  %vm184_vm0 = vcmask 1046528   ;;  %vm235_vm1 = vcmask 1045504   ;;  %v465_v42 = vld [vmem:[%s516_s1] ss:$0 sm:$0xff] }
   0xc   : > { %s396_s11 = smul.u32 160, %s519_s10  ;;  %s395_s17 = sshll.u32 %s519_s10, 6 }
   0xd   : > { %s479_s20 = scalar_lea.vmem %s517_s2, %s395_s17 }
   0xe   : > { %s443_s14 = scalar_lea.vmem %s515_s0, %s396_s11 }
   0xf   : > { %v144_v0 = vld [vmem:[%s443_s14] sm:$0xff]  ;;  %v145_v1 = vld [vmem:[%s443_s14 + $0x8] sm:$0x3]  ;;  %v146_v2 = vld [vmem:[%s443_s14 + $0x10] sm:$0xff] }
  0x10   : > { %v147_v3 = vld [vmem:[%s443_s14 + $0x18] sm:$0x3]  ;;  %v148_v4 = vld [vmem:[%s443_s14 + $0x20] sm:$0xff]  ;;  %v149_v5 = vld [vmem:[%s443_s14 + $0x28] sm:$0x3]  ;;  %v185_v6 = vrot.slane %v144_v0, 1 }
  0x11   : > { %v186_v7 = vrot.slane %v145_v1, 1  ;;  %v188_v8 = vrot.slane %v146_v2, 1  ;;  %v189_v9 = vrot.slane %v147_v3, 1  ;;  %v191_v10 = vrot.slane %v148_v4, 1  ;;  %v150_v15 = vld [vmem:[%s443_s14 + $0x30] sm:$0xff]  ;;  %v152_v25 = vld [vmem:[%s443_s14 + $0x40] sm:$0xff] }
  0x12   : > { %v192_v11 = vrot.slane %v149_v5, 1  ;;  %v236_v12 = vrot.slane %v144_v0, 2  ;;  %v237_v13 = vrot.slane %v145_v1, 2  ;;  %v239_v14 = vrot.slane %v146_v2, 2  ;;  %v151_v20 = vld [vmem:[%s443_s14 + $0x38] sm:$0x3] }
  0x13   : > { %v187_v16 = vsel %vm184_vm0, %v185_v6, %v186_v7  ;;  %v190_v17 = vsel %vm184_vm0, %v188_v8, %v189_v9  ;;  %v240_v18 = vrot.slane %v147_v3, 2  ;;  %v242_v19 = vrot.slane %v148_v4, 2  ;;  %v153_v26 = vld [vmem:[%s443_s14 + $0x48] sm:$0x3]  ;;  %v154_v39 = vld [vmem:[%s443_s14 + $0x50] sm:$0xff]  ;;  %v156_v50 = vld [vmem:[%s443_s14 + $0x60] sm:$0xff] }
  0x14   : > { %v193_v21 = vsel %vm184_vm0, %v191_v10, %v192_v11  ;;  %v225_v22 = vadd.f32 %v187_v16, %v144_v0  ;;  %v226_v23 = vadd.f32 %v190_v17, %v146_v2  ;;  %v238_v24 = vsel %vm235_vm1, %v236_v12, %v237_v13  ;;  %v155_v45 = vld [vmem:[%s443_s14 + $0x58] sm:$0x3]  ;;  %v157_v55 = vld [vmem:[%s443_s14 + $0x68] sm:$0x3] }
  0x15   : > { %v227_v27 = vadd.f32 %v193_v21, %v148_v4  ;;  %v241_v28 = vsel %vm235_vm1, %v239_v14, %v240_v18  ;;  %v243_v29 = vrot.slane %v149_v5, 2  ;;  %v194_v30 = vrot.slane %v150_v15, 1  ;;  %v158_v4 = vld [vmem:[%s443_s14 + $0x70] sm:$0xff]  ;;  %v159_v9 = vld [vmem:[%s443_s14 + $0x78] sm:$0x3]  ;;  %v160_v18 = vld [vmem:[%s443_s14 + $0x80] sm:$0xff] }
  0x16   : > { %v276_v31 = vadd.f32 %v238_v24, %v225_v22  ;;  %v277_v32 = vadd.f32 %v241_v28, %v226_v23  ;;  %v195_v33 = vrot.slane %v151_v20, 1  ;;  %v245_v34 = vrot.slane %v150_v15, 2  ;;  %v161_v23 = vld [vmem:[%s443_s14 + $0x88] sm:$0x3] }
  0x17   : > { %v244_v35 = vsel %vm235_vm1, %v242_v19, %v243_v29  ;;  %v246_v36 = vrot.slane %v151_v20, 2  ;;  %v197_v37 = vrot.slane %v152_v25, 1  ;;  %v198_v38 = vrot.slane %v153_v26, 1 }
  0x18   : > { %v278_v40 = vadd.f32 %v244_v35, %v227_v27  ;;  %v286_v41 = vadd.f32 %v277_v32, %v276_v31  ;;  %v196_v43 = vsel %vm184_vm0, %v194_v30, %v195_v33  ;;  %v248_v44 = vrot.slane %v152_v25, 2 }
  0x19   : > { %v228_v46 = vadd.f32 %v196_v43, %v150_v15  ;;  %v247_v47 = vsel %vm235_vm1, %v245_v34, %v246_v36  ;;  %v199_v48 = vsel %vm184_vm0, %v197_v37, %v198_v38  ;;  %v249_v49 = vrot.slane %v153_v26, 2  ;;  %v163_v37 = vld [vmem:[%s443_s14 + $0x98] sm:$0x3] }
  0x1a   : > { %v294_v51 = vadd.f32 %v286_v41, %v278_v40  ;;  %v287_v52 = vadd.f32 %v278_v40, %v277_v32  ;;  %v229_v53 = vadd.f32 %v199_v48, %v152_v25  ;;  %v200_v54 = vrot.slane %v154_v39, 1  ;;  %v162_v32 = vld [vmem:[%s443_s14 + $0x90] sm:$0xff] }
  0x1b   : > { %v279_v56 = vadd.f32 %v247_v47, %v228_v46  ;;  %v250_v57 = vsel %vm235_vm1, %v248_v44, %v249_v49  ;;  %v201_v58 = vrot.slane %v155_v45, 1  ;;  %v251_v59 = vrot.slane %v154_v39, 2 }
  0x1c   : > { %v306_v60 = vadd.f32 %v465_v42, %v294_v51  ;;  %v280_v61 = vadd.f32 %v250_v57, %v229_v53  ;;  %v252_v62 = vrot.slane %v155_v45, 2  ;;  %v203_v63 = vrot.slane %v156_v50, 1 }
  0x1d   : > { %v295_v0 = vadd.f32 %v287_v52, %v279_v56  ;;  %v288_v1 = vadd.f32 %v279_v56, %v278_v40  ;;  %v202_v2 = vsel %vm184_vm0, %v200_v54, %v201_v58  ;;  %v204_v3 = vrot.slane %v157_v55, 1 }
  0x1e   : > { %v314_v5 = vmax.f32 %v306_v60, 0.0  ;;  %v230_v6 = vadd.f32 %v202_v2, %v154_v39  ;;  %v253_v7 = vsel %vm235_vm1, %v251_v59, %v252_v62  ;;  %v289_v8 = vadd.f32 %v280_v61, %v279_v56 }
  0x1f   : > { %v307_v10 = vadd.f32 %v465_v42, %v295_v0  ;;  %v296_v11 = vadd.f32 %v288_v1, %v280_v61  ;;  %v205_v12 = vsel %vm184_vm0, %v203_v63, %v204_v3  ;;  %v254_v13 = vrot.slane %v156_v50, 2 }
  0x20   : > { %322 = vst [vmem:[%s479_s20] sm:$0xff] %v314_v5  ;;  %v281_v14 = vadd.f32 %v253_v7, %v230_v6  ;;  %v231_v15 = vadd.f32 %v205_v12, %v156_v50  ;;  %v255_v16 = vrot.slane %v157_v55, 2  ;;  %v206_v17 = vrot.slane %v158_v4, 1 }
  0x21   : > { %v315_v19 = vmax.f32 %v307_v10, 0.0  ;;  %v308_v20 = vadd.f32 %v465_v42, %v296_v11  ;;  %v207_v21 = vrot.slane %v159_v9, 1  ;;  %v257_v22 = vrot.slane %v158_v4, 2 }
  0x22   : > { %v297_v24 = vadd.f32 %v289_v8, %v281_v14  ;;  %v256_v25 = vsel %vm235_vm1, %v254_v13, %v255_v16  ;;  %v290_v26 = vadd.f32 %v281_v14, %v280_v61  ;;  %v258_v27 = vrot.slane %v159_v9, 2 }
  0x23   : > { %323 = vst [vmem:[%s479_s20 + $0x8] sm:$0xff] %v315_v19  ;;  %v316_v28 = vmax.f32 %v308_v20, 0.0  ;;  %v282_v29 = vadd.f32 %v256_v25, %v231_v15  ;;  %v208_v30 = vsel %vm184_vm0, %v206_v17, %v207_v21  ;;  %v209_v31 = vrot.slane %v160_v18, 1 }
  0x24   : > { %v309_v33 = vadd.f32 %v465_v42, %v297_v24  ;;  %v232_v34 = vadd.f32 %v208_v30, %v158_v4  ;;  %v259_v35 = vsel %vm235_vm1, %v257_v22, %v258_v27  ;;  %v210_v36 = vrot.slane %v161_v23, 1 }
  0x25   : > { %324 = vst [vmem:[%s479_s20 + $0x10] sm:$0xff] %v316_v28  ;;  %v298_v38 = vadd.f32 %v290_v26, %v282_v29  ;;  %v291_v39 = vadd.f32 %v282_v29, %v281_v14  ;;  %v260_v40 = vrot.slane %v160_v18, 2  ;;  %v261_v41 = vrot.slane %v161_v23, 2 }
  0x26   : > { %v317_v43 = vmax.f32 %v309_v33, 0.0  ;;  %v283_v44 = vadd.f32 %v259_v35, %v232_v34  ;;  %v211_v45 = vsel %vm184_vm0, %v209_v31, %v210_v36  ;;  %v212_v46 = vrot.slane %v162_v32, 1 }
  0x27   : > { %v310_v47 = vadd.f32 %v465_v42, %v298_v38  ;;  %v233_v48 = vadd.f32 %v211_v45, %v160_v18  ;;  %v262_v49 = vsel %vm235_vm1, %v260_v40, %v261_v41  ;;  %v213_v50 = vrot.slane %v163_v37, 1 }
  0x28   : > { %325 = vst [vmem:[%s479_s20 + $0x18] sm:$0xff] %v317_v43  ;;  %v299_v51 = vadd.f32 %v291_v39, %v283_v44  ;;  %v292_v52 = vadd.f32 %v283_v44, %v282_v29  ;;  %v263_v53 = vrot.slane %v162_v32, 2  ;;  %v264_v54 = vrot.slane %v163_v37, 2 }
  0x29   : > { %v318_v55 = vmax.f32 %v310_v47, 0.0  ;;  %v284_v56 = vadd.f32 %v262_v49, %v233_v48  ;;  %v214_v57 = vsel %vm184_vm0, %v212_v46, %v213_v50 }
  0x2a   : > { %v311_v58 = vadd.f32 %v465_v42, %v299_v51  ;;  %v234_v59 = vadd.f32 %v214_v57, %v162_v32  ;;  %v265_v60 = vsel %vm235_vm1, %v263_v53, %v264_v54 }
  0x2b   : > { %326 = vst [vmem:[%s479_s20 + $0x20] sm:$0xff] %v318_v55  ;;  %v300_v61 = vadd.f32 %v292_v52, %v284_v56  ;;  %v293_v62 = vadd.f32 %v284_v56, %v283_v44 }
  0x2c   : > { %v319_v63 = vmax.f32 %v311_v58, 0.0  ;;  %v285_v0 = vadd.f32 %v265_v60, %v234_v59 }
  0x2d   : > { %v312_v1 = vadd.f32 %v465_v42, %v300_v61 }
  0x2e   : > { %327 = vst [vmem:[%s479_s20 + $0x28] sm:$0xff] %v319_v63  ;;  %v301_v2 = vadd.f32 %v293_v62, %v285_v0 }
  0x2f   : > { %v320_v3 = vmax.f32 %v312_v1, 0.0 }
  0x30   : > { %v313_v4 = vadd.f32 %v465_v42, %v301_v2 }
  0x31   : > { %328 = vst [vmem:[%s479_s20 + $0x30] sm:$0xff] %v320_v3 }
  0x32   : > { %v321_v5 = vmax.f32 %v313_v4, 0.0 }
  0x34   : > { %329 = vst [vmem:[%s479_s20 + $0x38] sm:$0xff] %v321_v5 }
  0x35 PF: > { %s12_s9 = sadd.s32 1, %s412_s9  }
  0x36   : > { %p9_p4 = scmp.ge.s32.totalorder %s12_s9, 4  }
  0x38   :  { %11 = sbr.rel (!%p9_p4) target bundleno = 1 (0x1), region = 58 }

</bundles_post_ra>
